<compile_context>
chip_gen: v7x
topology: tpu7x:2x2x1
jax: 0.10.0
libtpu: 0.0.40
codegen_flags: <defaults>
</compile_context>

<pallas_src>
import functools

import jax
import jax.numpy as jnp
import numpy as np
from jax.experimental import pallas as pl
from jax.experimental.pallas import tpu as pltpu


# ------------------------------ Fused kernel ---------------------------------

def _fused_lstm_kernel(*refs, num_layers, seq_len, batch, hidden_p):
    """Full GeneralLSTM forward in one kernel (wavefront over layers/time).

    Ref layout (inputs, then output):
      refs[0]              x2d       (T*B, D_in)
      refs[1]              w_ih0^T   (D_in, 4*HP)   lane-padded per gate
      refs[2]              w_hh0^T   (HP,   4*HP)
      refs[3]              bias0     (1,    4*HP)   (= b_ih + b_hh, zero-padded)
      refs[4 + 2*(l-1)]    wcat_l    (2*HP, 4*HP)   = [w_ih_l^T ; w_hh_l^T]
      refs[5 + 2*(l-1)]    bias_l    (1,    4*HP)
      refs[base]           w_out^T   (HP, OP)
      refs[base+1]         b_out     (1,  OP)
      refs[base+2]         out       (T*B, OP)      single dense store
    """
    T, B, HP = seq_len, batch, hidden_p
    L = num_layers
    x_ref, wih0_ref, whh0_ref, b0_ref = refs[0], refs[1], refs[2], refs[3]
    upper = [(refs[4 + 2 * i], refs[5 + 2 * i]) for i in range(L - 1)]
    base = 4 + 2 * (L - 1)
    wout_ref, bout_ref, o_ref = refs[base], refs[base + 1], refs[base + 2]

    # Loop-invariant weight loads.
    whh0 = whh0_ref[...]                               # (HP, 4*HP)
    wcats = [w[...] for (w, _) in upper]               # (2*HP, 4*HP) each
    bups = [b[...] for (_, b) in upper]                # (1, 4*HP) each

    # Hoisted layer-0 input projection: one batched MXU matmul for all steps,
    # off the serial recurrence path (x is available upfront).
    gx0 = (jnp.dot(x_ref[...], wih0_ref[...], preferred_element_type=jnp.float32)
           + b0_ref[...])                              # (T*B, 4*HP)

    def cell(gates, c_prev):
        # PyTorch gate order: i, f, g, o.  Each slice is a full 128-lane tile.
        i_g = jax.nn.sigmoid(gates[:, 0 * HP:1 * HP])
        f_g = jax.nn.sigmoid(gates[:, 1 * HP:2 * HP])
        g_g = jnp.tanh(gates[:, 2 * HP:3 * HP])
        o_g = jax.nn.sigmoid(gates[:, 3 * HP:4 * HP])
        c_new = f_g * c_prev + i_g * g_g
        h_new = o_g * jnp.tanh(c_new)
        return h_new, c_new

    zero = jnp.zeros((B, HP), jnp.float32)
    h = [zero] * L
    c = [zero] * L
    top_outs = [None] * T

    # Wavefront: at wave w, layer l processes timestep t = w - l.  Layers are
    # visited top-down inside a wave, so h[l-1] still holds timestep w-l when
    # layer l reads it; cells on one wave are data-independent, so the
    # dependent chain is T+L-1 cells (not T*L) and the scheduler can overlap
    # them.  T and L are small -> static unroll, all slices static.
    for w in range(T + L - 1):
        for l in reversed(range(L)):
            t = w - l
            if 0 <= t < T:
                if l == 0:
                    gates = gx0[t * B:(t + 1) * B, :] + jnp.dot(
                        h[0], whh0, preferred_element_type=jnp.float32)
                else:
                    # Fused input + recurrent projection: one matmul per cell.
                    z = jnp.concatenate([h[l - 1], h[l]], axis=1)  # (B, 2*HP)
                    gates = jnp.dot(z, wcats[l - 1],
                                    preferred_element_type=jnp.float32) + bups[l - 1]
                h[l], c[l] = cell(gates, c[l])
                if l == L - 1:
                    top_outs[t] = h[l]

    # Fused Linear head + single lane-dense store of the whole output.
    y = jnp.concatenate(top_outs, axis=0)              # (T*B, HP)
    o_ref[...] = (jnp.dot(y, wout_ref[...], preferred_element_type=jnp.float32)
                  + bout_ref[...])


# ------------------------------ Wrapper ---------------------------------------

def _round_up(n, m):
    return ((n + m - 1) // m) * m


def _forward_impl(params, x):
    """x: (T, B, input_size) -> (T, B, output_size). Single fused pallas_call."""
    T, B, D = x.shape
    layers = params["layers"]
    L = len(layers)
    H = layers[0]["w_hh"].shape[1]
    O = params["w_out"].shape[0]
    HP = _round_up(H, 128)      # per-gate lane-padded width
    OP = _round_up(O, 128)      # lane-dense output width

    def pad_gate_cols(w):
        # (rows, 4H) -> (rows, 4*HP); gate k's real data at [k*HP : k*HP+H],
        # padded lanes are exactly zero (keeps padded h/c lanes at 0).
        rows = w.shape[0]
        out = jnp.zeros((rows, 4 * HP), jnp.float32)
        for k in range(4):
            out = out.at[:, k * HP:k * HP + H].set(w[:, k * H:(k + 1) * H])
        return out

    def pad_rows(w, rows_p):
        return jnp.zeros((rows_p,) + w.shape[1:], jnp.float32).at[:w.shape[0]].set(w)

    args = [x.reshape(T * B, D).astype(jnp.float32)]
    # Layer 0: separate input / recurrent weights (input projection is hoisted).
    l0 = layers[0]
    args += [pad_gate_cols(l0["w_ih"].T),                    # (D, 4*HP)
             pad_rows(pad_gate_cols(l0["w_hh"].T), HP),      # (HP, 4*HP)
             pad_gate_cols(l0["bias"])]                      # (1, 4*HP)
    # Upper layers: concatenated [w_ih^T ; w_hh^T] for a single fused matmul.
    for l in range(1, L):
        lay = layers[l]
        wih = pad_rows(pad_gate_cols(lay["w_ih"].T), HP)
        whh = pad_rows(pad_gate_cols(lay["w_hh"].T), HP)
        args += [jnp.concatenate([wih, whh], axis=0),        # (2*HP, 4*HP)
                 pad_gate_cols(lay["bias"])]                 # (1, 4*HP)
    # Linear head, padded to lane-dense output width.
    wout = jnp.zeros((HP, OP), jnp.float32).at[:H, :O].set(params["w_out"].T)
    bout = jnp.zeros((1, OP), jnp.float32).at[:, :O].set(params["b_out"])
    args += [wout, bout]

    kernel = functools.partial(
        _fused_lstm_kernel,
        num_layers=L, seq_len=T, batch=B, hidden_p=HP)

    outp = pl.pallas_call(
        kernel,
        out_shape=jax.ShapeDtypeStruct((T * B, OP), jnp.float32),
        in_specs=[pl.BlockSpec(memory_space=pltpu.MemorySpace.VMEM)] * len(args),
        out_specs=pl.BlockSpec(memory_space=pltpu.MemorySpace.VMEM),
    )(*args)
    return outp[:, :O].reshape(T, B, O)


general_lstm_forward = jax.jit(_forward_impl)


# ------------------------------ Parameter init --------------------------------

def init_params(key, input_size, hidden_size, num_layers, output_size):
    """Deterministic init mimicking PyTorch's U(-1/sqrt(H), 1/sqrt(H))."""
    params = {"layers": []}
    bound = 1.0 / np.sqrt(hidden_size)
    for layer in range(num_layers):
        d_in = input_size if layer == 0 else hidden_size
        key, k1, k2, k3, k4 = jax.random.split(key, 5)
        w_ih = jax.random.uniform(k1, (4 * hidden_size, d_in),
                                  jnp.float32, -bound, bound)
        w_hh = jax.random.uniform(k2, (4 * hidden_size, hidden_size),
                                  jnp.float32, -bound, bound)
        b_ih = jax.random.uniform(k3, (4 * hidden_size,),
                                  jnp.float32, -bound, bound)
        b_hh = jax.random.uniform(k4, (4 * hidden_size,),
                                  jnp.float32, -bound, bound)
        params["layers"].append(
            {"w_ih": w_ih, "w_hh": w_hh,
             "bias": (b_ih + b_hh).reshape(1, 4 * hidden_size)})
    key, k1, k2 = jax.random.split(key, 3)
    params["w_out"] = jax.random.uniform(k1, (output_size, hidden_size),
                                         jnp.float32, -bound, bound)
    params["b_out"] = jax.random.uniform(k2, (1, output_size),
                                         jnp.float32, -bound, bound)
    return params


# ------------------------------ Pure-JAX reference -----------------------------

def _ref_forward(params, x):
    h = x
    for layer in params["layers"]:
        w_ih, w_hh, bias = layer["w_ih"], layer["w_hh"], layer["bias"]
        H = w_hh.shape[1]
        B = h.shape[1]

        def step(carry, x_t):
            h_prev, c_prev = carry
            gates = x_t @ w_ih.T + h_prev @ w_hh.T + bias
            i_g = jax.nn.sigmoid(gates[:, 0 * H:1 * H])
            f_g = jax.nn.sigmoid(gates[:, 1 * H:2 * H])
            g_g = jnp.tanh(gates[:, 2 * H:3 * H])
            o_g = jax.nn.sigmoid(gates[:, 3 * H:4 * H])
            c_new = f_g * c_prev + i_g * g_g
            h_new = o_g * jnp.tanh(c_new)
            return (h_new, c_new), h_new

        init = (jnp.zeros((B, H), jnp.float32), jnp.zeros((B, H), jnp.float32))
        _, ys = jax.lax.scan(step, init, h)
        h = ys
    T, B, H = h.shape
    out = h.reshape(T * B, H) @ params["w_out"].T + params["b_out"]
    return out.reshape(T, B, -1)


# ------------------------------------ Main -------------------------------------

if __name__ == "__main__":
    INPUT_SIZE = 4
    HIDDEN_SIZE = 32
    NUM_LAYERS = 2
    OUTPUT_SIZE = 1
    SEQ_LEN = 8
    BATCH = 2

    key = jax.random.PRNGKey(0)
    key, pkey, xkey = jax.random.split(key, 3)
    params = init_params(pkey, INPUT_SIZE, HIDDEN_SIZE, NUM_LAYERS, OUTPUT_SIZE)
    x = jax.random.normal(xkey, (SEQ_LEN, BATCH, INPUT_SIZE), jnp.float32)

    out = jax.block_until_ready(general_lstm_forward(params, x))
    ref = jax.block_until_ready(_ref_forward(params, x))

    assert out.shape == (SEQ_LEN, BATCH, OUTPUT_SIZE), out.shape
    np.testing.assert_allclose(np.asarray(out), np.asarray(ref),
                               rtol=1e-5, atol=1e-5)

    print("KERNEL_OK")
</pallas_src>

<mosaic_0001>
module attributes {stable_mosaic.version = 11 : i64} {
  func.func @_fused_lstm_kernel(%arg0: memref<16x4xf32, #tpu.memory_space<vmem>>, %arg1: memref<4x512xf32, #tpu.memory_space<vmem>>, %arg2: memref<128x512xf32, #tpu.memory_space<vmem>>, %arg3: memref<1x512xf32, #tpu.memory_space<vmem>>, %arg4: memref<256x512xf32, #tpu.memory_space<vmem>>, %arg5: memref<1x512xf32, #tpu.memory_space<vmem>>, %arg6: memref<128x128xf32, #tpu.memory_space<vmem>>, %arg7: memref<1x128xf32, #tpu.memory_space<vmem>>, %arg8: memref<16x128xf32, #tpu.memory_space<vmem>>) attributes {dimension_semantics = [], scalar_prefetch = 0 : i64, scratch_operands = 0 : i64, tpu.core_type = #tpu.core_type<tc>} {
    %c0 = arith.constant 0 : index
    %c0_0 = arith.constant 0 : index
    %0 = vector.load %arg2[%c0, %c0_0] : memref<128x512xf32, #tpu.memory_space<vmem>>, vector<128x512xf32>
    %c0_1 = arith.constant 0 : index
    %c0_2 = arith.constant 0 : index
    %1 = vector.load %arg4[%c0_1, %c0_2] : memref<256x512xf32, #tpu.memory_space<vmem>>, vector<256x512xf32>
    %c0_3 = arith.constant 0 : index
    %c0_4 = arith.constant 0 : index
    %2 = vector.load %arg5[%c0_3, %c0_4] : memref<1x512xf32, #tpu.memory_space<vmem>>, vector<1x512xf32>
    %c0_5 = arith.constant 0 : index
    %c0_6 = arith.constant 0 : index
    %3 = vector.load %arg0[%c0_5, %c0_6] : memref<16x4xf32, #tpu.memory_space<vmem>>, vector<16x4xf32>
    %c0_7 = arith.constant 0 : index
    %c0_8 = arith.constant 0 : index
    %4 = vector.load %arg1[%c0_7, %c0_8] : memref<4x512xf32, #tpu.memory_space<vmem>>, vector<4x512xf32>
    %cst = arith.constant dense<0.000000e+00> : vector<16x512xf32>
    %5 = tpu.matmul %3, %4, %cst {dimension_numbers = #tpu.dot_dimension_numbers<[1], [0], [0], [1], [0, 0, 1, 1], [], []>} : vector<16x4xf32>, vector<4x512xf32>, vector<16x512xf32> -> vector<16x512xf32>
    %c0_9 = arith.constant 0 : index
    %c0_10 = arith.constant 0 : index
    %6 = vector.load %arg3[%c0_9, %c0_10] : memref<1x512xf32, #tpu.memory_space<vmem>>, vector<1x512xf32>
    %7 = vector.broadcast %6 : vector<1x512xf32> to vector<16x512xf32>
    %8 = arith.addf %5, %7 : vector<16x512xf32>
    %cst_11 = arith.constant 0.000000e+00 : f32
    %9 = vector.broadcast %cst_11 : f32 to vector<2x128xf32>
    %10 = vector.extract_strided_slice %8 {offsets = [0, 0], sizes = [2, 512], strides = [1, 1]} : vector<16x512xf32> to vector<2x512xf32>
    %cst_12 = arith.constant dense<0.000000e+00> : vector<2x512xf32>
    %11 = tpu.matmul %9, %0, %cst_12 {dimension_numbers = #tpu.dot_dimension_numbers<[1], [0], [0], [1], [0, 0, 1, 1], [], []>} : vector<2x128xf32>, vector<128x512xf32>, vector<2x512xf32> -> vector<2x512xf32>
    %12 = arith.addf %10, %11 : vector<2x512xf32>
    %13 = vector.extract_strided_slice %12 {offsets = [0, 0], sizes = [2, 128], strides = [1, 1]} : vector<2x512xf32> to vector<2x128xf32>
    %14 = arith.negf %13 : vector<2x128xf32>
    %15 = math.exp %14 : vector<2x128xf32>
    %cst_13 = arith.constant 1.000000e+00 : f32
    %16 = vector.broadcast %cst_13 : f32 to vector<2x128xf32>
    %17 = arith.addf %16, %15 : vector<2x128xf32>
    %18 = arith.divf %16, %17 : vector<2x128xf32>
    %19 = vector.extract_strided_slice %12 {offsets = [0, 128], sizes = [2, 128], strides = [1, 1]} : vector<2x512xf32> to vector<2x128xf32>
    %20 = arith.negf %19 : vector<2x128xf32>
    %21 = math.exp %20 : vector<2x128xf32>
    %cst_14 = arith.constant 1.000000e+00 : f32
    %22 = vector.broadcast %cst_14 : f32 to vector<2x128xf32>
    %23 = arith.addf %22, %21 : vector<2x128xf32>
    %24 = arith.divf %22, %23 : vector<2x128xf32>
    %25 = vector.extract_strided_slice %12 {offsets = [0, 256], sizes = [2, 128], strides = [1, 1]} : vector<2x512xf32> to vector<2x128xf32>
    %26 = math.tanh %25 : vector<2x128xf32>
    %27 = vector.extract_strided_slice %12 {offsets = [0, 384], sizes = [2, 128], strides = [1, 1]} : vector<2x512xf32> to vector<2x128xf32>
    %28 = arith.negf %27 : vector<2x128xf32>
    %29 = math.exp %28 : vector<2x128xf32>
    %cst_15 = arith.constant 1.000000e+00 : f32
    %30 = vector.broadcast %cst_15 : f32 to vector<2x128xf32>
    %31 = arith.addf %30, %29 : vector<2x128xf32>
    %32 = arith.divf %30, %31 : vector<2x128xf32>
    %33 = arith.mulf %24, %9 : vector<2x128xf32>
    %34 = arith.mulf %18, %26 : vector<2x128xf32>
    %35 = arith.addf %33, %34 : vector<2x128xf32>
    %36 = math.tanh %35 : vector<2x128xf32>
    %37 = arith.mulf %32, %36 : vector<2x128xf32>
    %38 = tpu.concatenate %37, %9 in 1 : vector<2x128xf32>, vector<2x128xf32> -> vector<2x256xf32>
    %cst_16 = arith.constant dense<0.000000e+00> : vector<2x512xf32>
    %39 = tpu.matmul %38, %1, %cst_16 {dimension_numbers = #tpu.dot_dimension_numbers<[1], [0], [0], [1], [0, 0, 1, 1], [], []>} : vector<2x256xf32>, vector<256x512xf32>, vector<2x512xf32> -> vector<2x512xf32>
    %40 = vector.broadcast %2 : vector<1x512xf32> to vector<2x512xf32>
    %41 = arith.addf %39, %40 : vector<2x512xf32>
    %42 = vector.extract_strided_slice %41 {offsets = [0, 0], sizes = [2, 128], strides = [1, 1]} : vector<2x512xf32> to vector<2x128xf32>
    %43 = arith.negf %42 : vector<2x128xf32>
    %44 = math.exp %43 : vector<2x128xf32>
    %cst_17 = arith.constant 1.000000e+00 : f32
    %45 = vector.broadcast %cst_17 : f32 to vector<2x128xf32>
    %46 = arith.addf %45, %44 : vector<2x128xf32>
    %47 = arith.divf %45, %46 : vector<2x128xf32>
    %48 = vector.extract_strided_slice %41 {offsets = [0, 128], sizes = [2, 128], strides = [1, 1]} : vector<2x512xf32> to vector<2x128xf32>
    %49 = arith.negf %48 : vector<2x128xf32>
    %50 = math.exp %49 : vector<2x128xf32>
    %cst_18 = arith.constant 1.000000e+00 : f32
    %51 = vector.broadcast %cst_18 : f32 to vector<2x128xf32>
    %52 = arith.addf %51, %50 : vector<2x128xf32>
    %53 = arith.divf %51, %52 : vector<2x128xf32>
    %54 = vector.extract_strided_slice %41 {offsets = [0, 256], sizes = [2, 128], strides = [1, 1]} : vector<2x512xf32> to vector<2x128xf32>
    %55 = math.tanh %54 : vector<2x128xf32>
    %56 = vector.extract_strided_slice %41 {offsets = [0, 384], sizes = [2, 128], strides = [1, 1]} : vector<2x512xf32> to vector<2x128xf32>
    %57 = arith.negf %56 : vector<2x128xf32>
    %58 = math.exp %57 : vector<2x128xf32>
    %cst_19 = arith.constant 1.000000e+00 : f32
    %59 = vector.broadcast %cst_19 : f32 to vector<2x128xf32>
    %60 = arith.addf %59, %58 : vector<2x128xf32>
    %61 = arith.divf %59, %60 : vector<2x128xf32>
    %62 = arith.mulf %53, %9 : vector<2x128xf32>
    %63 = arith.mulf %47, %55 : vector<2x128xf32>
    %64 = arith.addf %62, %63 : vector<2x128xf32>
    %65 = math.tanh %64 : vector<2x128xf32>
    %66 = arith.mulf %61, %65 : vector<2x128xf32>
    %67 = vector.extract_strided_slice %8 {offsets = [2, 0], sizes = [2, 512], strides = [1, 1]} : vector<16x512xf32> to vector<2x512xf32>
    %cst_20 = arith.constant dense<0.000000e+00> : vector<2x512xf32>
    %68 = tpu.matmul %37, %0, %cst_20 {dimension_numbers = #tpu.dot_dimension_numbers<[1], [0], [0], [1], [0, 0, 1, 1], [], []>} : vector<2x128xf32>, vector<128x512xf32>, vector<2x512xf32> -> vector<2x512xf32>
    %69 = arith.addf %67, %68 : vector<2x512xf32>
    %70 = vector.extract_strided_slice %69 {offsets = [0, 0], sizes = [2, 128], strides = [1, 1]} : vector<2x512xf32> to vector<2x128xf32>
    %71 = arith.negf %70 : vector<2x128xf32>
    %72 = math.exp %71 : vector<2x128xf32>
    %cst_21 = arith.constant 1.000000e+00 : f32
    %73 = vector.broadcast %cst_21 : f32 to vector<2x128xf32>
    %74 = arith.addf %73, %72 : vector<2x128xf32>
    %75 = arith.divf %73, %74 : vector<2x128xf32>
    %76 = vector.extract_strided_slice %69 {offsets = [0, 128], sizes = [2, 128], strides = [1, 1]} : vector<2x512xf32> to vector<2x128xf32>
    %77 = arith.negf %76 : vector<2x128xf32>
    %78 = math.exp %77 : vector<2x128xf32>
    %cst_22 = arith.constant 1.000000e+00 : f32
    %79 = vector.broadcast %cst_22 : f32 to vector<2x128xf32>
    %80 = arith.addf %79, %78 : vector<2x128xf32>
    %81 = arith.divf %79, %80 : vector<2x128xf32>
    %82 = vector.extract_strided_slice %69 {offsets = [0, 256], sizes = [2, 128], strides = [1, 1]} : vector<2x512xf32> to vector<2x128xf32>
    %83 = math.tanh %82 : vector<2x128xf32>
    %84 = vector.extract_strided_slice %69 {offsets = [0, 384], sizes = [2, 128], strides = [1, 1]} : vector<2x512xf32> to vector<2x128xf32>
    %85 = arith.negf %84 : vector<2x128xf32>
    %86 = math.exp %85 : vector<2x128xf32>
    %cst_23 = arith.constant 1.000000e+00 : f32
    %87 = vector.broadcast %cst_23 : f32 to vector<2x128xf32>
    %88 = arith.addf %87, %86 : vector<2x128xf32>
    %89 = arith.divf %87, %88 : vector<2x128xf32>
    %90 = arith.mulf %81, %35 : vector<2x128xf32>
    %91 = arith.mulf %75, %83 : vector<2x128xf32>
    %92 = arith.addf %90, %91 : vector<2x128xf32>
    %93 = math.tanh %92 : vector<2x128xf32>
    %94 = arith.mulf %89, %93 : vector<2x128xf32>
    %95 = tpu.concatenate %94, %66 in 1 : vector<2x128xf32>, vector<2x128xf32> -> vector<2x256xf32>
    %cst_24 = arith.constant dense<0.000000e+00> : vector<2x512xf32>
    %96 = tpu.matmul %95, %1, %cst_24 {dimension_numbers = #tpu.dot_dimension_numbers<[1], [0], [0], [1], [0, 0, 1, 1], [], []>} : vector<2x256xf32>, vector<256x512xf32>, vector<2x512xf32> -> vector<2x512xf32>
    %97 = vector.broadcast %2 : vector<1x512xf32> to vector<2x512xf32>
    %98 = arith.addf %96, %97 : vector<2x512xf32>
    %99 = vector.extract_strided_slice %98 {offsets = [0, 0], sizes = [2, 128], strides = [1, 1]} : vector<2x512xf32> to vector<2x128xf32>
    %100 = arith.negf %99 : vector<2x128xf32>
    %101 = math.exp %100 : vector<2x128xf32>
    %cst_25 = arith.constant 1.000000e+00 : f32
    %102 = vector.broadcast %cst_25 : f32 to vector<2x128xf32>
    %103 = arith.addf %102, %101 : vector<2x128xf32>
    %104 = arith.divf %102, %103 : vector<2x128xf32>
    %105 = vector.extract_strided_slice %98 {offsets = [0, 128], sizes = [2, 128], strides = [1, 1]} : vector<2x512xf32> to vector<2x128xf32>
    %106 = arith.negf %105 : vector<2x128xf32>
    %107 = math.exp %106 : vector<2x128xf32>
    %cst_26 = arith.constant 1.000000e+00 : f32
    %108 = vector.broadcast %cst_26 : f32 to vector<2x128xf32>
    %109 = arith.addf %108, %107 : vector<2x128xf32>
    %110 = arith.divf %108, %109 : vector<2x128xf32>
    %111 = vector.extract_strided_slice %98 {offsets = [0, 256], sizes = [2, 128], strides = [1, 1]} : vector<2x512xf32> to vector<2x128xf32>
    %112 = math.tanh %111 : vector<2x128xf32>
    %113 = vector.extract_strided_slice %98 {offsets = [0, 384], sizes = [2, 128], strides = [1, 1]} : vector<2x512xf32> to vector<2x128xf32>
    %114 = arith.negf %113 : vector<2x128xf32>
    %115 = math.exp %114 : vector<2x128xf32>
    %cst_27 = arith.constant 1.000000e+00 : f32
    %116 = vector.broadcast %cst_27 : f32 to vector<2x128xf32>
    %117 = arith.addf %116, %115 : vector<2x128xf32>
    %118 = arith.divf %116, %117 : vector<2x128xf32>
    %119 = arith.mulf %110, %64 : vector<2x128xf32>
    %120 = arith.mulf %104, %112 : vector<2x128xf32>
    %121 = arith.addf %119, %120 : vector<2x128xf32>
    %122 = math.tanh %121 : vector<2x128xf32>
    %123 = arith.mulf %118, %122 : vector<2x128xf32>
    %124 = vector.extract_strided_slice %8 {offsets = [4, 0], sizes = [2, 512], strides = [1, 1]} : vector<16x512xf32> to vector<2x512xf32>
    %cst_28 = arith.constant dense<0.000000e+00> : vector<2x512xf32>
    %125 = tpu.matmul %94, %0, %cst_28 {dimension_numbers = #tpu.dot_dimension_numbers<[1], [0], [0], [1], [0, 0, 1, 1], [], []>} : vector<2x128xf32>, vector<128x512xf32>, vector<2x512xf32> -> vector<2x512xf32>
    %126 = arith.addf %124, %125 : vector<2x512xf32>
    %127 = vector.extract_strided_slice %126 {offsets = [0, 0], sizes = [2, 128], strides = [1, 1]} : vector<2x512xf32> to vector<2x128xf32>
    %128 = arith.negf %127 : vector<2x128xf32>
    %129 = math.exp %128 : vector<2x128xf32>
    %cst_29 = arith.constant 1.000000e+00 : f32
    %130 = vector.broadcast %cst_29 : f32 to vector<2x128xf32>
    %131 = arith.addf %130, %129 : vector<2x128xf32>
    %132 = arith.divf %130, %131 : vector<2x128xf32>
    %133 = vector.extract_strided_slice %126 {offsets = [0, 128], sizes = [2, 128], strides = [1, 1]} : vector<2x512xf32> to vector<2x128xf32>
    %134 = arith.negf %133 : vector<2x128xf32>
    %135 = math.exp %134 : vector<2x128xf32>
    %cst_30 = arith.constant 1.000000e+00 : f32
    %136 = vector.broadcast %cst_30 : f32 to vector<2x128xf32>
    %137 = arith.addf %136, %135 : vector<2x128xf32>
    %138 = arith.divf %136, %137 : vector<2x128xf32>
    %139 = vector.extract_strided_slice %126 {offsets = [0, 256], sizes = [2, 128], strides = [1, 1]} : vector<2x512xf32> to vector<2x128xf32>
    %140 = math.tanh %139 : vector<2x128xf32>
    %141 = vector.extract_strided_slice %126 {offsets = [0, 384], sizes = [2, 128], strides = [1, 1]} : vector<2x512xf32> to vector<2x128xf32>
    %142 = arith.negf %141 : vector<2x128xf32>
    %143 = math.exp %142 : vector<2x128xf32>
    %cst_31 = arith.constant 1.000000e+00 : f32
    %144 = vector.broadcast %cst_31 : f32 to vector<2x128xf32>
    %145 = arith.addf %144, %143 : vector<2x128xf32>
    %146 = arith.divf %144, %145 : vector<2x128xf32>
    %147 = arith.mulf %138, %92 : vector<2x128xf32>
    %148 = arith.mulf %132, %140 : vector<2x128xf32>
    %149 = arith.addf %147, %148 : vector<2x128xf32>
    %150 = math.tanh %149 : vector<2x128xf32>
    %151 = arith.mulf %146, %150 : vector<2x128xf32>
    %152 = tpu.concatenate %151, %123 in 1 : vector<2x128xf32>, vector<2x128xf32> -> vector<2x256xf32>
    %cst_32 = arith.constant dense<0.000000e+00> : vector<2x512xf32>
    %153 = tpu.matmul %152, %1, %cst_32 {dimension_numbers = #tpu.dot_dimension_numbers<[1], [0], [0], [1], [0, 0, 1, 1], [], []>} : vector<2x256xf32>, vector<256x512xf32>, vector<2x512xf32> -> vector<2x512xf32>
    %154 = vector.broadcast %2 : vector<1x512xf32> to vector<2x512xf32>
    %155 = arith.addf %153, %154 : vector<2x512xf32>
    %156 = vector.extract_strided_slice %155 {offsets = [0, 0], sizes = [2, 128], strides = [1, 1]} : vector<2x512xf32> to vector<2x128xf32>
    %157 = arith.negf %156 : vector<2x128xf32>
    %158 = math.exp %157 : vector<2x128xf32>
    %cst_33 = arith.constant 1.000000e+00 : f32
    %159 = vector.broadcast %cst_33 : f32 to vector<2x128xf32>
    %160 = arith.addf %159, %158 : vector<2x128xf32>
    %161 = arith.divf %159, %160 : vector<2x128xf32>
    %162 = vector.extract_strided_slice %155 {offsets = [0, 128], sizes = [2, 128], strides = [1, 1]} : vector<2x512xf32> to vector<2x128xf32>
    %163 = arith.negf %162 : vector<2x128xf32>
    %164 = math.exp %163 : vector<2x128xf32>
    %cst_34 = arith.constant 1.000000e+00 : f32
    %165 = vector.broadcast %cst_34 : f32 to vector<2x128xf32>
    %166 = arith.addf %165, %164 : vector<2x128xf32>
    %167 = arith.divf %165, %166 : vector<2x128xf32>
    %168 = vector.extract_strided_slice %155 {offsets = [0, 256], sizes = [2, 128], strides = [1, 1]} : vector<2x512xf32> to vector<2x128xf32>
    %169 = math.tanh %168 : vector<2x128xf32>
    %170 = vector.extract_strided_slice %155 {offsets = [0, 384], sizes = [2, 128], strides = [1, 1]} : vector<2x512xf32> to vector<2x128xf32>
    %171 = arith.negf %170 : vector<2x128xf32>
    %172 = math.exp %171 : vector<2x128xf32>
    %cst_35 = arith.constant 1.000000e+00 : f32
    %173 = vector.broadcast %cst_35 : f32 to vector<2x128xf32>
    %174 = arith.addf %173, %172 : vector<2x128xf32>
    %175 = arith.divf %173, %174 : vector<2x128xf32>
    %176 = arith.mulf %167, %121 : vector<2x128xf32>
    %177 = arith.mulf %161, %169 : vector<2x128xf32>
    %178 = arith.addf %176, %177 : vector<2x128xf32>
    %179 = math.tanh %178 : vector<2x128xf32>
    %180 = arith.mulf %175, %179 : vector<2x128xf32>
    %181 = vector.extract_strided_slice %8 {offsets = [6, 0], sizes = [2, 512], strides = [1, 1]} : vector<16x512xf32> to vector<2x512xf32>
    %cst_36 = arith.constant dense<0.000000e+00> : vector<2x512xf32>
    %182 = tpu.matmul %151, %0, %cst_36 {dimension_numbers = #tpu.dot_dimension_numbers<[1], [0], [0], [1], [0, 0, 1, 1], [], []>} : vector<2x128xf32>, vector<128x512xf32>, vector<2x512xf32> -> vector<2x512xf32>
    %183 = arith.addf %181, %182 : vector<2x512xf32>
    %184 = vector.extract_strided_slice %183 {offsets = [0, 0], sizes = [2, 128], strides = [1, 1]} : vector<2x512xf32> to vector<2x128xf32>
    %185 = arith.negf %184 : vector<2x128xf32>
    %186 = math.exp %185 : vector<2x128xf32>
    %cst_37 = arith.constant 1.000000e+00 : f32
    %187 = vector.broadcast %cst_37 : f32 to vector<2x128xf32>
    %188 = arith.addf %187, %186 : vector<2x128xf32>
    %189 = arith.divf %187, %188 : vector<2x128xf32>
    %190 = vector.extract_strided_slice %183 {offsets = [0, 128], sizes = [2, 128], strides = [1, 1]} : vector<2x512xf32> to vector<2x128xf32>
    %191 = arith.negf %190 : vector<2x128xf32>
    %192 = math.exp %191 : vector<2x128xf32>
    %cst_38 = arith.constant 1.000000e+00 : f32
    %193 = vector.broadcast %cst_38 : f32 to vector<2x128xf32>
    %194 = arith.addf %193, %192 : vector<2x128xf32>
    %195 = arith.divf %193, %194 : vector<2x128xf32>
    %196 = vector.extract_strided_slice %183 {offsets = [0, 256], sizes = [2, 128], strides = [1, 1]} : vector<2x512xf32> to vector<2x128xf32>
    %197 = math.tanh %196 : vector<2x128xf32>
    %198 = vector.extract_strided_slice %183 {offsets = [0, 384], sizes = [2, 128], strides = [1, 1]} : vector<2x512xf32> to vector<2x128xf32>
    %199 = arith.negf %198 : vector<2x128xf32>
    %200 = math.exp %199 : vector<2x128xf32>
    %cst_39 = arith.constant 1.000000e+00 : f32
    %201 = vector.broadcast %cst_39 : f32 to vector<2x128xf32>
    %202 = arith.addf %201, %200 : vector<2x128xf32>
    %203 = arith.divf %201, %202 : vector<2x128xf32>
    %204 = arith.mulf %195, %149 : vector<2x128xf32>
    %205 = arith.mulf %189, %197 : vector<2x128xf32>
    %206 = arith.addf %204, %205 : vector<2x128xf32>
    %207 = math.tanh %206 : vector<2x128xf32>
    %208 = arith.mulf %203, %207 : vector<2x128xf32>
    %209 = tpu.concatenate %208, %180 in 1 : vector<2x128xf32>, vector<2x128xf32> -> vector<2x256xf32>
    %cst_40 = arith.constant dense<0.000000e+00> : vector<2x512xf32>
    %210 = tpu.matmul %209, %1, %cst_40 {dimension_numbers = #tpu.dot_dimension_numbers<[1], [0], [0], [1], [0, 0, 1, 1], [], []>} : vector<2x256xf32>, vector<256x512xf32>, vector<2x512xf32> -> vector<2x512xf32>
    %211 = vector.broadcast %2 : vector<1x512xf32> to vector<2x512xf32>
    %212 = arith.addf %210, %211 : vector<2x512xf32>
    %213 = vector.extract_strided_slice %212 {offsets = [0, 0], sizes = [2, 128], strides = [1, 1]} : vector<2x512xf32> to vector<2x128xf32>
    %214 = arith.negf %213 : vector<2x128xf32>
    %215 = math.exp %214 : vector<2x128xf32>
    %cst_41 = arith.constant 1.000000e+00 : f32
    %216 = vector.broadcast %cst_41 : f32 to vector<2x128xf32>
    %217 = arith.addf %216, %215 : vector<2x128xf32>
    %218 = arith.divf %216, %217 : vector<2x128xf32>
    %219 = vector.extract_strided_slice %212 {offsets = [0, 128], sizes = [2, 128], strides = [1, 1]} : vector<2x512xf32> to vector<2x128xf32>
    %220 = arith.negf %219 : vector<2x128xf32>
    %221 = math.exp %220 : vector<2x128xf32>
    %cst_42 = arith.constant 1.000000e+00 : f32
    %222 = vector.broadcast %cst_42 : f32 to vector<2x128xf32>
    %223 = arith.addf %222, %221 : vector<2x128xf32>
    %224 = arith.divf %222, %223 : vector<2x128xf32>
    %225 = vector.extract_strided_slice %212 {offsets = [0, 256], sizes = [2, 128], strides = [1, 1]} : vector<2x512xf32> to vector<2x128xf32>
    %226 = math.tanh %225 : vector<2x128xf32>
    %227 = vector.extract_strided_slice %212 {offsets = [0, 384], sizes = [2, 128], strides = [1, 1]} : vector<2x512xf32> to vector<2x128xf32>
    %228 = arith.negf %227 : vector<2x128xf32>
    %229 = math.exp %228 : vector<2x128xf32>
    %cst_43 = arith.constant 1.000000e+00 : f32
    %230 = vector.broadcast %cst_43 : f32 to vector<2x128xf32>
    %231 = arith.addf %230, %229 : vector<2x128xf32>
    %232 = arith.divf %230, %231 : vector<2x128xf32>
    %233 = arith.mulf %224, %178 : vector<2x128xf32>
    %234 = arith.mulf %218, %226 : vector<2x128xf32>
    %235 = arith.addf %233, %234 : vector<2x128xf32>
    %236 = math.tanh %235 : vector<2x128xf32>
    %237 = arith.mulf %232, %236 : vector<2x128xf32>
    %238 = vector.extract_strided_slice %8 {offsets = [8, 0], sizes = [2, 512], strides = [1, 1]} : vector<16x512xf32> to vector<2x512xf32>
    %cst_44 = arith.constant dense<0.000000e+00> : vector<2x512xf32>
    %239 = tpu.matmul %208, %0, %cst_44 {dimension_numbers = #tpu.dot_dimension_numbers<[1], [0], [0], [1], [0, 0, 1, 1], [], []>} : vector<2x128xf32>, vector<128x512xf32>, vector<2x512xf32> -> vector<2x512xf32>
    %240 = arith.addf %238, %239 : vector<2x512xf32>
    %241 = vector.extract_strided_slice %240 {offsets = [0, 0], sizes = [2, 128], strides = [1, 1]} : vector<2x512xf32> to vector<2x128xf32>
    %242 = arith.negf %241 : vector<2x128xf32>
    %243 = math.exp %242 : vector<2x128xf32>
    %cst_45 = arith.constant 1.000000e+00 : f32
    %244 = vector.broadcast %cst_45 : f32 to vector<2x128xf32>
    %245 = arith.addf %244, %243 : vector<2x128xf32>
    %246 = arith.divf %244, %245 : vector<2x128xf32>
    %247 = vector.extract_strided_slice %240 {offsets = [0, 128], sizes = [2, 128], strides = [1, 1]} : vector<2x512xf32> to vector<2x128xf32>
    %248 = arith.negf %247 : vector<2x128xf32>
    %249 = math.exp %248 : vector<2x128xf32>
    %cst_46 = arith.constant 1.000000e+00 : f32
    %250 = vector.broadcast %cst_46 : f32 to vector<2x128xf32>
    %251 = arith.addf %250, %249 : vector<2x128xf32>
    %252 = arith.divf %250, %251 : vector<2x128xf32>
    %253 = vector.extract_strided_slice %240 {offsets = [0, 256], sizes = [2, 128], strides = [1, 1]} : vector<2x512xf32> to vector<2x128xf32>
    %254 = math.tanh %253 : vector<2x128xf32>
    %255 = vector.extract_strided_slice %240 {offsets = [0, 384], sizes = [2, 128], strides = [1, 1]} : vector<2x512xf32> to vector<2x128xf32>
    %256 = arith.negf %255 : vector<2x128xf32>
    %257 = math.exp %256 : vector<2x128xf32>
    %cst_47 = arith.constant 1.000000e+00 : f32
    %258 = vector.broadcast %cst_47 : f32 to vector<2x128xf32>
    %259 = arith.addf %258, %257 : vector<2x128xf32>
    %260 = arith.divf %258, %259 : vector<2x128xf32>
    %261 = arith.mulf %252, %206 : vector<2x128xf32>
    %262 = arith.mulf %246, %254 : vector<2x128xf32>
    %263 = arith.addf %261, %262 : vector<2x128xf32>
    %264 = math.tanh %263 : vector<2x128xf32>
    %265 = arith.mulf %260, %264 : vector<2x128xf32>
    %266 = tpu.concatenate %265, %237 in 1 : vector<2x128xf32>, vector<2x128xf32> -> vector<2x256xf32>
    %cst_48 = arith.constant dense<0.000000e+00> : vector<2x512xf32>
    %267 = tpu.matmul %266, %1, %cst_48 {dimension_numbers = #tpu.dot_dimension_numbers<[1], [0], [0], [1], [0, 0, 1, 1], [], []>} : vector<2x256xf32>, vector<256x512xf32>, vector<2x512xf32> -> vector<2x512xf32>
    %268 = vector.broadcast %2 : vector<1x512xf32> to vector<2x512xf32>
    %269 = arith.addf %267, %268 : vector<2x512xf32>
    %270 = vector.extract_strided_slice %269 {offsets = [0, 0], sizes = [2, 128], strides = [1, 1]} : vector<2x512xf32> to vector<2x128xf32>
    %271 = arith.negf %270 : vector<2x128xf32>
    %272 = math.exp %271 : vector<2x128xf32>
    %cst_49 = arith.constant 1.000000e+00 : f32
    %273 = vector.broadcast %cst_49 : f32 to vector<2x128xf32>
    %274 = arith.addf %273, %272 : vector<2x128xf32>
    %275 = arith.divf %273, %274 : vector<2x128xf32>
    %276 = vector.extract_strided_slice %269 {offsets = [0, 128], sizes = [2, 128], strides = [1, 1]} : vector<2x512xf32> to vector<2x128xf32>
    %277 = arith.negf %276 : vector<2x128xf32>
    %278 = math.exp %277 : vector<2x128xf32>
    %cst_50 = arith.constant 1.000000e+00 : f32
    %279 = vector.broadcast %cst_50 : f32 to vector<2x128xf32>
    %280 = arith.addf %279, %278 : vector<2x128xf32>
    %281 = arith.divf %279, %280 : vector<2x128xf32>
    %282 = vector.extract_strided_slice %269 {offsets = [0, 256], sizes = [2, 128], strides = [1, 1]} : vector<2x512xf32> to vector<2x128xf32>
    %283 = math.tanh %282 : vector<2x128xf32>
    %284 = vector.extract_strided_slice %269 {offsets = [0, 384], sizes = [2, 128], strides = [1, 1]} : vector<2x512xf32> to vector<2x128xf32>
    %285 = arith.negf %284 : vector<2x128xf32>
    %286 = math.exp %285 : vector<2x128xf32>
    %cst_51 = arith.constant 1.000000e+00 : f32
    %287 = vector.broadcast %cst_51 : f32 to vector<2x128xf32>
    %288 = arith.addf %287, %286 : vector<2x128xf32>
    %289 = arith.divf %287, %288 : vector<2x128xf32>
    %290 = arith.mulf %281, %235 : vector<2x128xf32>
    %291 = arith.mulf %275, %283 : vector<2x128xf32>
    %292 = arith.addf %290, %291 : vector<2x128xf32>
    %293 = math.tanh %292 : vector<2x128xf32>
    %294 = arith.mulf %289, %293 : vector<2x128xf32>
    %295 = vector.extract_strided_slice %8 {offsets = [10, 0], sizes = [2, 512], strides = [1, 1]} : vector<16x512xf32> to vector<2x512xf32>
    %cst_52 = arith.constant dense<0.000000e+00> : vector<2x512xf32>
    %296 = tpu.matmul %265, %0, %cst_52 {dimension_numbers = #tpu.dot_dimension_numbers<[1], [0], [0], [1], [0, 0, 1, 1], [], []>} : vector<2x128xf32>, vector<128x512xf32>, vector<2x512xf32> -> vector<2x512xf32>
    %297 = arith.addf %295, %296 : vector<2x512xf32>
    %298 = vector.extract_strided_slice %297 {offsets = [0, 0], sizes = [2, 128], strides = [1, 1]} : vector<2x512xf32> to vector<2x128xf32>
    %299 = arith.negf %298 : vector<2x128xf32>
    %300 = math.exp %299 : vector<2x128xf32>
    %cst_53 = arith.constant 1.000000e+00 : f32
    %301 = vector.broadcast %cst_53 : f32 to vector<2x128xf32>
    %302 = arith.addf %301, %300 : vector<2x128xf32>
    %303 = arith.divf %301, %302 : vector<2x128xf32>
    %304 = vector.extract_strided_slice %297 {offsets = [0, 128], sizes = [2, 128], strides = [1, 1]} : vector<2x512xf32> to vector<2x128xf32>
    %305 = arith.negf %304 : vector<2x128xf32>
    %306 = math.exp %305 : vector<2x128xf32>
    %cst_54 = arith.constant 1.000000e+00 : f32
    %307 = vector.broadcast %cst_54 : f32 to vector<2x128xf32>
    %308 = arith.addf %307, %306 : vector<2x128xf32>
    %309 = arith.divf %307, %308 : vector<2x128xf32>
    %310 = vector.extract_strided_slice %297 {offsets = [0, 256], sizes = [2, 128], strides = [1, 1]} : vector<2x512xf32> to vector<2x128xf32>
    %311 = math.tanh %310 : vector<2x128xf32>
    %312 = vector.extract_strided_slice %297 {offsets = [0, 384], sizes = [2, 128], strides = [1, 1]} : vector<2x512xf32> to vector<2x128xf32>
    %313 = arith.negf %312 : vector<2x128xf32>
    %314 = math.exp %313 : vector<2x128xf32>
    %cst_55 = arith.constant 1.000000e+00 : f32
    %315 = vector.broadcast %cst_55 : f32 to vector<2x128xf32>
    %316 = arith.addf %315, %314 : vector<2x128xf32>
    %317 = arith.divf %315, %316 : vector<2x128xf32>
    %318 = arith.mulf %309, %263 : vector<2x128xf32>
    %319 = arith.mulf %303, %311 : vector<2x128xf32>
    %320 = arith.addf %318, %319 : vector<2x128xf32>
    %321 = math.tanh %320 : vector<2x128xf32>
    %322 = arith.mulf %317, %321 : vector<2x128xf32>
    %323 = tpu.concatenate %322, %294 in 1 : vector<2x128xf32>, vector<2x128xf32> -> vector<2x256xf32>
    %cst_56 = arith.constant dense<0.000000e+00> : vector<2x512xf32>
    %324 = tpu.matmul %323, %1, %cst_56 {dimension_numbers = #tpu.dot_dimension_numbers<[1], [0], [0], [1], [0, 0, 1, 1], [], []>} : vector<2x256xf32>, vector<256x512xf32>, vector<2x512xf32> -> vector<2x512xf32>
    %325 = vector.broadcast %2 : vector<1x512xf32> to vector<2x512xf32>
    %326 = arith.addf %324, %325 : vector<2x512xf32>
    %327 = vector.extract_strided_slice %326 {offsets = [0, 0], sizes = [2, 128], strides = [1, 1]} : vector<2x512xf32> to vector<2x128xf32>
    %328 = arith.negf %327 : vector<2x128xf32>
    %329 = math.exp %328 : vector<2x128xf32>
    %cst_57 = arith.constant 1.000000e+00 : f32
    %330 = vector.broadcast %cst_57 : f32 to vector<2x128xf32>
    %331 = arith.addf %330, %329 : vector<2x128xf32>
    %332 = arith.divf %330, %331 : vector<2x128xf32>
    %333 = vector.extract_strided_slice %326 {offsets = [0, 128], sizes = [2, 128], strides = [1, 1]} : vector<2x512xf32> to vector<2x128xf32>
    %334 = arith.negf %333 : vector<2x128xf32>
    %335 = math.exp %334 : vector<2x128xf32>
    %cst_58 = arith.constant 1.000000e+00 : f32
    %336 = vector.broadcast %cst_58 : f32 to vector<2x128xf32>
    %337 = arith.addf %336, %335 : vector<2x128xf32>
    %338 = arith.divf %336, %337 : vector<2x128xf32>
    %339 = vector.extract_strided_slice %326 {offsets = [0, 256], sizes = [2, 128], strides = [1, 1]} : vector<2x512xf32> to vector<2x128xf32>
    %340 = math.tanh %339 : vector<2x128xf32>
    %341 = vector.extract_strided_slice %326 {offsets = [0, 384], sizes = [2, 128], strides = [1, 1]} : vector<2x512xf32> to vector<2x128xf32>
    %342 = arith.negf %341 : vector<2x128xf32>
    %343 = math.exp %342 : vector<2x128xf32>
    %cst_59 = arith.constant 1.000000e+00 : f32
    %344 = vector.broadcast %cst_59 : f32 to vector<2x128xf32>
    %345 = arith.addf %344, %343 : vector<2x128xf32>
    %346 = arith.divf %344, %345 : vector<2x128xf32>
    %347 = arith.mulf %338, %292 : vector<2x128xf32>
    %348 = arith.mulf %332, %340 : vector<2x128xf32>
    %349 = arith.addf %347, %348 : vector<2x128xf32>
    %350 = math.tanh %349 : vector<2x128xf32>
    %351 = arith.mulf %346, %350 : vector<2x128xf32>
    %352 = vector.extract_strided_slice %8 {offsets = [12, 0], sizes = [2, 512], strides = [1, 1]} : vector<16x512xf32> to vector<2x512xf32>
    %cst_60 = arith.constant dense<0.000000e+00> : vector<2x512xf32>
    %353 = tpu.matmul %322, %0, %cst_60 {dimension_numbers = #tpu.dot_dimension_numbers<[1], [0], [0], [1], [0, 0, 1, 1], [], []>} : vector<2x128xf32>, vector<128x512xf32>, vector<2x512xf32> -> vector<2x512xf32>
    %354 = arith.addf %352, %353 : vector<2x512xf32>
    %355 = vector.extract_strided_slice %354 {offsets = [0, 0], sizes = [2, 128], strides = [1, 1]} : vector<2x512xf32> to vector<2x128xf32>
    %356 = arith.negf %355 : vector<2x128xf32>
    %357 = math.exp %356 : vector<2x128xf32>
    %cst_61 = arith.constant 1.000000e+00 : f32
    %358 = vector.broadcast %cst_61 : f32 to vector<2x128xf32>
    %359 = arith.addf %358, %357 : vector<2x128xf32>
    %360 = arith.divf %358, %359 : vector<2x128xf32>
    %361 = vector.extract_strided_slice %354 {offsets = [0, 128], sizes = [2, 128], strides = [1, 1]} : vector<2x512xf32> to vector<2x128xf32>
    %362 = arith.negf %361 : vector<2x128xf32>
    %363 = math.exp %362 : vector<2x128xf32>
    %cst_62 = arith.constant 1.000000e+00 : f32
    %364 = vector.broadcast %cst_62 : f32 to vector<2x128xf32>
    %365 = arith.addf %364, %363 : vector<2x128xf32>
    %366 = arith.divf %364, %365 : vector<2x128xf32>
    %367 = vector.extract_strided_slice %354 {offsets = [0, 256], sizes = [2, 128], strides = [1, 1]} : vector<2x512xf32> to vector<2x128xf32>
    %368 = math.tanh %367 : vector<2x128xf32>
    %369 = vector.extract_strided_slice %354 {offsets = [0, 384], sizes = [2, 128], strides = [1, 1]} : vector<2x512xf32> to vector<2x128xf32>
    %370 = arith.negf %369 : vector<2x128xf32>
    %371 = math.exp %370 : vector<2x128xf32>
    %cst_63 = arith.constant 1.000000e+00 : f32
    %372 = vector.broadcast %cst_63 : f32 to vector<2x128xf32>
    %373 = arith.addf %372, %371 : vector<2x128xf32>
    %374 = arith.divf %372, %373 : vector<2x128xf32>
    %375 = arith.mulf %366, %320 : vector<2x128xf32>
    %376 = arith.mulf %360, %368 : vector<2x128xf32>
    %377 = arith.addf %375, %376 : vector<2x128xf32>
    %378 = math.tanh %377 : vector<2x128xf32>
    %379 = arith.mulf %374, %378 : vector<2x128xf32>
    %380 = tpu.concatenate %379, %351 in 1 : vector<2x128xf32>, vector<2x128xf32> -> vector<2x256xf32>
    %cst_64 = arith.constant dense<0.000000e+00> : vector<2x512xf32>
    %381 = tpu.matmul %380, %1, %cst_64 {dimension_numbers = #tpu.dot_dimension_numbers<[1], [0], [0], [1], [0, 0, 1, 1], [], []>} : vector<2x256xf32>, vector<256x512xf32>, vector<2x512xf32> -> vector<2x512xf32>
    %382 = vector.broadcast %2 : vector<1x512xf32> to vector<2x512xf32>
    %383 = arith.addf %381, %382 : vector<2x512xf32>
    %384 = vector.extract_strided_slice %383 {offsets = [0, 0], sizes = [2, 128], strides = [1, 1]} : vector<2x512xf32> to vector<2x128xf32>
    %385 = arith.negf %384 : vector<2x128xf32>
    %386 = math.exp %385 : vector<2x128xf32>
    %cst_65 = arith.constant 1.000000e+00 : f32
    %387 = vector.broadcast %cst_65 : f32 to vector<2x128xf32>
    %388 = arith.addf %387, %386 : vector<2x128xf32>
    %389 = arith.divf %387, %388 : vector<2x128xf32>
    %390 = vector.extract_strided_slice %383 {offsets = [0, 128], sizes = [2, 128], strides = [1, 1]} : vector<2x512xf32> to vector<2x128xf32>
    %391 = arith.negf %390 : vector<2x128xf32>
    %392 = math.exp %391 : vector<2x128xf32>
    %cst_66 = arith.constant 1.000000e+00 : f32
    %393 = vector.broadcast %cst_66 : f32 to vector<2x128xf32>
    %394 = arith.addf %393, %392 : vector<2x128xf32>
    %395 = arith.divf %393, %394 : vector<2x128xf32>
    %396 = vector.extract_strided_slice %383 {offsets = [0, 256], sizes = [2, 128], strides = [1, 1]} : vector<2x512xf32> to vector<2x128xf32>
    %397 = math.tanh %396 : vector<2x128xf32>
    %398 = vector.extract_strided_slice %383 {offsets = [0, 384], sizes = [2, 128], strides = [1, 1]} : vector<2x512xf32> to vector<2x128xf32>
    %399 = arith.negf %398 : vector<2x128xf32>
    %400 = math.exp %399 : vector<2x128xf32>
    %cst_67 = arith.constant 1.000000e+00 : f32
    %401 = vector.broadcast %cst_67 : f32 to vector<2x128xf32>
    %402 = arith.addf %401, %400 : vector<2x128xf32>
    %403 = arith.divf %401, %402 : vector<2x128xf32>
    %404 = arith.mulf %395, %349 : vector<2x128xf32>
    %405 = arith.mulf %389, %397 : vector<2x128xf32>
    %406 = arith.addf %404, %405 : vector<2x128xf32>
    %407 = math.tanh %406 : vector<2x128xf32>
    %408 = arith.mulf %403, %407 : vector<2x128xf32>
    %409 = vector.extract_strided_slice %8 {offsets = [14, 0], sizes = [2, 512], strides = [1, 1]} : vector<16x512xf32> to vector<2x512xf32>
    %cst_68 = arith.constant dense<0.000000e+00> : vector<2x512xf32>
    %410 = tpu.matmul %379, %0, %cst_68 {dimension_numbers = #tpu.dot_dimension_numbers<[1], [0], [0], [1], [0, 0, 1, 1], [], []>} : vector<2x128xf32>, vector<128x512xf32>, vector<2x512xf32> -> vector<2x512xf32>
    %411 = arith.addf %409, %410 : vector<2x512xf32>
    %412 = vector.extract_strided_slice %411 {offsets = [0, 0], sizes = [2, 128], strides = [1, 1]} : vector<2x512xf32> to vector<2x128xf32>
    %413 = arith.negf %412 : vector<2x128xf32>
    %414 = math.exp %413 : vector<2x128xf32>
    %cst_69 = arith.constant 1.000000e+00 : f32
    %415 = vector.broadcast %cst_69 : f32 to vector<2x128xf32>
    %416 = arith.addf %415, %414 : vector<2x128xf32>
    %417 = arith.divf %415, %416 : vector<2x128xf32>
    %418 = vector.extract_strided_slice %411 {offsets = [0, 128], sizes = [2, 128], strides = [1, 1]} : vector<2x512xf32> to vector<2x128xf32>
    %419 = arith.negf %418 : vector<2x128xf32>
    %420 = math.exp %419 : vector<2x128xf32>
    %cst_70 = arith.constant 1.000000e+00 : f32
    %421 = vector.broadcast %cst_70 : f32 to vector<2x128xf32>
    %422 = arith.addf %421, %420 : vector<2x128xf32>
    %423 = arith.divf %421, %422 : vector<2x128xf32>
    %424 = vector.extract_strided_slice %411 {offsets = [0, 256], sizes = [2, 128], strides = [1, 1]} : vector<2x512xf32> to vector<2x128xf32>
    %425 = math.tanh %424 : vector<2x128xf32>
    %426 = vector.extract_strided_slice %411 {offsets = [0, 384], sizes = [2, 128], strides = [1, 1]} : vector<2x512xf32> to vector<2x128xf32>
    %427 = arith.negf %426 : vector<2x128xf32>
    %428 = math.exp %427 : vector<2x128xf32>
    %cst_71 = arith.constant 1.000000e+00 : f32
    %429 = vector.broadcast %cst_71 : f32 to vector<2x128xf32>
    %430 = arith.addf %429, %428 : vector<2x128xf32>
    %431 = arith.divf %429, %430 : vector<2x128xf32>
    %432 = arith.mulf %423, %377 : vector<2x128xf32>
    %433 = arith.mulf %417, %425 : vector<2x128xf32>
    %434 = arith.addf %432, %433 : vector<2x128xf32>
    %435 = math.tanh %434 : vector<2x128xf32>
    %436 = arith.mulf %431, %435 : vector<2x128xf32>
    %437 = tpu.concatenate %436, %408 in 1 : vector<2x128xf32>, vector<2x128xf32> -> vector<2x256xf32>
    %cst_72 = arith.constant dense<0.000000e+00> : vector<2x512xf32>
    %438 = tpu.matmul %437, %1, %cst_72 {dimension_numbers = #tpu.dot_dimension_numbers<[1], [0], [0], [1], [0, 0, 1, 1], [], []>} : vector<2x256xf32>, vector<256x512xf32>, vector<2x512xf32> -> vector<2x512xf32>
    %439 = vector.broadcast %2 : vector<1x512xf32> to vector<2x512xf32>
    %440 = arith.addf %438, %439 : vector<2x512xf32>
    %441 = vector.extract_strided_slice %440 {offsets = [0, 0], sizes = [2, 128], strides = [1, 1]} : vector<2x512xf32> to vector<2x128xf32>
    %442 = arith.negf %441 : vector<2x128xf32>
    %443 = math.exp %442 : vector<2x128xf32>
    %cst_73 = arith.constant 1.000000e+00 : f32
    %444 = vector.broadcast %cst_73 : f32 to vector<2x128xf32>
    %445 = arith.addf %444, %443 : vector<2x128xf32>
    %446 = arith.divf %444, %445 : vector<2x128xf32>
    %447 = vector.extract_strided_slice %440 {offsets = [0, 128], sizes = [2, 128], strides = [1, 1]} : vector<2x512xf32> to vector<2x128xf32>
    %448 = arith.negf %447 : vector<2x128xf32>
    %449 = math.exp %448 : vector<2x128xf32>
    %cst_74 = arith.constant 1.000000e+00 : f32
    %450 = vector.broadcast %cst_74 : f32 to vector<2x128xf32>
    %451 = arith.addf %450, %449 : vector<2x128xf32>
    %452 = arith.divf %450, %451 : vector<2x128xf32>
    %453 = vector.extract_strided_slice %440 {offsets = [0, 256], sizes = [2, 128], strides = [1, 1]} : vector<2x512xf32> to vector<2x128xf32>
    %454 = math.tanh %453 : vector<2x128xf32>
    %455 = vector.extract_strided_slice %440 {offsets = [0, 384], sizes = [2, 128], strides = [1, 1]} : vector<2x512xf32> to vector<2x128xf32>
    %456 = arith.negf %455 : vector<2x128xf32>
    %457 = math.exp %456 : vector<2x128xf32>
    %cst_75 = arith.constant 1.000000e+00 : f32
    %458 = vector.broadcast %cst_75 : f32 to vector<2x128xf32>
    %459 = arith.addf %458, %457 : vector<2x128xf32>
    %460 = arith.divf %458, %459 : vector<2x128xf32>
    %461 = arith.mulf %452, %406 : vector<2x128xf32>
    %462 = arith.mulf %446, %454 : vector<2x128xf32>
    %463 = arith.addf %461, %462 : vector<2x128xf32>
    %464 = math.tanh %463 : vector<2x128xf32>
    %465 = arith.mulf %460, %464 : vector<2x128xf32>
    %466 = tpu.concatenate %66, %123, %180, %237, %294, %351, %408, %465 in 0 : vector<2x128xf32>, vector<2x128xf32>, vector<2x128xf32>, vector<2x128xf32>, vector<2x128xf32>, vector<2x128xf32>, vector<2x128xf32>, vector<2x128xf32> -> vector<16x128xf32>
    %c0_76 = arith.constant 0 : index
    %c0_77 = arith.constant 0 : index
    %467 = vector.load %arg6[%c0_76, %c0_77] : memref<128x128xf32, #tpu.memory_space<vmem>>, vector<128x128xf32>
    %cst_78 = arith.constant dense<0.000000e+00> : vector<16x128xf32>
    %468 = tpu.matmul %466, %467, %cst_78 {dimension_numbers = #tpu.dot_dimension_numbers<[1], [0], [0], [1], [0, 0, 1, 1], [], []>} : vector<16x128xf32>, vector<128x128xf32>, vector<16x128xf32> -> vector<16x128xf32>
    %c0_79 = arith.constant 0 : index
    %c0_80 = arith.constant 0 : index
    %469 = vector.load %arg7[%c0_79, %c0_80] : memref<1x128xf32, #tpu.memory_space<vmem>>, vector<1x128xf32>
    %470 = vector.broadcast %469 : vector<1x128xf32> to vector<16x128xf32>
    %471 = arith.addf %468, %470 : vector<16x128xf32>
    %c0_81 = arith.constant 0 : index
    %c0_82 = arith.constant 0 : index
    %472 = vector.load %arg8[%c0_81, %c0_82] : memref<16x128xf32, #tpu.memory_space<vmem>>, vector<16x128xf32>
    tpu.vector_store %arg8[%c0_81, %c0_82], %471 {strides = array<i32>} : memref<16x128xf32, #tpu.memory_space<vmem>>, vector<16x128xf32>,
    return
  }
}

</mosaic_0001>

<bundles_post_ra>
// kernel: _forward_impl.1
= control target key start
LH: loop header
LB: loop body
LE: loop exit
PB: predicated region body
PF: predicated region fallthrough
CT: control target
= control target key end

     0   :  { %vm259_vm0 = vcmask 1043456   ;;  %v7224_v3 = vmov 0.0   ;;  %vm252_vm1 = vcmask 31744   ;;  %vm3280_vm2 = vcmask 1041408   ;;  %s7215_s1 = inlined_call_operand.vmem [shape: f32[4,512], index: 1, kind: input, shape index: {}]   ;;  %s7216_s2 = inlined_call_operand.vmem [shape: f32[128,512], index: 2, kind: input, shape index: {}]   ;;  %s7217_s0 = inlined_call_operand.vmem [shape: f32[16,4], index: 0, kind: input, shape index: {}]   ;;  %s7218_s4 = inlined_call_operand.vmem [shape: f32[256,512], index: 4, kind: input, shape index: {}]   ;;  %s7219_s3 = inlined_call_operand.vmem [shape: f32[1,512], index: 3, kind: input, shape index: {}]   ;;  %s7220_s5 = inlined_call_operand.vmem [shape: f32[1,512], index: 5, kind: input, shape index: {}]   ;;  %s7221_s6 = inlined_call_operand.vmem [shape: f32[128,128], index: 6, kind: input, shape index: {}]   ;;  %s7222_s7 = inlined_call_operand.vmem [shape: f32[1,128], index: 7, kind: input, shape index: {}]   ;;  %s7223_s8 = inlined_call_operand.vmem [shape: f32[16,128], index: 8, kind: output, shape index: {}]  }
   0x1   :  { %v224_v0 = vld [vmem:[%s7215_s1] sm:$0xff]  ;;  %v225_v1 = vld [vmem:[%s7215_s1 + $0x8] sm:$0xff]  ;;  %332 = vmatprep.mubr.f32.mxu1 %v7224_v3  ;;  %486 = vmatprep.mubr.f32.mxu0 %v7224_v3  ;;  %v32_v21 = vld [vmem:[%s7216_s2 + $0x18] sm:$0xff]  ;;  %vm3283_vm3 = vcmask 1045504  }
   0x2   :  { %v30_v2 = vld [vmem:[%s7216_s2 + $0x8] sm:$0xff]  ;;  %v250_v4 = vcombine.high %v224_v0, %v224_v0  ;;  %v29_v6 = vld [vmem:[%s7216_s2] sm:$0xff]  ;;  %v251_v13 = vcombine.high %v225_v1, %v225_v1  ;;  %v36_v22 = vld [vmem:[%s7216_s2 + $0x38] sm:$0xff] }
   0x3   :  { %v34_v5 = vld [vmem:[%s7216_s2 + $0x28] sm:$0xff]  ;;  %v33_v7 = vld [vmem:[%s7216_s2 + $0x20] sm:$0xff]  ;;  %v31_v26 = vld [vmem:[%s7216_s2 + $0x10] sm:$0xff]  ;;  %v5452_v27 = vpack.c.bf16 %v36_v22, %v32_v21 }
   0x4   :  { %v5395_v8 = vpack.c.bf16 %v34_v5, %v30_v2  ;;  %v5397_v9 = vpack.c.bf16 %v33_v7, %v29_v6  ;;  %v222_v10 = vld [vmem:[%s7217_s0] sm:$0xff]  ;;  %v38_v11 = vld [vmem:[%s7216_s2 + $0x48] sm:$0xff]  ;;  %3392 = vmatprep.subr.msk.mxu1 %vm259_vm0, %v250_v4  ;;  %v35_v28 = vld [vmem:[%s7216_s2 + $0x30] sm:$0xff] }
   0x5   :  { %v42_v12 = vld [vmem:[%s7216_s2 + $0x68] sm:$0xff]  ;;  %v37_v15 = vld [vmem:[%s7216_s2 + $0x40] sm:$0xff]  ;;  %3393 = vmatpush1.msk.msra.mxu1 %vm259_vm0, %v224_v0  ;;  %7365 = vst [vmem:[#allocation3_spill] sm:$0xff] %v5452_v27  ;;  %v40_v31 = vld [vmem:[%s7216_s2 + $0x58] sm:$0xff]  ;;  %v5476_v34 = vpack.c.bf16 %v35_v28, %v31_v26 }
   0x6   :  { %7364 = vst [vmem:[#allocation2_spill] sm:$0xff] %v5395_v8  ;;  %v5409_v14 = vpack.c.bf16 %v42_v12, %v38_v11  ;;  %v41_v16 = vld [vmem:[%s7216_s2 + $0x60] sm:$0xff]  ;;  %3503 = vmatprep.subr.bf16.mxu0 %v5395_v8  ;;  %v46_v17 = vld [vmem:[%s7216_s2 + $0x88] sm:$0xff]  ;;  %3394 = vmatmul.mubr.msk.f32.vlgmr.msra.gmra.mrb[0].mxu1 %vm252_vm1, %v222_v10  ;;  %v44_v32 = vld [vmem:[%s7216_s2 + $0x78] sm:$0xff] }
   0x7   :  { %v50_v18 = vld [vmem:[%s7216_s2 + $0xa8] sm:$0xff]  ;;  %3505 = vmatpush1.bf16.msra.mxu0 %v5397_v9  ;;  %v5427_v19 = vpack.c.bf16 %v41_v16, %v37_v15  ;;  %338 = vmatprep.mubr.f32.mxu1 %v7224_v3  ;;  %v45_v24 = vld [vmem:[%s7216_s2 + $0x80] sm:$0xff]  ;;  %v39_v38 = vld [vmem:[%s7216_s2 + $0x50] sm:$0xff]  ;;  %v5490_v39 = vpack.c.bf16 %v44_v32, %v40_v31 }
   0x8   :  { %v223_v20 = vld [vmem:[%s7217_s0 + $0x8] sm:$0xff]  ;;  %3507 = vmatprep.subr.bf16.mxu0 %v5409_v14  ;;  %v5440_v23 = vpack.c.bf16 %v50_v18, %v46_v17  ;;  %v49_v25 = vld [vmem:[%s7216_s2 + $0xa0] sm:$0xff]  ;;  %3396 = vmatprep.subr.msk.mxu1 %vm259_vm0, %v251_v13  ;;  %v43_v40 = vld [vmem:[%s7216_s2 + $0x70] sm:$0xff] }
   0x9   :  { %v54_v29 = vld [vmem:[%s7216_s2 + $0xc8] sm:$0xff]  ;;  %3397 = vmatpush1.msk.msra.mxu1 %vm259_vm0, %v225_v1  ;;  %v5472_v33 = vpack.c.bf16 %v49_v25, %v45_v24  ;;  %v53_v36 = vld [vmem:[%s7216_s2 + $0xc0] sm:$0xff]  ;;  %v48_v43 = vld [vmem:[%s7216_s2 + $0x98] sm:$0xff]  ;;  %v5513_v46 = vpack.c.bf16 %v43_v40, %v39_v38 }
   0xa   :  { %v58_v30 = vld [vmem:[%s7216_s2 + $0xe8] sm:$0xff]  ;;  %3395 = vmatmul.mubr.msk.f32.gmra.mrb[2].mxu1 %vm252_vm1, %v223_v20  ;;  %v57_v37 = vld [vmem:[%s7216_s2 + $0xe0] sm:$0xff]  ;;  %3535 = vmatprep.subr.bf16.mxu1 %v5452_v27  ;;  %v52_v44 = vld [vmem:[%s7216_s2 + $0xb8] sm:$0xff] }
   0xb   :  { %3509 = vmatpush1.bf16.msra.mxu0 %v5427_v19  ;;  %409 = vmatprep.mubr.f32.mxu1 %v7224_v3  ;;  %v5478_v35 = vpack.c.bf16 %v58_v30, %v54_v29  ;;  %v62_v41 = vld [vmem:[%s7216_s2 + $0x108] sm:$0xff]  ;;  %v5509_v45 = vpack.c.bf16 %v57_v37, %v53_v36  ;;  %v61_v48 = vld [vmem:[%s7216_s2 + $0x100] sm:$0xff]  ;;  %v47_v50 = vld [vmem:[%s7216_s2 + $0x90] sm:$0xff]  ;;  %v5527_v51 = vpack.c.bf16 %v52_v44, %v48_v43 }
   0xc   :  { %3511 = vmatprep.subr.bf16.mxu0 %v5440_v23  ;;  %v66_v42 = vld [vmem:[%s7216_s2 + $0x128] sm:$0xff]  ;;  %v65_v49 = vld [vmem:[%s7216_s2 + $0x120] sm:$0xff]  ;;  %v51_v52 = vld [vmem:[%s7216_s2 + $0xb0] sm:$0xff] }
   0xd   :  { %v5515_v47 = vpack.c.bf16 %v66_v42, %v62_v41  ;;  %v70_v53 = vld [vmem:[%s7216_s2 + $0x148] sm:$0xff]  ;;  %v56_v55 = vld [vmem:[%s7216_s2 + $0xd8] sm:$0xff]  ;;  %v5546_v57 = vpack.c.bf16 %v65_v49, %v61_v48  ;;  %v5551_v58 = vpack.c.bf16 %v51_v52, %v47_v50  ;;  %v69_v60 = vld [vmem:[%s7216_s2 + $0x140] sm:$0xff] }
   0xe   :  { %3398 = vmatmul.mubr.msk.f32.vlgmr.msra.gmra.mrb[4].mxu1 %vm252_vm1, %v222_v10  ;;  %v74_v54 = vld [vmem:[%s7216_s2 + $0x168] sm:$0xff]  ;;  %v60_v56 = vld [vmem:[%s7216_s2 + $0xf8] sm:$0xff]  ;;  %v73_v61 = vld [vmem:[%s7216_s2 + $0x160] sm:$0xff] }
   0xf   :  { %3513 = vmatpush1.bf16.msra.mxu0 %v5472_v33  ;;  %3537 = vmatpush1.bf16.msra.mxu1 %v5476_v34  ;;  %v5553_v59 = vpack.c.bf16 %v74_v54, %v70_v53  ;;  %v55_v62 = vld [vmem:[%s7216_s2 + $0xd0] sm:$0xff]  ;;  %v5565_v63 = vpack.c.bf16 %v60_v56, %v56_v55  ;;  %v78_v1 = vld [vmem:[%s7216_s2 + $0x188] sm:$0xff]  ;;  %v64_v4 = vld [vmem:[%s7216_s2 + $0x118] sm:$0xff]  ;;  %v5584_v6 = vpack.c.bf16 %v73_v61, %v69_v60 }
  0x10   :  { %3515 = vmatprep.subr.bf16.mxu0 %v5478_v35  ;;  %3539 = vmatprep.subr.bf16.mxu1 %v5490_v39  ;;  %v59_v0 = vld [vmem:[%s7216_s2 + $0xf0] sm:$0xff]  ;;  %v82_v2 = vld [vmem:[%s7216_s2 + $0x1a8] sm:$0xff]  ;;  %v68_v5 = vld [vmem:[%s7216_s2 + $0x138] sm:$0xff] }
  0x11   :  { %415 = vmatprep.mubr.f32.mxu1 %v7224_v3  ;;  %v5588_v7 = vpack.c.bf16 %v59_v0, %v55_v62  ;;  %v5590_v10 = vpack.c.bf16 %v82_v2, %v78_v1  ;;  %v77_v11 = vld [vmem:[%s7216_s2 + $0x180] sm:$0xff]  ;;  %v63_v13 = vld [vmem:[%s7216_s2 + $0x110] sm:$0xff]  ;;  %v5602_v15 = vpack.c.bf16 %v68_v5, %v64_v4  ;;  %v86_v17 = vld [vmem:[%s7216_s2 + $0x1c8] sm:$0xff] }
  0x12   :  { %3399 = vmatmul.mubr.msk.f32.gmra.mrb[6].mxu1 %vm252_vm1, %v223_v20  ;;  %v81_v12 = vld [vmem:[%s7216_s2 + $0x1a0] sm:$0xff]  ;;  %v67_v16 = vld [vmem:[%s7216_s2 + $0x130] sm:$0xff]  ;;  %v90_v18 = vld [vmem:[%s7216_s2 + $0x1e8] sm:$0xff] }
  0x13   :  { %3517 = vmatpush1.bf16.msra.mxu0 %v5509_v45  ;;  %3541 = vmatpush1.bf16.msra.mxu1 %v5513_v46  ;;  %v72_v20 = vld [vmem:[%s7216_s2 + $0x158] sm:$0xff]  ;;  %v5620_v22 = vpack.c.bf16 %v81_v12, %v77_v11  ;;  %v5624_v24 = vpack.c.bf16 %v67_v16, %v63_v13  ;;  %v5626_v25 = vpack.c.bf16 %v90_v18, %v86_v17  ;;  %v85_v26 = vld [vmem:[%s7216_s2 + $0x1c0] sm:$0xff]  ;;  %v71_v30 = vld [vmem:[%s7216_s2 + $0x150] sm:$0xff] }
  0x14   :  { %3519 = vmatprep.subr.bf16.mxu0 %v5515_v47  ;;  %3543 = vmatprep.subr.bf16.mxu1 %v5527_v51  ;;  %v76_v21 = vld [vmem:[%s7216_s2 + $0x178] sm:$0xff]  ;;  %v89_v28 = vld [vmem:[%s7216_s2 + $0x1e0] sm:$0xff]  ;;  %v75_v31 = vld [vmem:[%s7216_s2 + $0x170] sm:$0xff] }
  0x15   :  { %557 = vmatprep.mubr.f32.mxu1 %v7224_v3  ;;  %v5635_v29 = vpack.c.bf16 %v76_v21, %v72_v20  ;;  %v80_v32 = vld [vmem:[%s7216_s2 + $0x198] sm:$0xff]  ;;  %v5650_v37 = vpack.c.bf16 %v89_v28, %v85_v26  ;;  %v5654_v38 = vpack.c.bf16 %v75_v31, %v71_v30  ;;  %v79_v41 = vld [vmem:[%s7216_s2 + $0x190] sm:$0xff]  ;;  %v94_v54 = vld [vmem:[%s7218_s4 + $0x8] sm:$0xff] }
  0x16   :  { %v84_v36 = vld [vmem:[%s7216_s2 + $0x1b8] sm:$0xff]  ;;  %v83_v42 = vld [vmem:[%s7216_s2 + $0x1b0] sm:$0xff]  ;;  %v98_v55 = vld [vmem:[%s7218_s4 + $0x28] sm:$0xff] }
  0x17   :  { %3521 = vmatpush1.bf16.msra.mxu0 %v5546_v57  ;;  %3545 = vmatpush1.bf16.msra.mxu1 %v5551_v58  ;;  %v5657_v40 = vpack.c.bf16 %v84_v36, %v80_v32  ;;  %v88_v43 = vld [vmem:[%s7216_s2 + $0x1d8] sm:$0xff]  ;;  %v5673_v48 = vpack.c.bf16 %v83_v42, %v79_v41  ;;  %v87_v50 = vld [vmem:[%s7216_s2 + $0x1d0] sm:$0xff]  ;;  %v5702_v60 = vpack.c.bf16 %v98_v55, %v94_v54  ;;  %v93_v0 = vld [vmem:[%s7218_s4] sm:$0xff] }
  0x18   :  { %3523 = vmatprep.subr.bf16.mxu0 %v5553_v59  ;;  %3547 = vmatprep.subr.bf16.mxu1 %v5565_v63  ;;  %v92_v44 = vld [vmem:[%s7216_s2 + $0x1f8] sm:$0xff]  ;;  %v91_v52 = vld [vmem:[%s7216_s2 + $0x1f0] sm:$0xff]  ;;  %v97_v1 = vld [vmem:[%s7218_s4 + $0x20] sm:$0xff] }
  0x19   :  { %v5676_v49 = vpack.c.bf16 %v92_v44, %v88_v43  ;;  %v5687_v53 = vpack.c.bf16 %v91_v52, %v87_v50  ;;  %v96_v56 = vld [vmem:[%s7218_s4 + $0x18] sm:$0xff]  ;;  %v95_v2 = vld [vmem:[%s7218_s4 + $0x10] sm:$0xff]  ;;  %v5719_v4 = vpack.c.bf16 %v97_v1, %v93_v0  ;;  %v102_v11 = vld [vmem:[%s7218_s4 + $0x48] sm:$0xff] }
  0x1a   :  { %v100_v61 = vld [vmem:[%s7218_s4 + $0x38] sm:$0xff]  ;;  %v99_v5 = vld [vmem:[%s7218_s4 + $0x30] sm:$0xff]  ;;  %v106_v12 = vld [vmem:[%s7218_s4 + $0x68] sm:$0xff] }
  0x1b   :  { %3525 = vmatpush1.bf16.msra.mxu0 %v5584_v6  ;;  %3549 = vmatpush1.bf16.msra.mxu1 %v5588_v7  ;;  %v5707_v62 = vpack.c.bf16 %v100_v61, %v96_v56  ;;  %v5731_v13 = vpack.c.bf16 %v99_v5, %v95_v2  ;;  %v5733_v16 = vpack.c.bf16 %v106_v12, %v102_v11  ;;  %v104_v17 = vld [vmem:[%s7218_s4 + $0x58] sm:$0xff]  ;;  %v101_v20 = vld [vmem:[%s7218_s4 + $0x40] sm:$0xff]  ;;  %v103_v28 = vld [vmem:[%s7218_s4 + $0x50] sm:$0xff] }
  0x1c   :  { %3527 = vmatprep.subr.bf16.mxu0 %v5590_v10  ;;  %3551 = vmatprep.subr.bf16.mxu1 %v5602_v15  ;;  %v108_v18 = vld [vmem:[%s7218_s4 + $0x78] sm:$0xff]  ;;  %v105_v26 = vld [vmem:[%s7218_s4 + $0x60] sm:$0xff]  ;;  %v107_v30 = vld [vmem:[%s7218_s4 + $0x70] sm:$0xff] }
  0x1d   :  { %v5745_v21 = vpack.c.bf16 %v108_v18, %v104_v17  ;;  %v5758_v31 = vpack.c.bf16 %v105_v26, %v101_v20  ;;  %v5760_v32 = vpack.c.bf16 %v107_v30, %v103_v28  ;;  %v110_v36 = vld [vmem:[%s7218_s4 + $0x88] sm:$0xff]  ;;  %v112_v42 = vld [vmem:[%s7218_s4 + $0x98] sm:$0xff]  ;;  %v109_v50 = vld [vmem:[%s7218_s4 + $0x80] sm:$0xff] }
  0x1e   :  { %v114_v41 = vld [vmem:[%s7218_s4 + $0xa8] sm:$0xff]  ;;  %v116_v44 = vld [vmem:[%s7218_s4 + $0xb8] sm:$0xff]  ;;  %v113_v52 = vld [vmem:[%s7218_s4 + $0xa0] sm:$0xff] }
  0x1f   :  { %3529 = vmatpush1.bf16.msra.mxu0 %v5620_v22  ;;  %3553 = vmatpush1.bf16.msra.mxu1 %v5624_v24  ;;  %v5772_v43 = vpack.c.bf16 %v114_v41, %v110_v36  ;;  %v5783_v54 = vpack.c.bf16 %v116_v44, %v112_v42  ;;  %v111_v55 = vld [vmem:[%s7218_s4 + $0x90] sm:$0xff]  ;;  %v118_v61 = vld [vmem:[%s7218_s4 + $0xc8] sm:$0xff]  ;;  %v5795_v0 = vpack.c.bf16 %v113_v52, %v109_v50  ;;  %v120_v2 = vld [vmem:[%s7218_s4 + $0xd8] sm:$0xff] }
  0x20   :  { %3531 = vmatprep.subr.bf16.mxu0 %v5626_v25  ;;  %3555 = vmatprep.subr.bf16.mxu1 %v5635_v29  ;;  %v115_v56 = vld [vmem:[%s7218_s4 + $0xb0] sm:$0xff]  ;;  %v122_v1 = vld [vmem:[%s7218_s4 + $0xe8] sm:$0xff]  ;;  %v124_v5 = vld [vmem:[%s7218_s4 + $0xf8] sm:$0xff] }
  0x21   :  { %7366 = vst [vmem:[#allocation4_spill] sm:$0xff] %v5772_v43  ;;  %7367 = vst [vmem:[#allocation5_spill] sm:$0xff] %v5783_v54  ;;  %v5808_v11 = vpack.c.bf16 %v115_v56, %v111_v55  ;;  %v5810_v12 = vpack.c.bf16 %v122_v1, %v118_v61  ;;  %v117_v17 = vld [vmem:[%s7218_s4 + $0xc0] sm:$0xff]  ;;  %v119_v20 = vld [vmem:[%s7218_s4 + $0xd0] sm:$0xff]  ;;  %v5822_v26 = vpack.c.bf16 %v124_v5, %v120_v2 }
  0x22   :  { %7368 = vst [vmem:[#allocation6_spill] sm:$0xff] %v5795_v0  ;;  %v121_v18 = vld [vmem:[%s7218_s4 + $0xe0] sm:$0xff]  ;;  %v123_v28 = vld [vmem:[%s7218_s4 + $0xf0] sm:$0xff]  ;;  %v126_v30 = vld [vmem:[%s7218_s4 + $0x108] sm:$0xff] }
  0x23   :  { %3533 = vmatpush1.bf16.msra.mxu0 %v5650_v37  ;;  %3557 = vmatpush1.bf16.msra.mxu1 %v5654_v38  ;;  %7369 = vst [vmem:[#allocation7_spill] sm:$0xff] %v5808_v11  ;;  %7370 = vst [vmem:[#allocation8_spill] sm:$0xff] %v5810_v12  ;;  %v130_v36 = vld [vmem:[%s7218_s4 + $0x128] sm:$0xff]  ;;  %v128_v41 = vld [vmem:[%s7218_s4 + $0x118] sm:$0xff]  ;;  %v5840_v44 = vpack.c.bf16 %v121_v18, %v117_v17  ;;  %v5844_v50 = vpack.c.bf16 %v123_v28, %v119_v20 }
  0x24   :  { %3559 = vmatprep.subr.bf16.mxu1 %v5657_v40  ;;  %3567 = vmatprep.subr.bf16.mxu0 %v5702_v60  ;;  %7371 = vst [vmem:[#allocation9_spill] sm:$0xff] %v5822_v26  ;;  %v132_v42 = vld [vmem:[%s7218_s4 + $0x138] sm:$0xff]  ;;  %v5846_v52 = vpack.c.bf16 %v130_v36, %v126_v30  ;;  %v125_v55 = vld [vmem:[%s7218_s4 + $0x100] sm:$0xff]  ;;  %v127_v1 = vld [vmem:[%s7218_s4 + $0x110] sm:$0xff] }
  0x25   :  { %7372 = vst [vmem:[#allocation10_spill] sm:$0xff] %v5840_v44  ;;  %7373 = vst [vmem:[#allocation11_spill] sm:$0xff] %v5844_v50  ;;  %v129_v56 = vld [vmem:[%s7218_s4 + $0x120] sm:$0xff]  ;;  %v5855_v61 = vpack.c.bf16 %v132_v42, %v128_v41  ;;  %v131_v2 = vld [vmem:[%s7218_s4 + $0x130] sm:$0xff] }
  0x26   :  { %487 = vmatmul.mubr.f32.vlgmr.msra.gmra.mrb[0].mxu0 %v7224_v3  ;;  %7374 = vst [vmem:[#allocation12_spill] sm:$0xff] %v5846_v52  ;;  %v5864_v5 = vpack.c.bf16 %v129_v56, %v125_v55  ;;  %v5868_v17 = vpack.c.bf16 %v131_v2, %v127_v1  ;;  %v134_v18 = vld [vmem:[%s7218_s4 + $0x148] sm:$0xff]  ;;  %v136_v28 = vld [vmem:[%s7218_s4 + $0x158] sm:$0xff]  ;;  %v133_v41 = vld [vmem:[%s7218_s4 + $0x140] sm:$0xff] }
  0x27   :  { %677 = vmatprep.mubr.f32.mxu0 %v7224_v3  ;;  %3561 = vmatpush1.bf16.msra.mxu1 %v5673_v48  ;;  %7375 = vst [vmem:[#allocation13_spill] sm:$0xff] %v5855_v61  ;;  %v138_v20 = vld [vmem:[%s7218_s4 + $0x168] sm:$0xff]  ;;  %v140_v36 = vld [vmem:[%s7218_s4 + $0x178] sm:$0xff]  ;;  %v137_v42 = vld [vmem:[%s7218_s4 + $0x160] sm:$0xff] }
  0x28   :  { %3563 = vmatprep.subr.bf16.mxu1 %v5676_v49  ;;  %3569 = vmatpush1.bf16.msra.mxu0 %v5719_v4  ;;  %7376 = vst [vmem:[#allocation14_spill] sm:$0xff] %v5864_v5  ;;  %7377 = vst [vmem:[#allocation15_spill] sm:$0xff] %v5868_v17  ;;  %v5882_v30 = vpack.c.bf16 %v138_v20, %v134_v18  ;;  %v5893_v55 = vpack.c.bf16 %v140_v36, %v136_v28  ;;  %v135_v1 = vld [vmem:[%s7218_s4 + $0x150] sm:$0xff]  ;;  %v142_v20 = vld [vmem:[%s7218_s4 + $0x188] sm:$0xff] }
  0x29   :  { %3571 = vmatprep.subr.bf16.mxu0 %v5733_v16  ;;  %v5895_v56 = vpack.c.bf16 %v137_v42, %v133_v41  ;;  %v139_v2 = vld [vmem:[%s7218_s4 + $0x170] sm:$0xff]  ;;  %v146_v28 = vld [vmem:[%s7218_s4 + $0x1a8] sm:$0xff]  ;;  %v144_v36 = vld [vmem:[%s7218_s4 + $0x198] sm:$0xff] }
  0x2a   :  { %7378 = vst [vmem:[#allocation16_spill] sm:$0xff] %v5882_v30  ;;  %7379 = vst [vmem:[#allocation17_spill] sm:$0xff] %v5893_v55  ;;  %v5904_v18 = vpack.c.bf16 %v139_v2, %v135_v1  ;;  %v5918_v41 = vpack.c.bf16 %v146_v28, %v142_v20  ;;  %v148_v42 = vld [vmem:[%s7218_s4 + $0x1b8] sm:$0xff]  ;;  %v141_v1 = vld [vmem:[%s7218_s4 + $0x180] sm:$0xff] }
  0x2b   :  { %3565 = vmatpush1.bf16.msra.mxu1 %v5687_v53  ;;  %7380 = vst [vmem:[#allocation18_spill] sm:$0xff] %v5895_v56  ;;  %v145_v2 = vld [vmem:[%s7218_s4 + $0x1a0] sm:$0xff]  ;;  %v143_v20 = vld [vmem:[%s7218_s4 + $0x190] sm:$0xff] }
  0x2c   :  { %3631 = vmatprep.subr.bf16.mxu1 %v5707_v62  ;;  %3573 = vmatpush1.bf16.msra.mxu0 %v5758_v31  ;;  %7381 = vst [vmem:[#allocation19_spill] sm:$0xff] %v5904_v18  ;;  %7382 = vst [vmem:[#allocation20_spill] sm:$0xff] %v5918_v41  ;;  %v147_v28 = vld [vmem:[%s7218_s4 + $0x1b0] sm:$0xff] }
  0x2d   :  { %3575 = vmatprep.subr.bf16.mxu0 %v5772_v43 }
  0x2e   :  { %558 = vmatmul.mubr.f32.vlgmr.msra.gmra.mrb[8].mxu1 %v7224_v3 }
  0x2f   :  { %748 = vmatprep.mubr.f32.mxu1 %v7224_v3  ;;  %3633 = vmatpush1.bf16.msra.mxu1 %v5731_v13  ;;  %v5929_v3 = vpack.c.bf16 %v148_v42, %v144_v36  ;;  %v150_v36 = vld [vmem:[%s7218_s4 + $0x1c8] sm:$0xff] }
  0x30   :  { %3635 = vmatprep.subr.bf16.mxu1 %v5745_v21  ;;  %3577 = vmatpush1.bf16.msra.mxu0 %v5795_v0  ;;  %v154_v42 = vld [vmem:[%s7218_s4 + $0x1e8] sm:$0xff] }
  0x31   :  { %3579 = vmatprep.subr.bf16.mxu0 %v5810_v12  ;;  %7383 = vst [vmem:[#allocation21_spill] sm:$0xff] %v5929_v3 }
  0x33   :  { %3637 = vmatpush1.bf16.msra.mxu1 %v5760_v32 }
  0x34   :  { %3639 = vmatprep.subr.bf16.mxu1 %v5783_v54  ;;  %3581 = vmatpush1.bf16.msra.mxu0 %v5840_v44 }
  0x35   :  { %3583 = vmatprep.subr.bf16.mxu0 %v5846_v52 }
  0x37   :  { %3641 = vmatpush1.bf16.msra.mxu1 %v5808_v11 }
  0x38   :  { %3643 = vmatprep.subr.bf16.mxu1 %v5822_v26  ;;  %3585 = vmatpush1.bf16.msra.mxu0 %v5864_v5 }
  0x39   :  { %3587 = vmatprep.subr.bf16.mxu0 %v5882_v30 }
  0x3b   :  { %3645 = vmatpush1.bf16.msra.mxu1 %v5844_v50 }
  0x3c   :  { %3647 = vmatprep.subr.bf16.mxu1 %v5855_v61  ;;  %3589 = vmatpush1.bf16.msra.mxu0 %v5895_v56  ;;  %v5931_v56 = vpack.c.bf16 %v145_v2, %v141_v1  ;;  %v152_v1 = vld [vmem:[%s7218_s4 + $0x1d8] sm:$0xff]  ;;  %v5954_v2 = vpack.c.bf16 %v154_v42, %v150_v36  ;;  %v151_v36 = vld [vmem:[%s7218_s4 + $0x1d0] sm:$0xff] }
  0x3d   :  { %3591 = vmatprep.subr.bf16.mxu0 %v5918_v41  ;;  %v155_v42 = vld [vmem:[%s7218_s4 + $0x1f0] sm:$0xff] }
  0x3e   :  { %7384 = vst [vmem:[#allocation22_spill] sm:$0xff] %v5931_v56  ;;  %7386 = vst [vmem:[#allocation24_spill] sm:$0xff] %v5954_v2 }
  0x3f   :  { %3649 = vmatpush1.bf16.msra.mxu1 %v5868_v17 }
  0x40   :  { %3651 = vmatprep.subr.bf16.mxu1 %v5893_v55  ;;  %3593 = vmatpush1.bf16.msra.mxu0 %v5931_v56  ;;  %v153_v56 = vld [vmem:[%s7218_s4 + $0x1e0] sm:$0xff]  ;;  %v206_v55 = vld [vmem:[%s7218_s4 + $0x388] sm:$0xff] }
  0x41   :  { %3595 = vmatprep.subr.bf16.mxu0 %v5954_v2 }
  0x43   :  { %3653 = vmatpush1.bf16.msra.mxu1 %v5904_v18  ;;  %v5940_v18 = vpack.c.bf16 %v147_v28, %v143_v20  ;;  %v156_v20 = vld [vmem:[%s7218_s4 + $0x1f8] sm:$0xff]  ;;  %v149_v28 = vld [vmem:[%s7218_s4 + $0x1c0] sm:$0xff] }
  0x44   :  { %3655 = vmatprep.subr.bf16.mxu1 %v5929_v3  ;;  %v5965_v3 = vpack.c.bf16 %v156_v20, %v152_v1  ;;  %v5967_v41 = vpack.c.bf16 %v153_v56, %v149_v28  ;;  %v158_v56 = vld [vmem:[%s7218_s4 + $0x208] sm:$0xff]  ;;  %v160_v20 = vld [vmem:[%s7218_s4 + $0x218] sm:$0xff] }
  0x45   :  { %7385 = vst [vmem:[#allocation23_spill] sm:$0xff] %v5940_v18  ;;  %v162_v1 = vld [vmem:[%s7218_s4 + $0x228] sm:$0xff] }
  0x46   :  { %7387 = vst [vmem:[#allocation25_spill] sm:$0xff] %v5965_v3  ;;  %7388 = vst [vmem:[#allocation26_spill] sm:$0xff] %v5967_v41  ;;  %3597 = vmatpush1.bf16.msra.mxu0 %v5967_v41  ;;  %v5990_v28 = vpack.c.bf16 %v162_v1, %v158_v56  ;;  %v161_v41 = vld [vmem:[%s7218_s4 + $0x220] sm:$0xff]  ;;  %v159_v56 = vld [vmem:[%s7218_s4 + $0x210] sm:$0xff] }
  0x47   :  { %3657 = vmatpush1.bf16.msra.mxu1 %v5940_v18  ;;  %v5976_v18 = vpack.c.bf16 %v155_v42, %v151_v36  ;;  %v164_v36 = vld [vmem:[%s7218_s4 + $0x238] sm:$0xff]  ;;  %v157_v42 = vld [vmem:[%s7218_s4 + $0x200] sm:$0xff]  ;;  %v163_v1 = vld [vmem:[%s7218_s4 + $0x230] sm:$0xff] }
  0x48   :  { %3659 = vmatprep.subr.bf16.mxu1 %v5965_v3  ;;  %7390 = vst [vmem:[#allocation28_spill] sm:$0xff] %v5990_v28  ;;  %v6001_v3 = vpack.c.bf16 %v164_v36, %v160_v20  ;;  %v6003_v2 = vpack.c.bf16 %v161_v41, %v157_v42  ;;  %3599 = vmatprep.subr.bf16.mxu0 %v5990_v28  ;;  %v166_v41 = vld [vmem:[%s7218_s4 + $0x248] sm:$0xff]  ;;  %v168_v36 = vld [vmem:[%s7218_s4 + $0x258] sm:$0xff] }
  0x49   :  { %7389 = vst [vmem:[#allocation27_spill] sm:$0xff] %v5976_v18  ;;  %v170_v20 = vld [vmem:[%s7218_s4 + $0x268] sm:$0xff] }
  0x4a   :  { %7391 = vst [vmem:[#allocation29_spill] sm:$0xff] %v6001_v3  ;;  %7392 = vst [vmem:[#allocation30_spill] sm:$0xff] %v6003_v2  ;;  %3601 = vmatpush1.bf16.msra.mxu0 %v6003_v2  ;;  %v6026_v42 = vpack.c.bf16 %v170_v20, %v166_v41  ;;  %v169_v2 = vld [vmem:[%s7218_s4 + $0x260] sm:$0xff]  ;;  %v167_v41 = vld [vmem:[%s7218_s4 + $0x250] sm:$0xff] }
  0x4b   :  { %3661 = vmatpush1.bf16.msra.mxu1 %v5976_v18  ;;  %v6012_v18 = vpack.c.bf16 %v163_v1, %v159_v56  ;;  %v172_v56 = vld [vmem:[%s7218_s4 + $0x278] sm:$0xff]  ;;  %v165_v1 = vld [vmem:[%s7218_s4 + $0x240] sm:$0xff]  ;;  %v171_v20 = vld [vmem:[%s7218_s4 + $0x270] sm:$0xff] }
  0x4c   :  { %3663 = vmatprep.subr.bf16.mxu1 %v6001_v3  ;;  %7394 = vst [vmem:[#allocation32_spill] sm:$0xff] %v6026_v42  ;;  %v6037_v3 = vpack.c.bf16 %v172_v56, %v168_v36  ;;  %v6039_v28 = vpack.c.bf16 %v169_v2, %v165_v1  ;;  %3603 = vmatprep.subr.bf16.mxu0 %v6026_v42  ;;  %v174_v2 = vld [vmem:[%s7218_s4 + $0x288] sm:$0xff]  ;;  %v176_v56 = vld [vmem:[%s7218_s4 + $0x298] sm:$0xff] }
  0x4d   :  { %7393 = vst [vmem:[#allocation31_spill] sm:$0xff] %v6012_v18  ;;  %v178_v36 = vld [vmem:[%s7218_s4 + $0x2a8] sm:$0xff] }
  0x4e   :  { %7395 = vst [vmem:[#allocation33_spill] sm:$0xff] %v6037_v3  ;;  %7396 = vst [vmem:[#allocation34_spill] sm:$0xff] %v6039_v28  ;;  %3605 = vmatpush1.bf16.msra.mxu0 %v6039_v28  ;;  %v6062_v1 = vpack.c.bf16 %v178_v36, %v174_v2  ;;  %v177_v28 = vld [vmem:[%s7218_s4 + $0x2a0] sm:$0xff]  ;;  %v175_v2 = vld [vmem:[%s7218_s4 + $0x290] sm:$0xff] }
  0x4f   :  { %3665 = vmatpush1.bf16.msra.mxu1 %v6012_v18  ;;  %v6048_v18 = vpack.c.bf16 %v171_v20, %v167_v41  ;;  %v180_v41 = vld [vmem:[%s7218_s4 + $0x2b8] sm:$0xff]  ;;  %v173_v20 = vld [vmem:[%s7218_s4 + $0x280] sm:$0xff]  ;;  %v179_v36 = vld [vmem:[%s7218_s4 + $0x2b0] sm:$0xff] }
  0x50   :  { %3667 = vmatprep.subr.bf16.mxu1 %v6037_v3  ;;  %7398 = vst [vmem:[#allocation36_spill] sm:$0xff] %v6062_v1  ;;  %v6073_v3 = vpack.c.bf16 %v180_v41, %v176_v56  ;;  %v6075_v42 = vpack.c.bf16 %v177_v28, %v173_v20  ;;  %3607 = vmatprep.subr.bf16.mxu0 %v6062_v1  ;;  %v182_v28 = vld [vmem:[%s7218_s4 + $0x2c8] sm:$0xff]  ;;  %v184_v41 = vld [vmem:[%s7218_s4 + $0x2d8] sm:$0xff] }
  0x51   :  { %7397 = vst [vmem:[#allocation35_spill] sm:$0xff] %v6048_v18  ;;  %v186_v56 = vld [vmem:[%s7218_s4 + $0x2e8] sm:$0xff] }
  0x52   :  { %7399 = vst [vmem:[#allocation37_spill] sm:$0xff] %v6073_v3  ;;  %7400 = vst [vmem:[#allocation38_spill] sm:$0xff] %v6075_v42  ;;  %3609 = vmatpush1.bf16.msra.mxu0 %v6075_v42  ;;  %v6098_v20 = vpack.c.bf16 %v186_v56, %v182_v28  ;;  %v185_v42 = vld [vmem:[%s7218_s4 + $0x2e0] sm:$0xff]  ;;  %v183_v28 = vld [vmem:[%s7218_s4 + $0x2d0] sm:$0xff] }
  0x53   :  { %3669 = vmatpush1.bf16.msra.mxu1 %v6048_v18  ;;  %v6084_v18 = vpack.c.bf16 %v179_v36, %v175_v2  ;;  %v188_v2 = vld [vmem:[%s7218_s4 + $0x2f8] sm:$0xff]  ;;  %v181_v36 = vld [vmem:[%s7218_s4 + $0x2c0] sm:$0xff]  ;;  %v187_v56 = vld [vmem:[%s7218_s4 + $0x2f0] sm:$0xff] }
  0x54   :  { %3671 = vmatprep.subr.bf16.mxu1 %v6073_v3  ;;  %7402 = vst [vmem:[#allocation40_spill] sm:$0xff] %v6098_v20  ;;  %v6109_v3 = vpack.c.bf16 %v188_v2, %v184_v41  ;;  %v6111_v1 = vpack.c.bf16 %v185_v42, %v181_v36  ;;  %3611 = vmatprep.subr.bf16.mxu0 %v6098_v20  ;;  %v190_v42 = vld [vmem:[%s7218_s4 + $0x308] sm:$0xff]  ;;  %v192_v2 = vld [vmem:[%s7218_s4 + $0x318] sm:$0xff] }
  0x55   :  { %7401 = vst [vmem:[#allocation39_spill] sm:$0xff] %v6084_v18  ;;  %v194_v41 = vld [vmem:[%s7218_s4 + $0x328] sm:$0xff] }
  0x56   :  { %7403 = vst [vmem:[#allocation41_spill] sm:$0xff] %v6109_v3  ;;  %7404 = vst [vmem:[#allocation42_spill] sm:$0xff] %v6111_v1  ;;  %3613 = vmatpush1.bf16.msra.mxu0 %v6111_v1  ;;  %v6134_v36 = vpack.c.bf16 %v194_v41, %v190_v42  ;;  %v193_v1 = vld [vmem:[%s7218_s4 + $0x320] sm:$0xff]  ;;  %v191_v42 = vld [vmem:[%s7218_s4 + $0x310] sm:$0xff] }
  0x57   :  { %3673 = vmatpush1.bf16.msra.mxu1 %v6084_v18  ;;  %v6120_v18 = vpack.c.bf16 %v187_v56, %v183_v28  ;;  %v196_v28 = vld [vmem:[%s7218_s4 + $0x338] sm:$0xff]  ;;  %v189_v56 = vld [vmem:[%s7218_s4 + $0x300] sm:$0xff]  ;;  %v195_v41 = vld [vmem:[%s7218_s4 + $0x330] sm:$0xff] }
  0x58   :  { %3675 = vmatprep.subr.bf16.mxu1 %v6109_v3  ;;  %7406 = vst [vmem:[#allocation44_spill] sm:$0xff] %v6134_v36  ;;  %v6145_v3 = vpack.c.bf16 %v196_v28, %v192_v2  ;;  %v6147_v20 = vpack.c.bf16 %v193_v1, %v189_v56  ;;  %3615 = vmatprep.subr.bf16.mxu0 %v6134_v36  ;;  %v198_v1 = vld [vmem:[%s7218_s4 + $0x348] sm:$0xff]  ;;  %v200_v28 = vld [vmem:[%s7218_s4 + $0x358] sm:$0xff] }
  0x59   :  { %7405 = vst [vmem:[#allocation43_spill] sm:$0xff] %v6120_v18  ;;  %v202_v2 = vld [vmem:[%s7218_s4 + $0x368] sm:$0xff] }
  0x5a   :  { %7407 = vst [vmem:[#allocation45_spill] sm:$0xff] %v6145_v3  ;;  %7408 = vst [vmem:[#allocation46_spill] sm:$0xff] %v6147_v20  ;;  %3617 = vmatpush1.bf16.msra.mxu0 %v6147_v20  ;;  %v6170_v56 = vpack.c.bf16 %v202_v2, %v198_v1  ;;  %v201_v20 = vld [vmem:[%s7218_s4 + $0x360] sm:$0xff]  ;;  %v199_v1 = vld [vmem:[%s7218_s4 + $0x350] sm:$0xff] }
  0x5b   :  { %3677 = vmatpush1.bf16.msra.mxu1 %v6120_v18  ;;  %v6156_v18 = vpack.c.bf16 %v195_v41, %v191_v42  ;;  %v204_v42 = vld [vmem:[%s7218_s4 + $0x378] sm:$0xff]  ;;  %v197_v41 = vld [vmem:[%s7218_s4 + $0x340] sm:$0xff]  ;;  %v203_v2 = vld [vmem:[%s7218_s4 + $0x370] sm:$0xff] }
  0x5c   :  { %3679 = vmatprep.subr.bf16.mxu1 %v6145_v3  ;;  %7410 = vst [vmem:[#allocation48_spill] sm:$0xff] %v6170_v56  ;;  %v6181_v3 = vpack.c.bf16 %v204_v42, %v200_v28  ;;  %v6183_v36 = vpack.c.bf16 %v201_v20, %v197_v41  ;;  %3619 = vmatprep.subr.bf16.mxu0 %v6170_v56  ;;  %v210_v20 = vld [vmem:[%s7218_s4 + $0x3a8] sm:$0xff]  ;;  %v208_v28 = vld [vmem:[%s7218_s4 + $0x398] sm:$0xff] }
  0x5d   :  { %7409 = vst [vmem:[#allocation47_spill] sm:$0xff] %v6156_v18  ;;  %v6205_v42 = vpack.c.bf16 %v210_v20, %v206_v55  ;;  %v212_v41 = vld [vmem:[%s7218_s4 + $0x3b8] sm:$0xff]  ;;  %v207_v55 = vld [vmem:[%s7218_s4 + $0x390] sm:$0xff] }
  0x5e   :  { %7411 = vst [vmem:[#allocation49_spill] sm:$0xff] %v6181_v3  ;;  %7412 = vst [vmem:[#allocation50_spill] sm:$0xff] %v6183_v36  ;;  %3621 = vmatpush1.bf16.msra.mxu0 %v6183_v36  ;;  %v6217_v56 = vpack.c.bf16 %v212_v41, %v208_v28  ;;  %v211_v20 = vld [vmem:[%s7218_s4 + $0x3b0] sm:$0xff]  ;;  %v214_v36 = vld [vmem:[%s7218_s4 + $0x3c8] sm:$0xff] }
  0x5f   :  { %3681 = vmatpush1.bf16.msra.mxu1 %v6156_v18  ;;  %v6192_v18 = vpack.c.bf16 %v203_v2, %v199_v1  ;;  %7414 = vst [vmem:[#allocation52_spill] sm:$0xff] %v6205_v42  ;;  %v205_v1 = vld [vmem:[%s7218_s4 + $0x380] sm:$0xff]  ;;  %3623 = vmatprep.subr.bf16.mxu0 %v6205_v42  ;;  %v6231_v30 = vpack.c.bf16 %v211_v20, %v207_v55  ;;  %v218_v28 = vld [vmem:[%s7218_s4 + $0x3e8] sm:$0xff]  ;;  %v216_v41 = vld [vmem:[%s7218_s4 + $0x3d8] sm:$0xff] }
  0x60   :  { %3683 = vmatprep.subr.bf16.mxu1 %v6181_v3  ;;  %v209_v2 = vld [vmem:[%s7218_s4 + $0x3a0] sm:$0xff]  ;;  %7415 = vst [vmem:[#allocation53_spill] sm:$0xff] %v6217_v56  ;;  %v215_v42 = vld [vmem:[%s7218_s4 + $0x3d0] sm:$0xff] }
  0x61   :  { %7413 = vst [vmem:[#allocation51_spill] sm:$0xff] %v6192_v18  ;;  %v6219_v3 = vpack.c.bf16 %v209_v2, %v205_v1  ;;  %7417 = vst [vmem:[#allocation55_spill] sm:$0xff] %v6231_v30  ;;  %v220_v1 = vld [vmem:[%s7218_s4 + $0x3f8] sm:$0xff]  ;;  %v6243_v2 = vpack.c.bf16 %v218_v28, %v214_v36  ;;  %v213_v55 = vld [vmem:[%s7218_s4 + $0x3c0] sm:$0xff] }
  0x62   :  { %v217_v20 = vld [vmem:[%s7218_s4 + $0x3e0] sm:$0xff]  ;;  %v219_v36 = vld [vmem:[%s7218_s4 + $0x3f0] sm:$0xff] }
  0x63   :  { %3685 = vmatpush1.bf16.msra.mxu1 %v6192_v18  ;;  %7416 = vst [vmem:[#allocation54_spill] sm:$0xff] %v6219_v3  ;;  %7418 = vst [vmem:[#allocation56_spill] sm:$0xff] %v6243_v2  ;;  %v6245_v18 = vpack.c.bf16 %v220_v1, %v216_v41  ;;  %3625 = vmatpush1.bf16.msra.mxu0 %v6219_v3  ;;  %v6257_v17 = vpack.c.bf16 %v217_v20, %v213_v55  ;;  %v228_v41 = vlaneseq }
  0x64   :  { %3687 = vmatprep.subr.bf16.mxu1 %v6217_v56  ;;  %3627 = vmatprep.subr.bf16.mxu0 %v6243_v2  ;;  %v6264_v28 = vpack.c.bf16 %v219_v36, %v215_v42  ;;  %v226_v42 = vld [vmem:[%s7219_s3] sm:$0xf] }
  0x65   :  { %7419 = vst [vmem:[#allocation57_spill] sm:$0xff] %v6245_v18  ;;  %7420 = vst [vmem:[#allocation58_spill] sm:$0xff] %v6257_v17  ;;  %v6271_v1 = vshrl.u32 %v228_v41, 7 }
  0x66   :  { %7421 = vst [vmem:[#allocation59_spill] sm:$0xff] %v6264_v28 }
  0x67   :  { %3689 = vmatpush1.bf16.msra.mxu1 %v6231_v30  ;;  %3629 = vmatpush1.bf16.msra.mxu0 %v6257_v17  ;;  %v7324_v55 = vsub.s32 0, %v6271_v1  ;;  %v7327_v36 = vsub.s32 1, %v6271_v1  ;;  %v7338_v30 = vsub.s32 2, %v6271_v1  ;;  %v7341_v56 = vsub.s32 3, %v6271_v1 }
  0x68   :  { %3691 = vmatprep.subr.bf16.mxu1 %v6245_v18  ;;  %3695 = vmatprep.subr.bf16.mxu0 %v5395_v8 }
  0x69   :  { %v235_v8 = vrot.slane %v226_v42, %v7327_v36  ;;  %v239_v61 = vrot.slane %v226_v42, %v7338_v30 }
  0x6b   :  { %3693 = vmatpush1.bf16.msra.mxu1 %v6264_v28  ;;  %v231_v28 = vrot.slane %v226_v42, %v7324_v55  ;;  %v243_v55 = vrot.slane %v226_v42, %v7341_v56 }
  0x6c   :  { %3727 = vmatprep.subr.bf16.mxu1 %v5452_v27 }
  0xd9   :  { %v334_v20 = vpop.f32.mrb[0].mxu1 }
  0xda   :  { %v336_v18 = vpop.f32.mrb[1].mxu1 }
  0xdd   :  { %v340_v27 = vpop.f32.mrb[2].mxu1 }
  0xde   :  { %v6282_v17 = vadd.f32 %v340_v27, %v231_v28  ;;  %v342_v41 = vpop.f32.mrb[3].mxu1 }
  0xdf   :  { %v6284_v2 = vadd.f32 %v342_v41, %v235_v8  ;;  %v6296_v41 = vadd.f32 %v334_v20, %v231_v28 }
  0xe0   :  { %7422 = vst [vmem:[#allocation60_spill] sm:$0xff] %v6282_v17 }
  0xe1   :  { %7423 = vst [vmem:[#allocation61_spill] sm:$0xff] %v6284_v2  ;;  %v411_v3 = vpop.f32.mrb[4].mxu1  ;;  %7426 = vst [vmem:[#allocation64_spill] sm:$0xff] %v6296_v41  ;;  %v6298_v2 = vadd.f32 %v336_v18, %v235_v8 }
  0xe2   :  { %v413_v5 = vpop.f32.mrb[5].mxu1 }
  0xe3   :  { %v6302_v42 = vadd.f32 %v413_v5, %v243_v55 }
  0xe5   :  { %v417_v52 = vpop.f32.mrb[6].mxu1 }
  0xe6   :  { %v6292_v36 = vadd.f32 %v417_v52, %v239_v61  ;;  %v419_v27 = vpop.f32.mrb[7].mxu1 }
  0xe7   :  { %v6294_v17 = vadd.f32 %v419_v27, %v243_v55  ;;  %v6304_v27 = vadd.f32 %v411_v3, %v239_v61 }
  0xe8   :  { %7424 = vst [vmem:[#allocation62_spill] sm:$0xff] %v6292_v36 }
  0xe9   :  { %7425 = vst [vmem:[#allocation63_spill] sm:$0xff] %v6294_v17  ;;  %v7443_v17 = vld [vmem:[#allocation22_spill] sm:$0xff] }
  0xf9   :  { %v488_v50 = vpop.f32.mrb[0].mxu0 }
  0xfa   :  { %v564_v44 = vadd.f32 %v488_v50, %v6296_v41  ;;  %v490_v26 = vpop.f32.mrb[1].mxu0 }
  0xfb   :  { %v565_v12 = vadd.f32 %v490_v26, %v6298_v2 }
  0xfc   :  { %v3400_v30 = vmul.f32 -1.442695, %v564_v44 }
  0xfd   :  { %v3401_v11 = vmul.f32 -1.442695, %v565_v12 }
  0xfe   :  { %5073 = vpow2.f32 %v3400_v30 }
  0xff   :  { %5075 = vpow2.f32 %v3401_v11 }
 0x101   :  { %v559_v52 = vpop.f32.mrb[8].mxu1 }
 0x102   :  { %v561_v56 = vpop.f32.mrb[9].mxu1  ;;  %v566_v8 = vadd.f32 %v559_v52, %v6304_v27 }
 0x103   :  { %v567_v28 = vadd.f32 %v561_v56, %v6302_v42 }
 0x105   :  { %v3402_v18 = vmul.f32 -1.442695, %v567_v28 }
 0x107   :  { %5077 = vpow2.f32 %v3402_v18  ;;  %v7429_v18 = vld [vmem:[#allocation8_spill] sm:$0xff] }
 0x108   :  { %v5074_v20 = vpop.eup %5073  ;;  %5079 = vtanh.f32 %v566_v8  ;;  %v7428_v8 = vld [vmem:[#allocation7_spill] sm:$0xff] }
 0x109   :  { %v5076_v50 = vpop.eup %5075  ;;  %v571_v36 = vadd.f32 1.0, %v5074_v20  ;;  %v7430_v20 = vld [vmem:[#allocation9_spill] sm:$0xff] }
 0x10a   :  { %v577_v26 = vadd.f32 1.0, %v5076_v50  ;;  %v7431_v50 = vld [vmem:[#allocation10_spill] sm:$0xff] }
 0x10b   :  { %5081 = vrcp.f32 %v571_v36  ;;  %v7427_v36 = vmov 0.0  }
 0x10c   :  { %5083 = vrcp.f32 %v577_v26  ;;  %v7432_v26 = vld [vmem:[#allocation11_spill] sm:$0xff] }
 0x111   :  { %v5078_v11 = vpop.eup %5077 }
 0x112   :  { %v5080_v12 = vpop.eup %5079  ;;  %v584_v3 = vadd.f32 1.0, %v5078_v11  ;;  %v7433_v11 = vld [vmem:[#allocation12_spill] sm:$0xff] }
 0x114   :  { %5085 = vrcp.f32 %v584_v3  ;;  %v7438_v3 = vld [vmem:[#allocation17_spill] sm:$0xff] }
 0x115   :  { %v5082_v44 = vpop.eup %5081 }
 0x116   :  { %v5084_v5 = vpop.eup %5083  ;;  %v588_v30 = vmul.f32 %v5082_v44, %v5080_v12  ;;  %v7434_v12 = vld [vmem:[#allocation13_spill] sm:$0xff]  ;;  %v7435_v44 = vld [vmem:[#allocation14_spill] sm:$0xff] }
 0x117   :  { %v587_v61 = vmul.f32 0.0, %v5084_v5  ;;  %v7436_v5 = vld [vmem:[#allocation15_spill] sm:$0xff] }
 0x119   :  { %v6308_v55 = vadd.f32 %v588_v30, %v587_v61  ;;  %v7437_v30 = vld [vmem:[#allocation16_spill] sm:$0xff]  ;;  %v7439_v61 = vld [vmem:[#allocation18_spill] sm:$0xff] }
 0x11b   :  { %5087 = vtanh.f32 %v6308_v55 }
 0x11e   :  { %v5086_v56 = vpop.eup %5085 }
 0x125   :  { %v5088_v52 = vpop.eup %5087 }
 0x126   :  { %v591_v28 = vmul.f32 %v5088_v52, %v5086_v56  ;;  %v7440_v56 = vld [vmem:[#allocation19_spill] sm:$0xff]  ;;  %v7441_v52 = vld [vmem:[#allocation20_spill] sm:$0xff] }
 0x128   :  { %678 = vmatmul.mubr.f32.vlgmr.msra.gmra.mrb[2].mxu0 %v591_v28  ;;  %749 = vmatmul.mubr.f32.vlgmr.msra.gmra.mrb[10].mxu1 %v591_v28 }
 0x129   :  { %3697 = vmatpush1.bf16.msra.mxu0 %v5397_v9  ;;  %3729 = vmatpush1.bf16.msra.mxu1 %v5476_v34 }
 0x12a   :  { %3699 = vmatprep.subr.bf16.mxu0 %v5409_v14  ;;  %3731 = vmatprep.subr.bf16.mxu1 %v5490_v39 }
 0x12b   :  { %843 = vmatprep.mubr.f32.mxu0 %v7427_v36  ;;  %914 = vmatprep.mubr.f32.mxu1 %v7427_v36 }
 0x12d   :  { %3701 = vmatpush1.bf16.msra.mxu0 %v5427_v19  ;;  %3733 = vmatpush1.bf16.msra.mxu1 %v5513_v46 }
 0x12e   :  { %3703 = vmatprep.subr.bf16.mxu0 %v5440_v23  ;;  %3735 = vmatprep.subr.bf16.mxu1 %v5527_v51 }
 0x131   :  { %3705 = vmatpush1.bf16.msra.mxu0 %v5472_v33  ;;  %3737 = vmatpush1.bf16.msra.mxu1 %v5551_v58 }
 0x132   :  { %3707 = vmatprep.subr.bf16.mxu0 %v5478_v35  ;;  %3739 = vmatprep.subr.bf16.mxu1 %v5565_v63 }
 0x135   :  { %3709 = vmatpush1.bf16.msra.mxu0 %v5509_v45  ;;  %3741 = vmatpush1.bf16.msra.mxu1 %v5588_v7 }
 0x136   :  { %3711 = vmatprep.subr.bf16.mxu0 %v5515_v47  ;;  %3743 = vmatprep.subr.bf16.mxu1 %v5602_v15 }
 0x139   :  { %3713 = vmatpush1.bf16.msra.mxu0 %v5546_v57  ;;  %3745 = vmatpush1.bf16.msra.mxu1 %v5624_v24 }
 0x13a   :  { %3715 = vmatprep.subr.bf16.mxu0 %v5553_v59  ;;  %3747 = vmatprep.subr.bf16.mxu1 %v5635_v29 }
 0x13d   :  { %3717 = vmatpush1.bf16.msra.mxu0 %v5584_v6  ;;  %3749 = vmatpush1.bf16.msra.mxu1 %v5654_v38 }
 0x13e   :  { %3719 = vmatprep.subr.bf16.mxu0 %v5590_v10  ;;  %3751 = vmatprep.subr.bf16.mxu1 %v5657_v40 }
 0x141   :  { %3721 = vmatpush1.bf16.msra.mxu0 %v5620_v22  ;;  %3753 = vmatpush1.bf16.msra.mxu1 %v5673_v48 }
 0x142   :  { %3723 = vmatprep.subr.bf16.mxu0 %v5626_v25  ;;  %3755 = vmatprep.subr.bf16.mxu1 %v5676_v49 }
 0x145   :  { %3725 = vmatpush1.bf16.msra.mxu0 %v5650_v37  ;;  %3757 = vmatpush1.bf16.msra.mxu1 %v5687_v53 }
 0x146   :  { %3759 = vmatprep.subr.bf16.mxu0 %v5702_v60  ;;  %3823 = vmatprep.subr.bf16.mxu1 %v5707_v62 }
 0x148   :  { %844 = vmatmul.mubr.f32.vlgmr.msra.gmra.mrb[4].mxu0 %v591_v28  ;;  %915 = vmatmul.mubr.f32.vlgmr.msra.gmra.mrb[12].mxu1 %v591_v28  ;;  %v7442_v28 = vld [vmem:[#allocation21_spill] sm:$0xff] }
 0x149   :  { %3761 = vmatpush1.bf16.msra.mxu0 %v5719_v4  ;;  %3825 = vmatpush1.bf16.msra.mxu1 %v5731_v13 }
 0x14a   :  { %3763 = vmatprep.subr.bf16.mxu0 %v5733_v16  ;;  %3827 = vmatprep.subr.bf16.mxu1 %v5745_v21 }
 0x14d   :  { %3765 = vmatpush1.bf16.msra.mxu0 %v5758_v31  ;;  %3829 = vmatpush1.bf16.msra.mxu1 %v5760_v32 }
 0x14e   :  { %3767 = vmatprep.subr.bf16.mxu0 %v5772_v43  ;;  %3831 = vmatprep.subr.bf16.mxu1 %v5783_v54 }
 0x151   :  { %3769 = vmatpush1.bf16.msra.mxu0 %v5795_v0  ;;  %3833 = vmatpush1.bf16.msra.mxu1 %v7428_v8 }
 0x152   :  { %3771 = vmatprep.subr.bf16.mxu0 %v7429_v18  ;;  %3835 = vmatprep.subr.bf16.mxu1 %v7430_v20 }
 0x155   :  { %3773 = vmatpush1.bf16.msra.mxu0 %v7431_v50  ;;  %3837 = vmatpush1.bf16.msra.mxu1 %v7432_v26  ;;  %v7487_v50 = vsub.s32 3, %v6271_v1 }
 0x156   :  { %3775 = vmatprep.subr.bf16.mxu0 %v7433_v11  ;;  %3839 = vmatprep.subr.bf16.mxu1 %v7434_v12  ;;  %v7444_v11 = vld [vmem:[#allocation23_spill] sm:$0xff]  ;;  %v7445_v12 = vld [vmem:[#allocation24_spill] sm:$0xff] }
 0x159   :  { %3777 = vmatpush1.bf16.msra.mxu0 %v7435_v44  ;;  %3841 = vmatpush1.bf16.msra.mxu1 %v7436_v5  ;;  %v7446_v44 = vld [vmem:[#allocation25_spill] sm:$0xff]  ;;  %v7447_v5 = vld [vmem:[#allocation26_spill] sm:$0xff] }
 0x15a   :  { %3779 = vmatprep.subr.bf16.mxu0 %v7437_v30  ;;  %3843 = vmatprep.subr.bf16.mxu1 %v7438_v3  ;;  %v7448_v30 = vld [vmem:[#allocation27_spill] sm:$0xff]  ;;  %v7449_v3 = vld [vmem:[#allocation28_spill] sm:$0xff] }
 0x15d   :  { %3781 = vmatpush1.bf16.msra.mxu0 %v7439_v61  ;;  %3845 = vmatpush1.bf16.msra.mxu1 %v7440_v56  ;;  %v7450_v61 = vld [vmem:[#allocation29_spill] sm:$0xff]  ;;  %v7451_v56 = vld [vmem:[#allocation30_spill] sm:$0xff] }
 0x15e   :  { %3783 = vmatprep.subr.bf16.mxu0 %v7441_v52  ;;  %3847 = vmatprep.subr.bf16.mxu1 %v7442_v28  ;;  %v7452_v52 = vld [vmem:[#allocation31_spill] sm:$0xff]  ;;  %v7453_v28 = vld [vmem:[#allocation32_spill] sm:$0xff] }
 0x161   :  { %3785 = vmatpush1.bf16.msra.mxu0 %v7443_v17  ;;  %3849 = vmatpush1.bf16.msra.mxu1 %v7444_v11  ;;  %v7454_v17 = vld [vmem:[#allocation33_spill] sm:$0xff]  ;;  %v7455_v11 = vld [vmem:[#allocation34_spill] sm:$0xff] }
 0x162   :  { %3787 = vmatprep.subr.bf16.mxu0 %v7445_v12  ;;  %3851 = vmatprep.subr.bf16.mxu1 %v7446_v44  ;;  %v7456_v12 = vld [vmem:[#allocation35_spill] sm:$0xff]  ;;  %v7457_v44 = vld [vmem:[#allocation36_spill] sm:$0xff] }
 0x165   :  { %3789 = vmatpush1.bf16.msra.mxu0 %v7447_v5  ;;  %3853 = vmatpush1.bf16.msra.mxu1 %v7448_v30  ;;  %v7458_v5 = vld [vmem:[#allocation37_spill] sm:$0xff]  ;;  %v7459_v30 = vld [vmem:[#allocation38_spill] sm:$0xff] }
 0x166   :  { %3791 = vmatprep.subr.bf16.mxu0 %v7449_v3  ;;  %3855 = vmatprep.subr.bf16.mxu1 %v7450_v61  ;;  %v7460_v3 = vld [vmem:[#allocation39_spill] sm:$0xff]  ;;  %v7461_v61 = vld [vmem:[#allocation40_spill] sm:$0xff] }
 0x169   :  { %3793 = vmatpush1.bf16.msra.mxu0 %v7451_v56  ;;  %3857 = vmatpush1.bf16.msra.mxu1 %v7452_v52  ;;  %v7462_v56 = vld [vmem:[#allocation41_spill] sm:$0xff]  ;;  %v7463_v52 = vld [vmem:[#allocation42_spill] sm:$0xff] }
 0x16a   :  { %3795 = vmatprep.subr.bf16.mxu0 %v7453_v28  ;;  %3859 = vmatprep.subr.bf16.mxu1 %v7454_v17  ;;  %v7464_v28 = vld [vmem:[#allocation43_spill] sm:$0xff]  ;;  %v7465_v17 = vld [vmem:[#allocation44_spill] sm:$0xff] }
 0x16d   :  { %3797 = vmatpush1.bf16.msra.mxu0 %v7455_v11  ;;  %3861 = vmatpush1.bf16.msra.mxu1 %v7456_v12  ;;  %v7466_v11 = vld [vmem:[#allocation45_spill] sm:$0xff]  ;;  %v7467_v12 = vld [vmem:[#allocation46_spill] sm:$0xff] }
 0x16e   :  { %3799 = vmatprep.subr.bf16.mxu0 %v7457_v44  ;;  %3863 = vmatprep.subr.bf16.mxu1 %v7458_v5  ;;  %v7468_v44 = vld [vmem:[#allocation47_spill] sm:$0xff]  ;;  %v7469_v5 = vld [vmem:[#allocation48_spill] sm:$0xff] }
 0x171   :  { %3801 = vmatpush1.bf16.msra.mxu0 %v7459_v30  ;;  %3865 = vmatpush1.bf16.msra.mxu1 %v7460_v3  ;;  %v7470_v30 = vld [vmem:[#allocation49_spill] sm:$0xff]  ;;  %v7471_v3 = vld [vmem:[#allocation50_spill] sm:$0xff] }
 0x172   :  { %3803 = vmatprep.subr.bf16.mxu0 %v7461_v61  ;;  %3867 = vmatprep.subr.bf16.mxu1 %v7462_v56  ;;  %v7472_v61 = vld [vmem:[#allocation51_spill] sm:$0xff]  ;;  %v7473_v56 = vld [vmem:[#allocation52_spill] sm:$0xff] }
 0x175   :  { %3805 = vmatpush1.bf16.msra.mxu0 %v7463_v52  ;;  %3869 = vmatpush1.bf16.msra.mxu1 %v7464_v28  ;;  %v7474_v52 = vld [vmem:[#allocation53_spill] sm:$0xff]  ;;  %v7475_v28 = vld [vmem:[#allocation54_spill] sm:$0xff] }
 0x176   :  { %3807 = vmatprep.subr.bf16.mxu0 %v7465_v17  ;;  %3871 = vmatprep.subr.bf16.mxu1 %v7466_v11  ;;  %v7476_v17 = vld [vmem:[#allocation55_spill] sm:$0xff]  ;;  %v7477_v11 = vld [vmem:[#allocation56_spill] sm:$0xff] }
 0x179   :  { %3809 = vmatpush1.bf16.msra.mxu0 %v7467_v12  ;;  %3873 = vmatpush1.bf16.msra.mxu1 %v7468_v44  ;;  %v7478_v12 = vld [vmem:[#allocation57_spill] sm:$0xff]  ;;  %v7479_v44 = vld [vmem:[#allocation58_spill] sm:$0xff] }
 0x17a   :  { %3811 = vmatprep.subr.bf16.mxu0 %v7469_v5  ;;  %3875 = vmatprep.subr.bf16.mxu1 %v7470_v30  ;;  %v7480_v5 = vld [vmem:[#allocation59_spill] sm:$0xff]  ;;  %v7481_v30 = vld [vmem:[#allocation2_spill] sm:$0xff] }
 0x17d   :  { %3813 = vmatpush1.bf16.msra.mxu0 %v7471_v3  ;;  %3877 = vmatpush1.bf16.msra.mxu1 %v7472_v61  ;;  %v7482_v3 = vld [vmem:[#allocation3_spill] sm:$0xff] }
 0x17e   :  { %3815 = vmatprep.subr.bf16.mxu0 %v7473_v56  ;;  %3879 = vmatprep.subr.bf16.mxu1 %v7474_v52  ;;  %v221_v52 = vld [vmem:[%s7220_s5] sm:$0xf] }
 0x17f   :  { %v6424_v20 = vrot.slane %v221_v52, %v7487_v50 }
 0x181   :  { %3817 = vmatpush1.bf16.msra.mxu0 %v7475_v28  ;;  %3881 = vmatpush1.bf16.msra.mxu1 %v7476_v17  ;;  %v7483_v28 = vsub.s32 0, %v6271_v1  ;;  %7488 = vst [vmem:[#allocation67_spill] sm:$0xff] %v6424_v20 }
 0x182   :  { %3819 = vmatprep.subr.bf16.mxu0 %v7477_v11  ;;  %3883 = vmatprep.subr.bf16.mxu1 %v7478_v12  ;;  %v7485_v11 = vsub.s32 1, %v6271_v1 }
 0x183   :  { %v6414_v56 = vrot.slane %v221_v52, %v7483_v28 }
 0x184   :  { %v6418_v17 = vrot.slane %v221_v52, %v7485_v11  ;;  %v7489_v11 = vsub.s32 2, %v6271_v1 }
 0x185   :  { %3821 = vmatpush1.bf16.msra.mxu0 %v7479_v44  ;;  %3885 = vmatpush1.bf16.msra.mxu1 %v7480_v5  ;;  %7484 = vst [vmem:[#allocation65_spill] sm:$0xff] %v6414_v56 }
 0x186   :  { %3887 = vmatprep.subr.bf16.mxu0 %v7481_v30  ;;  %3919 = vmatprep.subr.bf16.mxu1 %v7482_v3  ;;  %7486 = vst [vmem:[#allocation66_spill] sm:$0xff] %v6418_v17  ;;  %v6429_v8 = vrot.slane %v221_v52, %v7489_v11 }
 0x188   :  { %7490 = vst [vmem:[#allocation68_spill] sm:$0xff] %v6429_v8 }
 0x1fb   :  { %v679_v12 = vpop.f32.mrb[2].mxu0  ;;  %v750_v44 = vpop.f32.mrb[10].mxu1 }
 0x1fc   :  { %v680_v5 = vadd.f32 %v679_v12, %v6414_v56  ;;  %v681_v61 = vpop.f32.mrb[3].mxu0  ;;  %v752_v30 = vpop.f32.mrb[11].mxu1  ;;  %v751_v12 = vadd.f32 %v750_v44, %v6429_v8 }
 0x1fd   :  { %v682_v3 = vadd.f32 %v681_v61, %v6418_v17  ;;  %v753_v28 = vadd.f32 %v752_v30, %v6424_v20 }
 0x1fe   :  { %v3403_v26 = vmul.f32 -1.442695, %v680_v5 }
 0x1ff   :  { %v3404_v18 = vmul.f32 -1.442695, %v682_v3  ;;  %v3405_v0 = vmul.f32 -1.442695, %v753_v28 }
 0x200   :  { %5089 = vpow2.f32 %v3403_v26 }
 0x201   :  { %5091 = vpow2.f32 %v3404_v18 }
 0x202   :  { %5093 = vpow2.f32 %v3405_v0 }
 0x203   :  { %5095 = vtanh.f32 %v751_v12 }
 0x20a   :  { %v5090_v56 = vpop.eup %5089 }
 0x20b   :  { %v5092_v54 = vpop.eup %5091  ;;  %v758_v61 = vadd.f32 1.0, %v5090_v56 }
 0x20c   :  { %v764_v5 = vadd.f32 1.0, %v5092_v54  ;;  %v5094_v50 = vpop.eup %5093 }
 0x20d   :  { %5097 = vrcp.f32 %v758_v61  ;;  %v5096_v26 = vpop.eup %5095  ;;  %v771_v20 = vadd.f32 1.0, %v5094_v50 }
 0x20e   :  { %5099 = vrcp.f32 %v764_v5 }
 0x20f   :  { %5101 = vrcp.f32 %v771_v20 }
 0x217   :  { %v5098_v18 = vpop.eup %5097 }
 0x218   :  { %v5100_v3 = vpop.eup %5099  ;;  %v775_v30 = vmul.f32 %v5098_v18, %v5096_v26 }
 0x219   :  { %v774_v1 = vmul.f32 0.0, %v5100_v3  ;;  %v5102_v18 = vpop.eup %5101 }
 0x21b   :  { %v6432_v52 = vadd.f32 %v775_v30, %v774_v1  ;;  %v845_v28 = vpop.f32.mrb[4].mxu0  ;;  %v916_v11 = vpop.f32.mrb[12].mxu1 }
 0x21c   :  { %v925_v44 = vrot.slane %v845_v28, 6  ;;  %v847_v8 = vpop.f32.mrb[5].mxu0  ;;  %v918_v56 = vpop.f32.mrb[13].mxu1  ;;  %v927_v3 = vrot.slane %v916_v11, 6 }
 0x21d   :  { %5103 = vtanh.f32 %v6432_v52  ;;  %v926_v54 = vrot.slane %v847_v8, 6  ;;  %v928_v26 = vrot.slane %v918_v56, 6 }
 0x21e   :  { %v933_v0 = vadd.f32 %v925_v44, %v6296_v41  ;;  %v935_v28 = vadd.f32 %v927_v3, %v6304_v27 }
 0x21f   :  { %v934_v12 = vadd.f32 %v926_v54, %v6298_v2  ;;  %v936_v50 = vadd.f32 %v928_v26, %v6302_v42 }
 0x220   :  { %v3406_v61 = vmul.f32 -1.442695, %v933_v0 }
 0x221   :  { %v3407_v5 = vmul.f32 -1.442695, %v934_v12  ;;  %v3408_v1 = vmul.f32 -1.442695, %v936_v50 }
 0x222   :  { %5105 = vpow2.f32 %v3406_v61 }
 0x223   :  { %5107 = vpow2.f32 %v3407_v5  ;;  %v957_v5 = vrot.slane %v6308_v55, 6  ;;  %v7492_v55 = vld [vmem:[#allocation5_spill] sm:$0xff] }
 0x224   :  { %5109 = vpow2.f32 %v3408_v1 }
 0x225   :  { %5111 = vtanh.f32 %v935_v28 }
 0x227   :  { %v5104_v20 = vpop.eup %5103 }
 0x228   :  { %v6438_v30 = vmul.f32 %v5104_v20, %v5102_v18 }
 0x22a   :  { %7491 = vst [vmem:[#allocation69_spill] sm:$0xff] %v6438_v30  ;;  %v965_v8 = vrot.slane %v6438_v30, 6  ;;  %v7509_v30 = vld [vmem:[#allocation22_spill] sm:$0xff] }
 0x22c   :  { %v5106_v44 = vpop.eup %5105  ;;  %v968_v41 = vrot.slane %v965_v8, 2 }
 0x22d   :  { %v5108_v54 = vpop.eup %5107  ;;  %v940_v0 = vadd.f32 1.0, %v5106_v44  ;;  %v7493_v44 = vld [vmem:[#allocation6_spill] sm:$0xff] }
 0x22e   :  { %v946_v56 = vadd.f32 1.0, %v5108_v54  ;;  %1035 = vmatprep.mubr.f32.mxu0 %v968_v41  ;;  %1106 = vmatprep.mubr.f32.mxu1 %v968_v41  ;;  %v5110_v11 = vpop.eup %5109  ;;  %v7494_v54 = vld [vmem:[#allocation7_spill] sm:$0xff] }
 0x22f   :  { %5113 = vrcp.f32 %v940_v0  ;;  %v5112_v12 = vpop.eup %5111  ;;  %v953_v18 = vadd.f32 1.0, %v5110_v11  ;;  %v7495_v0 = vld [vmem:[#allocation8_spill] sm:$0xff]  ;;  %v7497_v11 = vld [vmem:[#allocation10_spill] sm:$0xff] }
 0x230   :  { %5115 = vrcp.f32 %v946_v56  ;;  %v7496_v56 = vld [vmem:[#allocation9_spill] sm:$0xff] }
 0x231   :  { %5117 = vrcp.f32 %v953_v18  ;;  %v7503_v18 = vld [vmem:[#allocation16_spill] sm:$0xff] }
 0x239   :  { %v5114_v61 = vpop.eup %5113 }
 0x23a   :  { %v5116_v26 = vpop.eup %5115  ;;  %v960_v50 = vmul.f32 %v5114_v61, %v5112_v12  ;;  %v7498_v12 = vld [vmem:[#allocation11_spill] sm:$0xff]  ;;  %v7499_v61 = vld [vmem:[#allocation12_spill] sm:$0xff] }
 0x23b   :  { %v959_v3 = vmul.f32 %v5116_v26, %v957_v5  ;;  %v5118_v1 = vpop.eup %5117  ;;  %v7500_v5 = vld [vmem:[#allocation13_spill] sm:$0xff]  ;;  %v7501_v26 = vld [vmem:[#allocation14_spill] sm:$0xff] }
 0x23d   :  { %v6443_v20 = vadd.f32 %v960_v50, %v959_v3  ;;  %v7502_v50 = vld [vmem:[#allocation15_spill] sm:$0xff]  ;;  %v7504_v3 = vld [vmem:[#allocation17_spill] sm:$0xff] }
 0x23f   :  { %5119 = vtanh.f32 %v6443_v20 }
 0x249   :  { %v5120_v28 = vpop.eup %5119 }
 0x24a   :  { %v963_v8 = vmul.f32 %v5120_v28, %v5118_v1  ;;  %v7505_v1 = vld [vmem:[#allocation18_spill] sm:$0xff]  ;;  %v7506_v28 = vld [vmem:[#allocation19_spill] sm:$0xff] }
 0x24c   :  { %v967_v41 = vrot.slane %v963_v8, 2  ;;  %v7507_v8 = vld [vmem:[#allocation20_spill] sm:$0xff] }
 0x24e   :  { %1036 = vmatmul.mubr.f32.vlgmr.msra.gmra.mrb[6].mxu0 %v967_v41  ;;  %1107 = vmatmul.mubr.f32.vlgmr.msra.gmra.mrb[14].mxu1 %v967_v41 }
 0x24f   :  { %3889 = vmatpush1.bf16.msra.mxu0 %v5397_v9  ;;  %3921 = vmatpush1.bf16.msra.mxu1 %v5476_v34 }
 0x250   :  { %3891 = vmatprep.subr.bf16.mxu0 %v5409_v14  ;;  %3923 = vmatprep.subr.bf16.mxu1 %v5490_v39 }
 0x251   :  { %1201 = vmatprep.mubr.f32.mxu0 %v7427_v36  ;;  %1272 = vmatprep.mubr.f32.mxu1 %v7427_v36 }
 0x253   :  { %3893 = vmatpush1.bf16.msra.mxu0 %v5427_v19  ;;  %3925 = vmatpush1.bf16.msra.mxu1 %v5513_v46 }
 0x254   :  { %3895 = vmatprep.subr.bf16.mxu0 %v5440_v23  ;;  %3927 = vmatprep.subr.bf16.mxu1 %v5527_v51 }
 0x257   :  { %3897 = vmatpush1.bf16.msra.mxu0 %v5472_v33  ;;  %3929 = vmatpush1.bf16.msra.mxu1 %v5551_v58 }
 0x258   :  { %3899 = vmatprep.subr.bf16.mxu0 %v5478_v35  ;;  %3931 = vmatprep.subr.bf16.mxu1 %v5565_v63 }
 0x25b   :  { %3901 = vmatpush1.bf16.msra.mxu0 %v5509_v45  ;;  %3933 = vmatpush1.bf16.msra.mxu1 %v5588_v7 }
 0x25c   :  { %3903 = vmatprep.subr.bf16.mxu0 %v5515_v47  ;;  %3935 = vmatprep.subr.bf16.mxu1 %v5602_v15 }
 0x25f   :  { %3905 = vmatpush1.bf16.msra.mxu0 %v5546_v57  ;;  %3937 = vmatpush1.bf16.msra.mxu1 %v5624_v24 }
 0x260   :  { %3907 = vmatprep.subr.bf16.mxu0 %v5553_v59  ;;  %3939 = vmatprep.subr.bf16.mxu1 %v5635_v29 }
 0x263   :  { %3909 = vmatpush1.bf16.msra.mxu0 %v5584_v6  ;;  %3941 = vmatpush1.bf16.msra.mxu1 %v5654_v38 }
 0x264   :  { %3911 = vmatprep.subr.bf16.mxu0 %v5590_v10  ;;  %3943 = vmatprep.subr.bf16.mxu1 %v5657_v40 }
 0x267   :  { %3913 = vmatpush1.bf16.msra.mxu0 %v5620_v22  ;;  %3945 = vmatpush1.bf16.msra.mxu1 %v5673_v48 }
 0x268   :  { %3915 = vmatprep.subr.bf16.mxu0 %v5626_v25  ;;  %3947 = vmatprep.subr.bf16.mxu1 %v5676_v49 }
 0x26b   :  { %3917 = vmatpush1.bf16.msra.mxu0 %v5650_v37  ;;  %3949 = vmatpush1.bf16.msra.mxu1 %v5687_v53 }
 0x26c   :  { %3951 = vmatprep.subr.bf16.mxu0 %v5702_v60  ;;  %4015 = vmatprep.subr.bf16.mxu1 %v5707_v62 }
 0x26e   :  { %1202 = vmatmul.mubr.f32.vlgmr.msra.gmra.mrb[8].mxu0 %v967_v41  ;;  %1273 = vmatmul.mubr.f32.vlgmr.msra.gmra.mrb[16].mxu1 %v967_v41  ;;  %v7508_v41 = vld [vmem:[#allocation21_spill] sm:$0xff] }
 0x26f   :  { %3953 = vmatpush1.bf16.msra.mxu0 %v5719_v4  ;;  %4017 = vmatpush1.bf16.msra.mxu1 %v5731_v13 }
 0x270   :  { %3955 = vmatprep.subr.bf16.mxu0 %v5733_v16  ;;  %4019 = vmatprep.subr.bf16.mxu1 %v5745_v21 }
 0x273   :  { %3957 = vmatpush1.bf16.msra.mxu0 %v5758_v31  ;;  %4021 = vmatpush1.bf16.msra.mxu1 %v5760_v32 }
 0x274   :  { %3959 = vmatprep.subr.bf16.mxu0 %v5772_v43  ;;  %4023 = vmatprep.subr.bf16.mxu1 %v7492_v55 }
 0x277   :  { %3961 = vmatpush1.bf16.msra.mxu0 %v7493_v44  ;;  %4025 = vmatpush1.bf16.msra.mxu1 %v7494_v54 }
 0x278   :  { %3963 = vmatprep.subr.bf16.mxu0 %v7495_v0  ;;  %4027 = vmatprep.subr.bf16.mxu1 %v7496_v56 }
 0x27b   :  { %3965 = vmatpush1.bf16.msra.mxu0 %v7497_v11  ;;  %4029 = vmatpush1.bf16.msra.mxu1 %v7498_v12  ;;  %v7549_v12 = vld [vmem:[#allocation65_spill] sm:$0xff] }
 0x27c   :  { %3967 = vmatprep.subr.bf16.mxu0 %v7499_v61  ;;  %4031 = vmatprep.subr.bf16.mxu1 %v7500_v5  ;;  %v7510_v61 = vld [vmem:[#allocation23_spill] sm:$0xff]  ;;  %v7511_v5 = vld [vmem:[#allocation24_spill] sm:$0xff] }
 0x27f   :  { %3969 = vmatpush1.bf16.msra.mxu0 %v7501_v26  ;;  %4033 = vmatpush1.bf16.msra.mxu1 %v7502_v50  ;;  %v7512_v26 = vld [vmem:[#allocation25_spill] sm:$0xff]  ;;  %v7513_v50 = vld [vmem:[#allocation26_spill] sm:$0xff] }
 0x280   :  { %3971 = vmatprep.subr.bf16.mxu0 %v7503_v18  ;;  %4035 = vmatprep.subr.bf16.mxu1 %v7504_v3  ;;  %v7514_v18 = vld [vmem:[#allocation27_spill] sm:$0xff]  ;;  %v7515_v3 = vld [vmem:[#allocation28_spill] sm:$0xff] }
 0x283   :  { %3973 = vmatpush1.bf16.msra.mxu0 %v7505_v1  ;;  %4037 = vmatpush1.bf16.msra.mxu1 %v7506_v28  ;;  %v7516_v1 = vld [vmem:[#allocation29_spill] sm:$0xff]  ;;  %v7517_v28 = vld [vmem:[#allocation30_spill] sm:$0xff] }
 0x284   :  { %3975 = vmatprep.subr.bf16.mxu0 %v7507_v8  ;;  %4039 = vmatprep.subr.bf16.mxu1 %v7508_v41  ;;  %v7518_v8 = vld [vmem:[#allocation31_spill] sm:$0xff]  ;;  %v7519_v41 = vld [vmem:[#allocation32_spill] sm:$0xff] }
 0x287   :  { %3977 = vmatpush1.bf16.msra.mxu0 %v7509_v30  ;;  %4041 = vmatpush1.bf16.msra.mxu1 %v7510_v61  ;;  %v7520_v30 = vld [vmem:[#allocation33_spill] sm:$0xff]  ;;  %v7521_v61 = vld [vmem:[#allocation34_spill] sm:$0xff] }
 0x288   :  { %3979 = vmatprep.subr.bf16.mxu0 %v7511_v5  ;;  %4043 = vmatprep.subr.bf16.mxu1 %v7512_v26  ;;  %v7522_v5 = vld [vmem:[#allocation35_spill] sm:$0xff]  ;;  %v7523_v26 = vld [vmem:[#allocation36_spill] sm:$0xff] }
 0x28b   :  { %3981 = vmatpush1.bf16.msra.mxu0 %v7513_v50  ;;  %4045 = vmatpush1.bf16.msra.mxu1 %v7514_v18  ;;  %v7524_v50 = vld [vmem:[#allocation37_spill] sm:$0xff]  ;;  %v7525_v18 = vld [vmem:[#allocation38_spill] sm:$0xff] }
 0x28c   :  { %3983 = vmatprep.subr.bf16.mxu0 %v7515_v3  ;;  %4047 = vmatprep.subr.bf16.mxu1 %v7516_v1  ;;  %v7526_v3 = vld [vmem:[#allocation39_spill] sm:$0xff]  ;;  %v7527_v1 = vld [vmem:[#allocation40_spill] sm:$0xff] }
 0x28f   :  { %3985 = vmatpush1.bf16.msra.mxu0 %v7517_v28  ;;  %4049 = vmatpush1.bf16.msra.mxu1 %v7518_v8  ;;  %v7528_v28 = vld [vmem:[#allocation41_spill] sm:$0xff]  ;;  %v7529_v8 = vld [vmem:[#allocation42_spill] sm:$0xff] }
 0x290   :  { %3987 = vmatprep.subr.bf16.mxu0 %v7519_v41  ;;  %4051 = vmatprep.subr.bf16.mxu1 %v7520_v30  ;;  %v7530_v41 = vld [vmem:[#allocation43_spill] sm:$0xff]  ;;  %v7531_v30 = vld [vmem:[#allocation44_spill] sm:$0xff] }
 0x293   :  { %3989 = vmatpush1.bf16.msra.mxu0 %v7521_v61  ;;  %4053 = vmatpush1.bf16.msra.mxu1 %v7522_v5  ;;  %v7532_v61 = vld [vmem:[#allocation45_spill] sm:$0xff]  ;;  %v7533_v5 = vld [vmem:[#allocation46_spill] sm:$0xff] }
 0x294   :  { %3991 = vmatprep.subr.bf16.mxu0 %v7523_v26  ;;  %4055 = vmatprep.subr.bf16.mxu1 %v7524_v50  ;;  %v7534_v26 = vld [vmem:[#allocation47_spill] sm:$0xff]  ;;  %v7535_v50 = vld [vmem:[#allocation48_spill] sm:$0xff] }
 0x297   :  { %3993 = vmatpush1.bf16.msra.mxu0 %v7525_v18  ;;  %4057 = vmatpush1.bf16.msra.mxu1 %v7526_v3  ;;  %v7536_v18 = vld [vmem:[#allocation49_spill] sm:$0xff]  ;;  %v7537_v3 = vld [vmem:[#allocation50_spill] sm:$0xff] }
 0x298   :  { %3995 = vmatprep.subr.bf16.mxu0 %v7527_v1  ;;  %4059 = vmatprep.subr.bf16.mxu1 %v7528_v28  ;;  %v7538_v1 = vld [vmem:[#allocation51_spill] sm:$0xff]  ;;  %v7539_v28 = vld [vmem:[#allocation52_spill] sm:$0xff] }
 0x29b   :  { %3997 = vmatpush1.bf16.msra.mxu0 %v7529_v8  ;;  %4061 = vmatpush1.bf16.msra.mxu1 %v7530_v41  ;;  %v7540_v8 = vld [vmem:[#allocation53_spill] sm:$0xff]  ;;  %v7541_v41 = vld [vmem:[#allocation54_spill] sm:$0xff] }
 0x29c   :  { %3999 = vmatprep.subr.bf16.mxu0 %v7531_v30  ;;  %4063 = vmatprep.subr.bf16.mxu1 %v7532_v61  ;;  %v7542_v30 = vld [vmem:[#allocation55_spill] sm:$0xff]  ;;  %v7543_v61 = vld [vmem:[#allocation56_spill] sm:$0xff] }
 0x29f   :  { %4001 = vmatpush1.bf16.msra.mxu0 %v7533_v5  ;;  %4065 = vmatpush1.bf16.msra.mxu1 %v7534_v26  ;;  %v7544_v5 = vld [vmem:[#allocation57_spill] sm:$0xff]  ;;  %v7545_v26 = vld [vmem:[#allocation58_spill] sm:$0xff] }
 0x2a0   :  { %4003 = vmatprep.subr.bf16.mxu0 %v7535_v50  ;;  %4067 = vmatprep.subr.bf16.mxu1 %v7536_v18  ;;  %v7546_v50 = vld [vmem:[#allocation59_spill] sm:$0xff]  ;;  %v7547_v18 = vld [vmem:[#allocation2_spill] sm:$0xff] }
 0x2a3   :  { %4005 = vmatpush1.bf16.msra.mxu0 %v7537_v3  ;;  %4069 = vmatpush1.bf16.msra.mxu1 %v7538_v1  ;;  %v7548_v3 = vld [vmem:[#allocation3_spill] sm:$0xff] }
 0x2a4   :  { %4007 = vmatprep.subr.bf16.mxu0 %v7539_v28  ;;  %4071 = vmatprep.subr.bf16.mxu1 %v7540_v8 }
 0x2a7   :  { %4009 = vmatpush1.bf16.msra.mxu0 %v7541_v41  ;;  %4073 = vmatpush1.bf16.msra.mxu1 %v7542_v30 }
 0x2a8   :  { %4011 = vmatprep.subr.bf16.mxu0 %v7543_v61  ;;  %4075 = vmatprep.subr.bf16.mxu1 %v7544_v5  ;;  %v7550_v5 = vld [vmem:[#allocation67_spill] sm:$0xff] }
 0x2ab   :  { %4013 = vmatpush1.bf16.msra.mxu0 %v7545_v26  ;;  %4077 = vmatpush1.bf16.msra.mxu1 %v7546_v50  ;;  %v7551_v50 = vld [vmem:[#allocation68_spill] sm:$0xff] }
 0x2ac   :  { %4079 = vmatprep.subr.bf16.mxu0 %v7547_v18  ;;  %4111 = vmatprep.subr.bf16.mxu1 %v7548_v3 }
 0x321   :  { %v1037_v1 = vpop.f32.mrb[6].mxu0  ;;  %v1108_v28 = vpop.f32.mrb[14].mxu1 }
 0x322   :  { %v1038_v8 = vadd.f32 %v1037_v1, %v7549_v12  ;;  %v1039_v11 = vpop.f32.mrb[7].mxu0  ;;  %v1110_v41 = vpop.f32.mrb[15].mxu1  ;;  %v1109_v54 = vadd.f32 %v1108_v28, %v7551_v50 }
 0x323   :  { %v1040_v30 = vadd.f32 %v1039_v11, %v6418_v17  ;;  %v1111_v26 = vadd.f32 %v1110_v41, %v7550_v5 }
 0x324   :  { %v3409_v56 = vmul.f32 -1.442695, %v1038_v8 }
 0x325   :  { %v3410_v61 = vmul.f32 -1.442695, %v1040_v30  ;;  %v3411_v0 = vmul.f32 -1.442695, %v1111_v26 }
 0x326   :  { %5121 = vpow2.f32 %v3409_v56 }
 0x327   :  { %5123 = vpow2.f32 %v3410_v61 }
 0x328   :  { %5125 = vpow2.f32 %v3411_v0 }
 0x329   :  { %5127 = vtanh.f32 %v1109_v54 }
 0x330   :  { %v5122_v18 = vpop.eup %5121 }
 0x331   :  { %v5124_v44 = vpop.eup %5123  ;;  %v1116_v3 = vadd.f32 1.0, %v5122_v18 }
 0x332   :  { %v1122_v55 = vadd.f32 1.0, %v5124_v44  ;;  %v5126_v1 = vpop.eup %5125 }
 0x333   :  { %5129 = vrcp.f32 %v1116_v3  ;;  %v5128_v12 = vpop.eup %5127  ;;  %v1129_v56 = vadd.f32 1.0, %v5126_v1 }
 0x334   :  { %5131 = vrcp.f32 %v1122_v55  ;;  %v7552_v55 = vld [vmem:[#allocation64_spill] sm:$0xff] }
 0x335   :  { %5133 = vrcp.f32 %v1129_v56 }
 0x33d   :  { %v5130_v11 = vpop.eup %5129 }
 0x33e   :  { %v5132_v8 = vpop.eup %5131  ;;  %v1133_v30 = vmul.f32 %v5130_v11, %v5128_v12 }
 0x33f   :  { %v1132_v61 = vmul.f32 %v5132_v8, %v6432_v52  ;;  %v5134_v11 = vpop.eup %5133 }
 0x341   :  { %v6549_v41 = vadd.f32 %v1133_v30, %v1132_v61  ;;  %v1203_v26 = vpop.f32.mrb[8].mxu0  ;;  %v1274_v28 = vpop.f32.mrb[16].mxu1 }
 0x342   :  { %v1283_v50 = vrot.slane %v1203_v26, 4  ;;  %v1205_v18 = vpop.f32.mrb[9].mxu0  ;;  %v1276_v0 = vpop.f32.mrb[17].mxu1  ;;  %v1285_v8 = vrot.slane %v1274_v28, 4 }
 0x343   :  { %v1284_v54 = vrot.slane %v1205_v18, 4  ;;  %5135 = vtanh.f32 %v6549_v41  ;;  %v1286_v1 = vrot.slane %v1276_v0, 4 }
 0x344   :  { %v1291_v44 = vadd.f32 %v1283_v50, %v7552_v55  ;;  %v1293_v26 = vadd.f32 %v1285_v8, %v6304_v27 }
 0x345   :  { %v1292_v3 = vadd.f32 %v1284_v54, %v6298_v2  ;;  %v1294_v52 = vadd.f32 %v1286_v1, %v6302_v42 }
 0x346   :  { %v3412_v5 = vmul.f32 -1.442695, %v1291_v44 }
 0x347   :  { %v3413_v12 = vmul.f32 -1.442695, %v1292_v3  ;;  %v3414_v61 = vmul.f32 -1.442695, %v1294_v52 }
 0x348   :  { %5137 = vpow2.f32 %v3412_v5 }
 0x349   :  { %5139 = vpow2.f32 %v3413_v12  ;;  %v1315_v12 = vrot.slane %v6443_v20, 6  ;;  %v7553_v20 = vld [vmem:[#allocation5_spill] sm:$0xff] }
 0x34a   :  { %5141 = vpow2.f32 %v3414_v61 }
 0x34b   :  { %5143 = vtanh.f32 %v1293_v26 }
 0x34d   :  { %v5136_v30 = vpop.eup %5135 }
 0x34e   :  { %v6555_v56 = vmul.f32 %v5136_v30, %v5134_v11 }
 0x350   :  { %v1323_v18 = vrot.slane %v6555_v56, 4 }
 0x352   :  { %v5138_v50 = vpop.eup %5137  ;;  %v1326_v55 = vrot.slane %v1323_v18, 4 }
 0x353   :  { %v5140_v54 = vpop.eup %5139  ;;  %v1298_v44 = vadd.f32 1.0, %v5138_v50  ;;  %v7554_v50 = vld [vmem:[#allocation6_spill] sm:$0xff] }
 0x354   :  { %v1304_v5 = vadd.f32 1.0, %v5140_v54  ;;  %1393 = vmatprep.mubr.f32.mxu0 %v1326_v55  ;;  %1464 = vmatprep.mubr.f32.mxu1 %v1326_v55  ;;  %v5142_v28 = vpop.eup %5141  ;;  %v7555_v54 = vld [vmem:[#allocation7_spill] sm:$0xff] }
 0x355   :  { %5145 = vrcp.f32 %v1298_v44  ;;  %v5144_v0 = vpop.eup %5143  ;;  %v1311_v11 = vadd.f32 1.0, %v5142_v28  ;;  %v7556_v44 = vld [vmem:[#allocation8_spill] sm:$0xff]  ;;  %v7558_v28 = vld [vmem:[#allocation10_spill] sm:$0xff] }
 0x356   :  { %5147 = vrcp.f32 %v1304_v5  ;;  %v7557_v5 = vld [vmem:[#allocation9_spill] sm:$0xff] }
 0x357   :  { %5149 = vrcp.f32 %v1311_v11  ;;  %v7564_v11 = vld [vmem:[#allocation16_spill] sm:$0xff] }
 0x35f   :  { %v5146_v3 = vpop.eup %5145 }
 0x360   :  { %v5148_v1 = vpop.eup %5147  ;;  %v1318_v52 = vmul.f32 %v5146_v3, %v5144_v0  ;;  %v7559_v0 = vld [vmem:[#allocation11_spill] sm:$0xff]  ;;  %v7560_v3 = vld [vmem:[#allocation12_spill] sm:$0xff] }
 0x361   :  { %v1317_v8 = vmul.f32 %v5148_v1, %v1315_v12  ;;  %v5150_v61 = vpop.eup %5149  ;;  %v7561_v12 = vld [vmem:[#allocation13_spill] sm:$0xff]  ;;  %v7562_v1 = vld [vmem:[#allocation14_spill] sm:$0xff] }
 0x363   :  { %v6560_v30 = vadd.f32 %v1318_v52, %v1317_v8  ;;  %v7563_v52 = vld [vmem:[#allocation15_spill] sm:$0xff]  ;;  %v7565_v8 = vld [vmem:[#allocation17_spill] sm:$0xff] }
 0x365   :  { %5151 = vtanh.f32 %v6560_v30 }
 0x36f   :  { %v5152_v26 = vpop.eup %5151 }
 0x370   :  { %v1321_v18 = vmul.f32 %v5152_v26, %v5150_v61  ;;  %v7566_v61 = vld [vmem:[#allocation18_spill] sm:$0xff]  ;;  %v7567_v26 = vld [vmem:[#allocation19_spill] sm:$0xff] }
 0x372   :  { %v1325_v55 = vrot.slane %v1321_v18, 4  ;;  %v7568_v18 = vld [vmem:[#allocation20_spill] sm:$0xff] }
 0x374   :  { %1394 = vmatmul.mubr.f32.vlgmr.msra.gmra.mrb[10].mxu0 %v1325_v55  ;;  %1465 = vmatmul.mubr.f32.vlgmr.msra.gmra.mrb[18].mxu1 %v1325_v55 }
 0x375   :  { %4081 = vmatpush1.bf16.msra.mxu0 %v5397_v9  ;;  %4113 = vmatpush1.bf16.msra.mxu1 %v5476_v34 }
 0x376   :  { %4083 = vmatprep.subr.bf16.mxu0 %v5409_v14  ;;  %4115 = vmatprep.subr.bf16.mxu1 %v5490_v39 }
 0x377   :  { %1559 = vmatprep.mubr.f32.mxu0 %v7427_v36  ;;  %1630 = vmatprep.mubr.f32.mxu1 %v7427_v36 }
 0x379   :  { %4085 = vmatpush1.bf16.msra.mxu0 %v5427_v19  ;;  %4117 = vmatpush1.bf16.msra.mxu1 %v5513_v46 }
 0x37a   :  { %4087 = vmatprep.subr.bf16.mxu0 %v5440_v23  ;;  %4119 = vmatprep.subr.bf16.mxu1 %v5527_v51 }
 0x37d   :  { %4089 = vmatpush1.bf16.msra.mxu0 %v5472_v33  ;;  %4121 = vmatpush1.bf16.msra.mxu1 %v5551_v58 }
 0x37e   :  { %4091 = vmatprep.subr.bf16.mxu0 %v5478_v35  ;;  %4123 = vmatprep.subr.bf16.mxu1 %v5565_v63 }
 0x381   :  { %4093 = vmatpush1.bf16.msra.mxu0 %v5509_v45  ;;  %4125 = vmatpush1.bf16.msra.mxu1 %v5588_v7 }
 0x382   :  { %4095 = vmatprep.subr.bf16.mxu0 %v5515_v47  ;;  %4127 = vmatprep.subr.bf16.mxu1 %v5602_v15 }
 0x385   :  { %4097 = vmatpush1.bf16.msra.mxu0 %v5546_v57  ;;  %4129 = vmatpush1.bf16.msra.mxu1 %v5624_v24 }
 0x386   :  { %4099 = vmatprep.subr.bf16.mxu0 %v5553_v59  ;;  %4131 = vmatprep.subr.bf16.mxu1 %v5635_v29 }
 0x389   :  { %4101 = vmatpush1.bf16.msra.mxu0 %v5584_v6  ;;  %4133 = vmatpush1.bf16.msra.mxu1 %v5654_v38 }
 0x38a   :  { %4103 = vmatprep.subr.bf16.mxu0 %v5590_v10  ;;  %4135 = vmatprep.subr.bf16.mxu1 %v5657_v40 }
 0x38d   :  { %4105 = vmatpush1.bf16.msra.mxu0 %v5620_v22  ;;  %4137 = vmatpush1.bf16.msra.mxu1 %v5673_v48 }
 0x38e   :  { %4107 = vmatprep.subr.bf16.mxu0 %v5626_v25  ;;  %4139 = vmatprep.subr.bf16.mxu1 %v5676_v49 }
 0x391   :  { %4109 = vmatpush1.bf16.msra.mxu0 %v5650_v37  ;;  %4141 = vmatpush1.bf16.msra.mxu1 %v5687_v53 }
 0x392   :  { %4143 = vmatprep.subr.bf16.mxu0 %v5702_v60  ;;  %4207 = vmatprep.subr.bf16.mxu1 %v5707_v62 }
 0x394   :  { %1560 = vmatmul.mubr.f32.vlgmr.msra.gmra.mrb[12].mxu0 %v1325_v55  ;;  %1631 = vmatmul.mubr.f32.vlgmr.msra.gmra.mrb[20].mxu1 %v1325_v55  ;;  %v7569_v55 = vld [vmem:[#allocation21_spill] sm:$0xff] }
 0x395   :  { %4145 = vmatpush1.bf16.msra.mxu0 %v5719_v4  ;;  %4209 = vmatpush1.bf16.msra.mxu1 %v5731_v13 }
 0x396   :  { %4147 = vmatprep.subr.bf16.mxu0 %v5733_v16  ;;  %4211 = vmatprep.subr.bf16.mxu1 %v5745_v21 }
 0x399   :  { %4149 = vmatpush1.bf16.msra.mxu0 %v5758_v31  ;;  %4213 = vmatpush1.bf16.msra.mxu1 %v5760_v32 }
 0x39a   :  { %4151 = vmatprep.subr.bf16.mxu0 %v5772_v43  ;;  %4215 = vmatprep.subr.bf16.mxu1 %v7553_v20 }
 0x39d   :  { %4153 = vmatpush1.bf16.msra.mxu0 %v7554_v50  ;;  %4217 = vmatpush1.bf16.msra.mxu1 %v7555_v54 }
 0x39e   :  { %4155 = vmatprep.subr.bf16.mxu0 %v7556_v44  ;;  %4219 = vmatprep.subr.bf16.mxu1 %v7557_v5 }
 0x3a1   :  { %4157 = vmatpush1.bf16.msra.mxu0 %v7558_v28  ;;  %4221 = vmatpush1.bf16.msra.mxu1 %v7559_v0  ;;  %v7570_v0 = vld [vmem:[#allocation22_spill] sm:$0xff]  ;;  %v7610_v28 = vld [vmem:[#allocation65_spill] sm:$0xff] }
 0x3a2   :  { %4159 = vmatprep.subr.bf16.mxu0 %v7560_v3  ;;  %4223 = vmatprep.subr.bf16.mxu1 %v7561_v12  ;;  %v7571_v3 = vld [vmem:[#allocation23_spill] sm:$0xff]  ;;  %v7572_v12 = vld [vmem:[#allocation24_spill] sm:$0xff] }
 0x3a5   :  { %4161 = vmatpush1.bf16.msra.mxu0 %v7562_v1  ;;  %4225 = vmatpush1.bf16.msra.mxu1 %v7563_v52  ;;  %v7573_v1 = vld [vmem:[#allocation25_spill] sm:$0xff]  ;;  %v7574_v52 = vld [vmem:[#allocation26_spill] sm:$0xff] }
 0x3a6   :  { %4163 = vmatprep.subr.bf16.mxu0 %v7564_v11  ;;  %4227 = vmatprep.subr.bf16.mxu1 %v7565_v8  ;;  %v7575_v11 = vld [vmem:[#allocation27_spill] sm:$0xff]  ;;  %v7576_v8 = vld [vmem:[#allocation28_spill] sm:$0xff] }
 0x3a9   :  { %4165 = vmatpush1.bf16.msra.mxu0 %v7566_v61  ;;  %4229 = vmatpush1.bf16.msra.mxu1 %v7567_v26  ;;  %v7577_v61 = vld [vmem:[#allocation29_spill] sm:$0xff]  ;;  %v7578_v26 = vld [vmem:[#allocation30_spill] sm:$0xff] }
 0x3aa   :  { %4167 = vmatprep.subr.bf16.mxu0 %v7568_v18  ;;  %4231 = vmatprep.subr.bf16.mxu1 %v7569_v55  ;;  %v7579_v18 = vld [vmem:[#allocation31_spill] sm:$0xff]  ;;  %v7580_v55 = vld [vmem:[#allocation32_spill] sm:$0xff] }
 0x3ad   :  { %4169 = vmatpush1.bf16.msra.mxu0 %v7570_v0  ;;  %4233 = vmatpush1.bf16.msra.mxu1 %v7571_v3  ;;  %v7581_v0 = vld [vmem:[#allocation33_spill] sm:$0xff]  ;;  %v7582_v3 = vld [vmem:[#allocation34_spill] sm:$0xff] }
 0x3ae   :  { %4171 = vmatprep.subr.bf16.mxu0 %v7572_v12  ;;  %4235 = vmatprep.subr.bf16.mxu1 %v7573_v1  ;;  %v7583_v12 = vld [vmem:[#allocation35_spill] sm:$0xff]  ;;  %v7584_v1 = vld [vmem:[#allocation36_spill] sm:$0xff] }
 0x3b1   :  { %4173 = vmatpush1.bf16.msra.mxu0 %v7574_v52  ;;  %4237 = vmatpush1.bf16.msra.mxu1 %v7575_v11  ;;  %v7585_v52 = vld [vmem:[#allocation37_spill] sm:$0xff]  ;;  %v7586_v11 = vld [vmem:[#allocation38_spill] sm:$0xff] }
 0x3b2   :  { %4175 = vmatprep.subr.bf16.mxu0 %v7576_v8  ;;  %4239 = vmatprep.subr.bf16.mxu1 %v7577_v61  ;;  %v7587_v8 = vld [vmem:[#allocation39_spill] sm:$0xff]  ;;  %v7588_v61 = vld [vmem:[#allocation40_spill] sm:$0xff] }
 0x3b5   :  { %4177 = vmatpush1.bf16.msra.mxu0 %v7578_v26  ;;  %4241 = vmatpush1.bf16.msra.mxu1 %v7579_v18  ;;  %v7589_v26 = vld [vmem:[#allocation41_spill] sm:$0xff]  ;;  %v7590_v18 = vld [vmem:[#allocation42_spill] sm:$0xff] }
 0x3b6   :  { %4179 = vmatprep.subr.bf16.mxu0 %v7580_v55  ;;  %4243 = vmatprep.subr.bf16.mxu1 %v7581_v0  ;;  %v7591_v55 = vld [vmem:[#allocation43_spill] sm:$0xff]  ;;  %v7592_v0 = vld [vmem:[#allocation44_spill] sm:$0xff] }
 0x3b9   :  { %4181 = vmatpush1.bf16.msra.mxu0 %v7582_v3  ;;  %4245 = vmatpush1.bf16.msra.mxu1 %v7583_v12  ;;  %v7593_v3 = vld [vmem:[#allocation45_spill] sm:$0xff]  ;;  %v7594_v12 = vld [vmem:[#allocation46_spill] sm:$0xff] }
 0x3ba   :  { %4183 = vmatprep.subr.bf16.mxu0 %v7584_v1  ;;  %4247 = vmatprep.subr.bf16.mxu1 %v7585_v52  ;;  %v7595_v1 = vld [vmem:[#allocation47_spill] sm:$0xff]  ;;  %v7596_v52 = vld [vmem:[#allocation48_spill] sm:$0xff] }
 0x3bd   :  { %4185 = vmatpush1.bf16.msra.mxu0 %v7586_v11  ;;  %4249 = vmatpush1.bf16.msra.mxu1 %v7587_v8  ;;  %v7597_v11 = vld [vmem:[#allocation49_spill] sm:$0xff]  ;;  %v7598_v8 = vld [vmem:[#allocation50_spill] sm:$0xff] }
 0x3be   :  { %4187 = vmatprep.subr.bf16.mxu0 %v7588_v61  ;;  %4251 = vmatprep.subr.bf16.mxu1 %v7589_v26  ;;  %v7599_v61 = vld [vmem:[#allocation51_spill] sm:$0xff]  ;;  %v7600_v26 = vld [vmem:[#allocation52_spill] sm:$0xff] }
 0x3c1   :  { %4189 = vmatpush1.bf16.msra.mxu0 %v7590_v18  ;;  %4253 = vmatpush1.bf16.msra.mxu1 %v7591_v55  ;;  %v7601_v18 = vld [vmem:[#allocation53_spill] sm:$0xff]  ;;  %v7602_v55 = vld [vmem:[#allocation54_spill] sm:$0xff] }
 0x3c2   :  { %4191 = vmatprep.subr.bf16.mxu0 %v7592_v0  ;;  %4255 = vmatprep.subr.bf16.mxu1 %v7593_v3  ;;  %v7603_v0 = vld [vmem:[#allocation55_spill] sm:$0xff]  ;;  %v7604_v3 = vld [vmem:[#allocation56_spill] sm:$0xff] }
 0x3c5   :  { %4193 = vmatpush1.bf16.msra.mxu0 %v7594_v12  ;;  %4257 = vmatpush1.bf16.msra.mxu1 %v7595_v1  ;;  %v7605_v12 = vld [vmem:[#allocation57_spill] sm:$0xff]  ;;  %v7606_v1 = vld [vmem:[#allocation58_spill] sm:$0xff] }
 0x3c6   :  { %4195 = vmatprep.subr.bf16.mxu0 %v7596_v52  ;;  %4259 = vmatprep.subr.bf16.mxu1 %v7597_v11  ;;  %v7607_v52 = vld [vmem:[#allocation59_spill] sm:$0xff]  ;;  %v7608_v11 = vld [vmem:[#allocation2_spill] sm:$0xff] }
 0x3c9   :  { %4197 = vmatpush1.bf16.msra.mxu0 %v7598_v8  ;;  %4261 = vmatpush1.bf16.msra.mxu1 %v7599_v61  ;;  %v7609_v8 = vld [vmem:[#allocation3_spill] sm:$0xff] }
 0x3ca   :  { %4199 = vmatprep.subr.bf16.mxu0 %v7600_v26  ;;  %4263 = vmatprep.subr.bf16.mxu1 %v7601_v18 }
 0x3cd   :  { %4201 = vmatpush1.bf16.msra.mxu0 %v7602_v55  ;;  %4265 = vmatpush1.bf16.msra.mxu1 %v7603_v0 }
 0x3ce   :  { %4203 = vmatprep.subr.bf16.mxu0 %v7604_v3  ;;  %4267 = vmatprep.subr.bf16.mxu1 %v7605_v12  ;;  %v7611_v12 = vld [vmem:[#allocation67_spill] sm:$0xff] }
 0x3d1   :  { %4205 = vmatpush1.bf16.msra.mxu0 %v7606_v1  ;;  %4269 = vmatpush1.bf16.msra.mxu1 %v7607_v52  ;;  %v7612_v52 = vld [vmem:[#allocation68_spill] sm:$0xff] }
 0x3d2   :  { %4271 = vmatprep.subr.bf16.mxu0 %v7608_v11  ;;  %4303 = vmatprep.subr.bf16.mxu1 %v7609_v8 }
 0x447   :  { %v1395_v61 = vpop.f32.mrb[10].mxu0  ;;  %v1466_v26 = vpop.f32.mrb[18].mxu1 }
 0x448   :  { %v1396_v18 = vadd.f32 %v1395_v61, %v7610_v28  ;;  %v1397_v5 = vpop.f32.mrb[11].mxu0  ;;  %v1468_v55 = vpop.f32.mrb[19].mxu1  ;;  %v1467_v50 = vadd.f32 %v1466_v26, %v7612_v52 }
 0x449   :  { %v1398_v0 = vadd.f32 %v1397_v5, %v6418_v17  ;;  %v1469_v1 = vadd.f32 %v1468_v55, %v7611_v12 }
 0x44a   :  { %v3415_v44 = vmul.f32 -1.442695, %v1396_v18 }
 0x44b   :  { %v3416_v3 = vmul.f32 -1.442695, %v1398_v0  ;;  %v3417_v54 = vmul.f32 -1.442695, %v1469_v1 }
 0x44c   :  { %5153 = vpow2.f32 %v3415_v44 }
 0x44d   :  { %5155 = vpow2.f32 %v3416_v3 }
 0x44e   :  { %5157 = vpow2.f32 %v3417_v54 }
 0x44f   :  { %5159 = vtanh.f32 %v1467_v50 }
 0x456   :  { %v5154_v11 = vpop.eup %5153 }
 0x457   :  { %v5156_v20 = vpop.eup %5155  ;;  %v1474_v8 = vadd.f32 1.0, %v5154_v11 }
 0x458   :  { %v1480_v43 = vadd.f32 1.0, %v5156_v20  ;;  %v5158_v61 = vpop.eup %5157 }
 0x459   :  { %5161 = vrcp.f32 %v1474_v8  ;;  %v5160_v28 = vpop.eup %5159  ;;  %v1487_v44 = vadd.f32 1.0, %v5158_v61 }
 0x45a   :  { %5163 = vrcp.f32 %v1480_v43  ;;  %v7613_v43 = vld [vmem:[#allocation64_spill] sm:$0xff] }
 0x45b   :  { %5165 = vrcp.f32 %v1487_v44  ;;  %v3266_v44 = vrot.slane %v6555_v56, 6 }
 0x463   :  { %v5162_v5 = vpop.eup %5161 }
 0x464   :  { %v5164_v18 = vpop.eup %5163  ;;  %v1491_v0 = vmul.f32 %v5162_v5, %v5160_v28 }
 0x465   :  { %v1490_v3 = vmul.f32 %v5164_v18, %v6549_v41  ;;  %v5166_v5 = vpop.eup %5165 }
 0x467   :  { %v6666_v55 = vadd.f32 %v1491_v0, %v1490_v3  ;;  %v1561_v1 = vpop.f32.mrb[12].mxu0  ;;  %v1632_v26 = vpop.f32.mrb[20].mxu1 }
 0x468   :  { %v1641_v52 = vrot.slane %v1561_v1, 2  ;;  %v1563_v11 = vpop.f32.mrb[13].mxu0  ;;  %v1634_v54 = vpop.f32.mrb[21].mxu1  ;;  %v1643_v18 = vrot.slane %v1632_v26, 2 }
 0x469   :  { %v1642_v50 = vrot.slane %v1563_v11, 2  ;;  %5167 = vtanh.f32 %v6666_v55  ;;  %v1644_v61 = vrot.slane %v1634_v54, 2 }
 0x46a   :  { %v1649_v20 = vadd.f32 %v1641_v52, %v7613_v43  ;;  %v1651_v11 = vadd.f32 %v1643_v18, %v6304_v27 }
 0x46b   :  { %v1650_v8 = vadd.f32 %v1642_v50, %v6298_v2  ;;  %v1652_v41 = vadd.f32 %v1644_v61, %v6302_v42  ;;  %v7614_v2 = vld [vmem:[#allocation69_spill] sm:$0xff]  ;;  %v1673_v61 = vrot.slane %v6560_v30, 6  ;;  %v7615_v30 = vld [vmem:[#allocation4_spill] sm:$0xff] }
 0x46c   :  { %v3418_v12 = vmul.f32 -1.442695, %v1649_v20  ;;  %v3281_v50 = vsel %vm3280_vm2, %v7614_v2, %v3266_v44  ;;  %v7617_v2 = vld [vmem:[#allocation6_spill] sm:$0xff] }
 0x46d   :  { %v3419_v28 = vmul.f32 -1.442695, %v1650_v8  ;;  %v3420_v1 = vmul.f32 -1.442695, %v1652_v41 }
 0x46e   :  { %5169 = vpow2.f32 %v3418_v12 }
 0x46f   :  { %5171 = vpow2.f32 %v3419_v28 }
 0x470   :  { %5173 = vpow2.f32 %v3420_v1 }
 0x471   :  { %5175 = vtanh.f32 %v1651_v11 }
 0x473   :  { %v5168_v0 = vpop.eup %5167 }
 0x474   :  { %v1494_v3 = vmul.f32 %v5168_v0, %v5166_v5 }
 0x476   :  { %v1681_v52 = vrot.slane %v1494_v3, 2  ;;  %v3268_v43 = vrot.slane %v1494_v3, 4 }
 0x478   :  { %v5170_v54 = vpop.eup %5169  ;;  %v1684_v12 = vrot.slane %v1681_v52, 6  ;;  %v6677_v20 = vsel %vm259_vm0, %v3281_v50, %v3268_v43  ;;  %v7616_v43 = vld [vmem:[#allocation5_spill] sm:$0xff]  ;;  %v7618_v50 = vld [vmem:[#allocation7_spill] sm:$0xff] }
 0x479   :  { %v5172_v42 = vpop.eup %5171  ;;  %v1656_v26 = vadd.f32 1.0, %v5170_v54  ;;  %v7619_v54 = vld [vmem:[#allocation8_spill] sm:$0xff] }
 0x47a   :  { %v1662_v56 = vadd.f32 1.0, %v5172_v42  ;;  %1751 = vmatprep.mubr.f32.mxu0 %v1684_v12  ;;  %1822 = vmatprep.mubr.f32.mxu1 %v1684_v12  ;;  %v5174_v27 = vpop.eup %5173  ;;  %v7620_v12 = vld [vmem:[#allocation9_spill] sm:$0xff]  ;;  %v7621_v42 = vld [vmem:[#allocation10_spill] sm:$0xff] }
 0x47b   :  { %5177 = vrcp.f32 %v1656_v26  ;;  %v5176_v8 = vpop.eup %5175  ;;  %v1669_v18 = vadd.f32 1.0, %v5174_v27  ;;  %v7622_v26 = vld [vmem:[#allocation11_spill] sm:$0xff]  ;;  %v7624_v27 = vld [vmem:[#allocation13_spill] sm:$0xff] }
 0x47c   :  { %5179 = vrcp.f32 %v1662_v56  ;;  %v7623_v56 = vld [vmem:[#allocation12_spill] sm:$0xff] }
 0x47d   :  { %5181 = vrcp.f32 %v1669_v18  ;;  %v7630_v18 = vld [vmem:[#allocation19_spill] sm:$0xff] }
 0x485   :  { %v5178_v28 = vpop.eup %5177 }
 0x486   :  { %v5180_v41 = vpop.eup %5179  ;;  %v1676_v5 = vmul.f32 %v5178_v28, %v5176_v8  ;;  %v7625_v8 = vld [vmem:[#allocation14_spill] sm:$0xff]  ;;  %v7626_v28 = vld [vmem:[#allocation15_spill] sm:$0xff] }
 0x487   :  { %v1675_v0 = vmul.f32 %v5180_v41, %v1673_v61  ;;  %v5182_v3 = vpop.eup %5181  ;;  %v7627_v61 = vld [vmem:[#allocation16_spill] sm:$0xff]  ;;  %v7628_v41 = vld [vmem:[#allocation17_spill] sm:$0xff] }
 0x489   :  { %v6680_v44 = vadd.f32 %v1676_v5, %v1675_v0  ;;  %v7629_v5 = vld [vmem:[#allocation18_spill] sm:$0xff]  ;;  %v7631_v0 = vld [vmem:[#allocation20_spill] sm:$0xff] }
 0x48b   :  { %5183 = vtanh.f32 %v6680_v44 }
 0x495   :  { %v5184_v1 = vpop.eup %5183 }
 0x496   :  { %v1679_v11 = vmul.f32 %v5184_v1, %v5182_v3  ;;  %v7632_v3 = vld [vmem:[#allocation21_spill] sm:$0xff]  ;;  %v7633_v1 = vld [vmem:[#allocation22_spill] sm:$0xff] }
 0x498   :  { %v1683_v52 = vrot.slane %v1679_v11, 6  ;;  %v7634_v11 = vld [vmem:[#allocation23_spill] sm:$0xff] }
 0x49a   :  { %1752 = vmatmul.mubr.f32.vlgmr.msra.gmra.mrb[14].mxu0 %v1683_v52  ;;  %1823 = vmatmul.mubr.f32.vlgmr.msra.gmra.mrb[22].mxu1 %v1683_v52 }
 0x49b   :  { %4273 = vmatpush1.bf16.msra.mxu0 %v5397_v9  ;;  %4305 = vmatpush1.bf16.msra.mxu1 %v5476_v34 }
 0x49c   :  { %4275 = vmatprep.subr.bf16.mxu0 %v5409_v14  ;;  %4307 = vmatprep.subr.bf16.mxu1 %v5490_v39 }
 0x49d   :  { %1917 = vmatprep.mubr.f32.mxu0 %v7427_v36  ;;  %1988 = vmatprep.mubr.f32.mxu1 %v7427_v36 }
 0x49f   :  { %4277 = vmatpush1.bf16.msra.mxu0 %v5427_v19  ;;  %4309 = vmatpush1.bf16.msra.mxu1 %v5513_v46 }
 0x4a0   :  { %4279 = vmatprep.subr.bf16.mxu0 %v5440_v23  ;;  %4311 = vmatprep.subr.bf16.mxu1 %v5527_v51 }
 0x4a3   :  { %4281 = vmatpush1.bf16.msra.mxu0 %v5472_v33  ;;  %4313 = vmatpush1.bf16.msra.mxu1 %v5551_v58 }
 0x4a4   :  { %4283 = vmatprep.subr.bf16.mxu0 %v5478_v35  ;;  %4315 = vmatprep.subr.bf16.mxu1 %v5565_v63 }
 0x4a7   :  { %4285 = vmatpush1.bf16.msra.mxu0 %v5509_v45  ;;  %4317 = vmatpush1.bf16.msra.mxu1 %v5588_v7 }
 0x4a8   :  { %4287 = vmatprep.subr.bf16.mxu0 %v5515_v47  ;;  %4319 = vmatprep.subr.bf16.mxu1 %v5602_v15 }
 0x4ab   :  { %4289 = vmatpush1.bf16.msra.mxu0 %v5546_v57  ;;  %4321 = vmatpush1.bf16.msra.mxu1 %v5624_v24 }
 0x4ac   :  { %4291 = vmatprep.subr.bf16.mxu0 %v5553_v59  ;;  %4323 = vmatprep.subr.bf16.mxu1 %v5635_v29 }
 0x4af   :  { %4293 = vmatpush1.bf16.msra.mxu0 %v5584_v6  ;;  %4325 = vmatpush1.bf16.msra.mxu1 %v5654_v38 }
 0x4b0   :  { %4295 = vmatprep.subr.bf16.mxu0 %v5590_v10  ;;  %4327 = vmatprep.subr.bf16.mxu1 %v5657_v40 }
 0x4b3   :  { %4297 = vmatpush1.bf16.msra.mxu0 %v5620_v22  ;;  %4329 = vmatpush1.bf16.msra.mxu1 %v5673_v48 }
 0x4b4   :  { %4299 = vmatprep.subr.bf16.mxu0 %v5626_v25  ;;  %4331 = vmatprep.subr.bf16.mxu1 %v5676_v49 }
 0x4b7   :  { %4301 = vmatpush1.bf16.msra.mxu0 %v5650_v37  ;;  %4333 = vmatpush1.bf16.msra.mxu1 %v5687_v53 }
 0x4b8   :  { %4335 = vmatprep.subr.bf16.mxu0 %v5702_v60  ;;  %4399 = vmatprep.subr.bf16.mxu1 %v5707_v62 }
 0x4ba   :  { %1918 = vmatmul.mubr.f32.vlgmr.msra.gmra.mrb[16].mxu0 %v1683_v52  ;;  %1989 = vmatmul.mubr.f32.vlgmr.msra.gmra.mrb[24].mxu1 %v1683_v52  ;;  %v7635_v52 = vld [vmem:[#allocation24_spill] sm:$0xff] }
 0x4bb   :  { %4337 = vmatpush1.bf16.msra.mxu0 %v5719_v4  ;;  %4401 = vmatpush1.bf16.msra.mxu1 %v5731_v13 }
 0x4bc   :  { %4339 = vmatprep.subr.bf16.mxu0 %v5733_v16  ;;  %4403 = vmatprep.subr.bf16.mxu1 %v5745_v21 }
 0x4bf   :  { %4341 = vmatpush1.bf16.msra.mxu0 %v5758_v31  ;;  %4405 = vmatpush1.bf16.msra.mxu1 %v5760_v32 }
 0x4c0   :  { %4343 = vmatprep.subr.bf16.mxu0 %v7615_v30  ;;  %4407 = vmatprep.subr.bf16.mxu1 %v7616_v43 }
 0x4c3   :  { %4345 = vmatpush1.bf16.msra.mxu0 %v7617_v2  ;;  %4409 = vmatpush1.bf16.msra.mxu1 %v7618_v50 }
 0x4c4   :  { %4347 = vmatprep.subr.bf16.mxu0 %v7619_v54  ;;  %4411 = vmatprep.subr.bf16.mxu1 %v7620_v12 }
 0x4c7   :  { %4349 = vmatpush1.bf16.msra.mxu0 %v7621_v42  ;;  %4413 = vmatpush1.bf16.msra.mxu1 %v7622_v26 }
 0x4c8   :  { %4351 = vmatprep.subr.bf16.mxu0 %v7623_v56  ;;  %4415 = vmatprep.subr.bf16.mxu1 %v7624_v27  ;;  %v7673_v27 = vld [vmem:[#allocation65_spill] sm:$0xff] }
 0x4cb   :  { %4353 = vmatpush1.bf16.msra.mxu0 %v7625_v8  ;;  %4417 = vmatpush1.bf16.msra.mxu1 %v7626_v28  ;;  %v7636_v8 = vld [vmem:[#allocation25_spill] sm:$0xff]  ;;  %v7637_v28 = vld [vmem:[#allocation26_spill] sm:$0xff] }
 0x4cc   :  { %4355 = vmatprep.subr.bf16.mxu0 %v7627_v61  ;;  %4419 = vmatprep.subr.bf16.mxu1 %v7628_v41  ;;  %v7638_v61 = vld [vmem:[#allocation27_spill] sm:$0xff]  ;;  %v7639_v41 = vld [vmem:[#allocation28_spill] sm:$0xff] }
 0x4cf   :  { %4357 = vmatpush1.bf16.msra.mxu0 %v7629_v5  ;;  %4421 = vmatpush1.bf16.msra.mxu1 %v7630_v18  ;;  %v7640_v5 = vld [vmem:[#allocation29_spill] sm:$0xff]  ;;  %v7641_v18 = vld [vmem:[#allocation30_spill] sm:$0xff] }
 0x4d0   :  { %4359 = vmatprep.subr.bf16.mxu0 %v7631_v0  ;;  %4423 = vmatprep.subr.bf16.mxu1 %v7632_v3  ;;  %v7642_v0 = vld [vmem:[#allocation31_spill] sm:$0xff]  ;;  %v7643_v3 = vld [vmem:[#allocation32_spill] sm:$0xff] }
 0x4d3   :  { %4361 = vmatpush1.bf16.msra.mxu0 %v7633_v1  ;;  %4425 = vmatpush1.bf16.msra.mxu1 %v7634_v11  ;;  %v7644_v1 = vld [vmem:[#allocation33_spill] sm:$0xff]  ;;  %v7645_v11 = vld [vmem:[#allocation34_spill] sm:$0xff] }
 0x4d4   :  { %4363 = vmatprep.subr.bf16.mxu0 %v7635_v52  ;;  %4427 = vmatprep.subr.bf16.mxu1 %v7636_v8  ;;  %v7646_v52 = vld [vmem:[#allocation35_spill] sm:$0xff]  ;;  %v7647_v8 = vld [vmem:[#allocation36_spill] sm:$0xff] }
 0x4d7   :  { %4365 = vmatpush1.bf16.msra.mxu0 %v7637_v28  ;;  %4429 = vmatpush1.bf16.msra.mxu1 %v7638_v61  ;;  %v7648_v28 = vld [vmem:[#allocation37_spill] sm:$0xff]  ;;  %v7649_v61 = vld [vmem:[#allocation38_spill] sm:$0xff] }
 0x4d8   :  { %4367 = vmatprep.subr.bf16.mxu0 %v7639_v41  ;;  %4431 = vmatprep.subr.bf16.mxu1 %v7640_v5  ;;  %v7650_v41 = vld [vmem:[#allocation39_spill] sm:$0xff]  ;;  %v7651_v5 = vld [vmem:[#allocation40_spill] sm:$0xff] }
 0x4db   :  { %4369 = vmatpush1.bf16.msra.mxu0 %v7641_v18  ;;  %4433 = vmatpush1.bf16.msra.mxu1 %v7642_v0  ;;  %v7652_v18 = vld [vmem:[#allocation41_spill] sm:$0xff]  ;;  %v7653_v0 = vld [vmem:[#allocation42_spill] sm:$0xff] }
 0x4dc   :  { %4371 = vmatprep.subr.bf16.mxu0 %v7643_v3  ;;  %4435 = vmatprep.subr.bf16.mxu1 %v7644_v1  ;;  %v7654_v3 = vld [vmem:[#allocation43_spill] sm:$0xff]  ;;  %v7655_v1 = vld [vmem:[#allocation44_spill] sm:$0xff] }
 0x4df   :  { %4373 = vmatpush1.bf16.msra.mxu0 %v7645_v11  ;;  %4437 = vmatpush1.bf16.msra.mxu1 %v7646_v52  ;;  %v7656_v11 = vld [vmem:[#allocation45_spill] sm:$0xff]  ;;  %v7657_v52 = vld [vmem:[#allocation46_spill] sm:$0xff] }
 0x4e0   :  { %4375 = vmatprep.subr.bf16.mxu0 %v7647_v8  ;;  %4439 = vmatprep.subr.bf16.mxu1 %v7648_v28  ;;  %v7658_v8 = vld [vmem:[#allocation47_spill] sm:$0xff]  ;;  %v7659_v28 = vld [vmem:[#allocation48_spill] sm:$0xff] }
 0x4e3   :  { %4377 = vmatpush1.bf16.msra.mxu0 %v7649_v61  ;;  %4441 = vmatpush1.bf16.msra.mxu1 %v7650_v41  ;;  %v7660_v61 = vld [vmem:[#allocation49_spill] sm:$0xff]  ;;  %v7661_v41 = vld [vmem:[#allocation50_spill] sm:$0xff] }
 0x4e4   :  { %4379 = vmatprep.subr.bf16.mxu0 %v7651_v5  ;;  %4443 = vmatprep.subr.bf16.mxu1 %v7652_v18  ;;  %v7662_v5 = vld [vmem:[#allocation51_spill] sm:$0xff]  ;;  %v7663_v18 = vld [vmem:[#allocation52_spill] sm:$0xff] }
 0x4e7   :  { %4381 = vmatpush1.bf16.msra.mxu0 %v7653_v0  ;;  %4445 = vmatpush1.bf16.msra.mxu1 %v7654_v3  ;;  %v7664_v0 = vld [vmem:[#allocation53_spill] sm:$0xff]  ;;  %v7665_v3 = vld [vmem:[#allocation54_spill] sm:$0xff] }
 0x4e8   :  { %4383 = vmatprep.subr.bf16.mxu0 %v7655_v1  ;;  %4447 = vmatprep.subr.bf16.mxu1 %v7656_v11  ;;  %v7666_v1 = vld [vmem:[#allocation55_spill] sm:$0xff]  ;;  %v7667_v11 = vld [vmem:[#allocation56_spill] sm:$0xff] }
 0x4eb   :  { %4385 = vmatpush1.bf16.msra.mxu0 %v7657_v52  ;;  %4449 = vmatpush1.bf16.msra.mxu1 %v7658_v8  ;;  %v7668_v52 = vld [vmem:[#allocation57_spill] sm:$0xff]  ;;  %v7669_v8 = vld [vmem:[#allocation58_spill] sm:$0xff] }
 0x4ec   :  { %4387 = vmatprep.subr.bf16.mxu0 %v7659_v28  ;;  %4451 = vmatprep.subr.bf16.mxu1 %v7660_v61  ;;  %v7670_v28 = vld [vmem:[#allocation59_spill] sm:$0xff]  ;;  %v7671_v61 = vld [vmem:[#allocation2_spill] sm:$0xff] }
 0x4ef   :  { %4389 = vmatpush1.bf16.msra.mxu0 %v7661_v41  ;;  %4453 = vmatpush1.bf16.msra.mxu1 %v7662_v5  ;;  %v7672_v41 = vld [vmem:[#allocation3_spill] sm:$0xff] }
 0x4f0   :  { %4391 = vmatprep.subr.bf16.mxu0 %v7663_v18  ;;  %4455 = vmatprep.subr.bf16.mxu1 %v7664_v0 }
 0x4f3   :  { %4393 = vmatpush1.bf16.msra.mxu0 %v7665_v3  ;;  %4457 = vmatpush1.bf16.msra.mxu1 %v7666_v1 }
 0x4f4   :  { %4395 = vmatprep.subr.bf16.mxu0 %v7667_v11  ;;  %4459 = vmatprep.subr.bf16.mxu1 %v7668_v52  ;;  %v7674_v52 = vld [vmem:[#allocation67_spill] sm:$0xff] }
 0x4f7   :  { %4397 = vmatpush1.bf16.msra.mxu0 %v7669_v8  ;;  %4461 = vmatpush1.bf16.msra.mxu1 %v7670_v28  ;;  %v7675_v28 = vld [vmem:[#allocation68_spill] sm:$0xff] }
 0x4f8   :  { %4463 = vmatprep.subr.bf16.mxu0 %v7671_v61  ;;  %4495 = vmatprep.subr.bf16.mxu1 %v7672_v41 }
 0x56d   :  { %v1753_v5 = vpop.f32.mrb[14].mxu0  ;;  %v1824_v18 = vpop.f32.mrb[22].mxu1 }
 0x56e   :  { %v1754_v0 = vadd.f32 %v1753_v5, %v7673_v27  ;;  %v1755_v56 = vpop.f32.mrb[15].mxu0  ;;  %v1826_v3 = vpop.f32.mrb[23].mxu1  ;;  %v1825_v12 = vadd.f32 %v1824_v18, %v7675_v28  ;;  %v7676_v18 = vld [vmem:[#allocation60_spill] sm:$0xff] }
 0x56f   :  { %v1756_v1 = vadd.f32 %v1755_v56, %v6418_v17  ;;  %v1827_v8 = vadd.f32 %v1826_v3, %v7674_v52 }
 0x570   :  { %v3421_v26 = vmul.f32 -1.442695, %v1754_v0 }
 0x571   :  { %v3422_v11 = vmul.f32 -1.442695, %v1756_v1  ;;  %v3423_v42 = vmul.f32 -1.442695, %v1827_v8 }
 0x572   :  { %5185 = vpow2.f32 %v3421_v26 }
 0x573   :  { %5187 = vpow2.f32 %v3422_v11 }
 0x574   :  { %5189 = vpow2.f32 %v3423_v42 }
 0x575   :  { %5191 = vtanh.f32 %v1825_v12 }
 0x57c   :  { %v5186_v61 = vpop.eup %5185 }
 0x57d   :  { %v5188_v54 = vpop.eup %5187  ;;  %v1832_v41 = vadd.f32 1.0, %v5186_v61 }
 0x57e   :  { %v1838_v50 = vadd.f32 1.0, %v5188_v54  ;;  %v5190_v5 = vpop.eup %5189  ;;  %v7677_v54 = vld [vmem:[#allocation61_spill] sm:$0xff] }
 0x57f   :  { %5193 = vrcp.f32 %v1832_v41  ;;  %v5192_v27 = vpop.eup %5191  ;;  %v1845_v26 = vadd.f32 1.0, %v5190_v5 }
 0x580   :  { %5195 = vrcp.f32 %v1838_v50 }
 0x581   :  { %5197 = vrcp.f32 %v1845_v26 }
 0x589   :  { %v5194_v56 = vpop.eup %5193 }
 0x58a   :  { %v5196_v0 = vpop.eup %5195  ;;  %v1849_v1 = vmul.f32 %v5194_v56, %v5192_v27  ;;  %v7678_v27 = vld [vmem:[#allocation63_spill] sm:$0xff] }
 0x58b   :  { %v1848_v11 = vmul.f32 %v5196_v0, %v6666_v55  ;;  %v5198_v55 = vpop.eup %5197 }
 0x58d   :  { %v1919_v3 = vpop.f32.mrb[16].mxu0  ;;  %v1990_v8 = vpop.f32.mrb[24].mxu1  ;;  %v6786_v52 = vadd.f32 %v1849_v1, %v1848_v11  ;;  %v7679_v1 = vld [vmem:[#allocation62_spill] sm:$0xff] }
 0x58e   :  { %v1995_v61 = vadd.f32 %v1919_v3, %v7676_v18  ;;  %v1921_v42 = vpop.f32.mrb[17].mxu0  ;;  %v1992_v12 = vpop.f32.mrb[25].mxu1  ;;  %v1997_v11 = vadd.f32 %v1990_v8, %v7679_v1 }
 0x58f   :  { %v1996_v41 = vadd.f32 %v1921_v42, %v7677_v54  ;;  %5199 = vtanh.f32 %v6786_v52  ;;  %v1998_v5 = vadd.f32 %v1992_v12, %v7678_v27 }
 0x590   :  { %v3424_v50 = vmul.f32 -1.442695, %v1995_v61 }
 0x591   :  { %v3425_v28 = vmul.f32 -1.442695, %v1996_v41  ;;  %v3426_v0 = vmul.f32 -1.442695, %v1998_v5 }
 0x592   :  { %5201 = vpow2.f32 %v3424_v50  ;;  %v2019_v50 = vrot.slane %v6680_v44, 6  ;;  %v7681_v44 = vld [vmem:[#allocation7_spill] sm:$0xff] }
 0x593   :  { %5203 = vpow2.f32 %v3425_v28 }
 0x594   :  { %5205 = vpow2.f32 %v3426_v0 }
 0x595   :  { %5207 = vtanh.f32 %v1997_v11 }
 0x599   :  { %v5200_v56 = vpop.eup %5199 }
 0x59a   :  { %v1852_v26 = vmul.f32 %v5200_v56, %v5198_v55 }
 0x59c   :  { %v5202_v3 = vpop.eup %5201  ;;  %2090 = vmatprep.mubr.f32.mxu0 %v1852_v26  ;;  %2161 = vmatprep.mubr.f32.mxu1 %v1852_v26  ;;  %v3271_v18 = vrot.slane %v1852_v26, 2 }
 0x59d   :  { %v5204_v42 = vpop.eup %5203  ;;  %v2002_v54 = vadd.f32 1.0, %v5202_v3  ;;  %v7684_v3 = vld [vmem:[#allocation10_spill] sm:$0xff] }
 0x59e   :  { %v2008_v61 = vadd.f32 1.0, %v5204_v42  ;;  %v6795_v28 = vsel %vm3283_vm3, %v6677_v20, %v3271_v18  ;;  %v5206_v12 = vpop.eup %5205  ;;  %v7682_v18 = vld [vmem:[#allocation8_spill] sm:$0xff]  ;;  %v7685_v42 = vld [vmem:[#allocation11_spill] sm:$0xff] }
 0x59f   :  { %7680 = vst [vmem:[#allocation64_spill] sm:$0xff] %v6795_v28  ;;  %5209 = vrcp.f32 %v2002_v54  ;;  %v5208_v41 = vpop.eup %5207  ;;  %v2015_v56 = vadd.f32 1.0, %v5206_v12  ;;  %v7683_v54 = vld [vmem:[#allocation9_spill] sm:$0xff]  ;;  %v7698_v28 = vld [vmem:[#allocation24_spill] sm:$0xff] }
 0x5a0   :  { %5211 = vrcp.f32 %v2008_v61  ;;  %v7686_v61 = vld [vmem:[#allocation12_spill] sm:$0xff]  ;;  %v7687_v12 = vld [vmem:[#allocation13_spill] sm:$0xff] }
 0x5a1   :  { %5213 = vrcp.f32 %v2015_v56  ;;  %v7693_v56 = vld [vmem:[#allocation19_spill] sm:$0xff] }
 0x5a9   :  { %v5210_v8 = vpop.eup %5209 }
 0x5aa   :  { %v5212_v5 = vpop.eup %5211  ;;  %v2022_v55 = vmul.f32 %v5210_v8, %v5208_v41  ;;  %v7688_v41 = vld [vmem:[#allocation14_spill] sm:$0xff]  ;;  %v7689_v8 = vld [vmem:[#allocation15_spill] sm:$0xff] }
 0x5ab   :  { %v2021_v26 = vmul.f32 %v5212_v5, %v2019_v50  ;;  %v5214_v0 = vpop.eup %5213  ;;  %v7690_v50 = vld [vmem:[#allocation16_spill] sm:$0xff]  ;;  %v7691_v5 = vld [vmem:[#allocation17_spill] sm:$0xff] }
 0x5ad   :  { %v6798_v1 = vadd.f32 %v2022_v55, %v2021_v26  ;;  %v7692_v55 = vld [vmem:[#allocation18_spill] sm:$0xff]  ;;  %v7694_v26 = vld [vmem:[#allocation20_spill] sm:$0xff] }
 0x5af   :  { %5215 = vtanh.f32 %v6798_v1 }
 0x5b9   :  { %v5216_v11 = vpop.eup %5215 }
 0x5ba   :  { %v2025_v20 = vmul.f32 %v5216_v11, %v5214_v0  ;;  %v7695_v0 = vld [vmem:[#allocation21_spill] sm:$0xff]  ;;  %v7696_v11 = vld [vmem:[#allocation22_spill] sm:$0xff] }
 0x5bc   :  { %2091 = vmatmul.mubr.f32.vlgmr.msra.gmra.mrb[18].mxu0 %v2025_v20  ;;  %2162 = vmatmul.mubr.f32.vlgmr.msra.gmra.mrb[26].mxu1 %v2025_v20 }
 0x5bd   :  { %4465 = vmatpush1.bf16.msra.mxu0 %v5397_v9  ;;  %4497 = vmatpush1.bf16.msra.mxu1 %v5476_v34 }
 0x5be   :  { %4467 = vmatprep.subr.bf16.mxu0 %v5409_v14  ;;  %4499 = vmatprep.subr.bf16.mxu1 %v5490_v39 }
 0x5bf   :  { %2256 = vmatprep.mubr.f32.mxu0 %v7427_v36  ;;  %2327 = vmatprep.mubr.f32.mxu1 %v7427_v36 }
 0x5c1   :  { %4469 = vmatpush1.bf16.msra.mxu0 %v5427_v19  ;;  %4501 = vmatpush1.bf16.msra.mxu1 %v5513_v46 }
 0x5c2   :  { %4471 = vmatprep.subr.bf16.mxu0 %v5440_v23  ;;  %4503 = vmatprep.subr.bf16.mxu1 %v5527_v51 }
 0x5c5   :  { %4473 = vmatpush1.bf16.msra.mxu0 %v5472_v33  ;;  %4505 = vmatpush1.bf16.msra.mxu1 %v5551_v58 }
 0x5c6   :  { %4475 = vmatprep.subr.bf16.mxu0 %v5478_v35  ;;  %4507 = vmatprep.subr.bf16.mxu1 %v5565_v63 }
 0x5c9   :  { %4477 = vmatpush1.bf16.msra.mxu0 %v5509_v45  ;;  %4509 = vmatpush1.bf16.msra.mxu1 %v5588_v7 }
 0x5ca   :  { %4479 = vmatprep.subr.bf16.mxu0 %v5515_v47  ;;  %4511 = vmatprep.subr.bf16.mxu1 %v5602_v15 }
 0x5cd   :  { %4481 = vmatpush1.bf16.msra.mxu0 %v5546_v57  ;;  %4513 = vmatpush1.bf16.msra.mxu1 %v5624_v24 }
 0x5ce   :  { %4483 = vmatprep.subr.bf16.mxu0 %v5553_v59  ;;  %4515 = vmatprep.subr.bf16.mxu1 %v5635_v29 }
 0x5d1   :  { %4485 = vmatpush1.bf16.msra.mxu0 %v5584_v6  ;;  %4517 = vmatpush1.bf16.msra.mxu1 %v5654_v38 }
 0x5d2   :  { %4487 = vmatprep.subr.bf16.mxu0 %v5590_v10  ;;  %4519 = vmatprep.subr.bf16.mxu1 %v5657_v40 }
 0x5d5   :  { %4489 = vmatpush1.bf16.msra.mxu0 %v5620_v22  ;;  %4521 = vmatpush1.bf16.msra.mxu1 %v5673_v48 }
 0x5d6   :  { %4491 = vmatprep.subr.bf16.mxu0 %v5626_v25  ;;  %4523 = vmatprep.subr.bf16.mxu1 %v5676_v49 }
 0x5d9   :  { %4493 = vmatpush1.bf16.msra.mxu0 %v5650_v37  ;;  %4525 = vmatpush1.bf16.msra.mxu1 %v5687_v53 }
 0x5da   :  { %4527 = vmatprep.subr.bf16.mxu0 %v5702_v60  ;;  %4591 = vmatprep.subr.bf16.mxu1 %v5707_v62 }
 0x5dc   :  { %2257 = vmatmul.mubr.f32.vlgmr.msra.gmra.mrb[20].mxu0 %v2025_v20  ;;  %2328 = vmatmul.mubr.f32.vlgmr.msra.gmra.mrb[28].mxu1 %v2025_v20  ;;  %v7697_v20 = vld [vmem:[#allocation23_spill] sm:$0xff] }
 0x5dd   :  { %4529 = vmatpush1.bf16.msra.mxu0 %v5719_v4  ;;  %4593 = vmatpush1.bf16.msra.mxu1 %v5731_v13 }
 0x5de   :  { %4531 = vmatprep.subr.bf16.mxu0 %v5733_v16  ;;  %4595 = vmatprep.subr.bf16.mxu1 %v5745_v21 }
 0x5e1   :  { %4533 = vmatpush1.bf16.msra.mxu0 %v5758_v31  ;;  %4597 = vmatpush1.bf16.msra.mxu1 %v5760_v32 }
 0x5e2   :  { %4535 = vmatprep.subr.bf16.mxu0 %v7615_v30  ;;  %4599 = vmatprep.subr.bf16.mxu1 %v7616_v43 }
 0x5e5   :  { %4537 = vmatpush1.bf16.msra.mxu0 %v7617_v2  ;;  %4601 = vmatpush1.bf16.msra.mxu1 %v7681_v44 }
 0x5e6   :  { %4539 = vmatprep.subr.bf16.mxu0 %v7682_v18  ;;  %4603 = vmatprep.subr.bf16.mxu1 %v7683_v54 }
 0x5e9   :  { %4541 = vmatpush1.bf16.msra.mxu0 %v7684_v3  ;;  %4605 = vmatpush1.bf16.msra.mxu1 %v7685_v42 }
 0x5ea   :  { %4543 = vmatprep.subr.bf16.mxu0 %v7686_v61  ;;  %4607 = vmatprep.subr.bf16.mxu1 %v7687_v12  ;;  %v7736_v12 = vld [vmem:[#allocation65_spill] sm:$0xff] }
 0x5ed   :  { %4545 = vmatpush1.bf16.msra.mxu0 %v7688_v41  ;;  %4609 = vmatpush1.bf16.msra.mxu1 %v7689_v8  ;;  %v7699_v41 = vld [vmem:[#allocation25_spill] sm:$0xff]  ;;  %v7700_v8 = vld [vmem:[#allocation26_spill] sm:$0xff] }
 0x5ee   :  { %4547 = vmatprep.subr.bf16.mxu0 %v7690_v50  ;;  %4611 = vmatprep.subr.bf16.mxu1 %v7691_v5  ;;  %v7701_v50 = vld [vmem:[#allocation27_spill] sm:$0xff]  ;;  %v7702_v5 = vld [vmem:[#allocation28_spill] sm:$0xff] }
 0x5f1   :  { %4549 = vmatpush1.bf16.msra.mxu0 %v7692_v55  ;;  %4613 = vmatpush1.bf16.msra.mxu1 %v7693_v56  ;;  %v7703_v55 = vld [vmem:[#allocation29_spill] sm:$0xff]  ;;  %v7704_v56 = vld [vmem:[#allocation30_spill] sm:$0xff] }
 0x5f2   :  { %4551 = vmatprep.subr.bf16.mxu0 %v7694_v26  ;;  %4615 = vmatprep.subr.bf16.mxu1 %v7695_v0  ;;  %v7705_v26 = vld [vmem:[#allocation31_spill] sm:$0xff]  ;;  %v7706_v0 = vld [vmem:[#allocation32_spill] sm:$0xff] }
 0x5f5   :  { %4553 = vmatpush1.bf16.msra.mxu0 %v7696_v11  ;;  %4617 = vmatpush1.bf16.msra.mxu1 %v7697_v20  ;;  %v7707_v11 = vld [vmem:[#allocation33_spill] sm:$0xff]  ;;  %v7708_v20 = vld [vmem:[#allocation34_spill] sm:$0xff] }
 0x5f6   :  { %4555 = vmatprep.subr.bf16.mxu0 %v7698_v28  ;;  %4619 = vmatprep.subr.bf16.mxu1 %v7699_v41  ;;  %v7709_v28 = vld [vmem:[#allocation35_spill] sm:$0xff]  ;;  %v7710_v41 = vld [vmem:[#allocation36_spill] sm:$0xff] }
 0x5f9   :  { %4557 = vmatpush1.bf16.msra.mxu0 %v7700_v8  ;;  %4621 = vmatpush1.bf16.msra.mxu1 %v7701_v50  ;;  %v7711_v8 = vld [vmem:[#allocation37_spill] sm:$0xff]  ;;  %v7712_v50 = vld [vmem:[#allocation38_spill] sm:$0xff] }
 0x5fa   :  { %4559 = vmatprep.subr.bf16.mxu0 %v7702_v5  ;;  %4623 = vmatprep.subr.bf16.mxu1 %v7703_v55  ;;  %v7713_v5 = vld [vmem:[#allocation39_spill] sm:$0xff]  ;;  %v7714_v55 = vld [vmem:[#allocation40_spill] sm:$0xff] }
 0x5fd   :  { %4561 = vmatpush1.bf16.msra.mxu0 %v7704_v56  ;;  %4625 = vmatpush1.bf16.msra.mxu1 %v7705_v26  ;;  %v7715_v56 = vld [vmem:[#allocation41_spill] sm:$0xff]  ;;  %v7716_v26 = vld [vmem:[#allocation42_spill] sm:$0xff] }
 0x5fe   :  { %4563 = vmatprep.subr.bf16.mxu0 %v7706_v0  ;;  %4627 = vmatprep.subr.bf16.mxu1 %v7707_v11  ;;  %v7717_v0 = vld [vmem:[#allocation43_spill] sm:$0xff]  ;;  %v7718_v11 = vld [vmem:[#allocation44_spill] sm:$0xff] }
 0x601   :  { %4565 = vmatpush1.bf16.msra.mxu0 %v7708_v20  ;;  %4629 = vmatpush1.bf16.msra.mxu1 %v7709_v28  ;;  %v7719_v20 = vld [vmem:[#allocation45_spill] sm:$0xff]  ;;  %v7720_v28 = vld [vmem:[#allocation46_spill] sm:$0xff] }
 0x602   :  { %4567 = vmatprep.subr.bf16.mxu0 %v7710_v41  ;;  %4631 = vmatprep.subr.bf16.mxu1 %v7711_v8  ;;  %v7721_v41 = vld [vmem:[#allocation47_spill] sm:$0xff]  ;;  %v7722_v8 = vld [vmem:[#allocation48_spill] sm:$0xff] }
 0x605   :  { %4569 = vmatpush1.bf16.msra.mxu0 %v7712_v50  ;;  %4633 = vmatpush1.bf16.msra.mxu1 %v7713_v5  ;;  %v7723_v50 = vld [vmem:[#allocation49_spill] sm:$0xff]  ;;  %v7724_v5 = vld [vmem:[#allocation50_spill] sm:$0xff] }
 0x606   :  { %4571 = vmatprep.subr.bf16.mxu0 %v7714_v55  ;;  %4635 = vmatprep.subr.bf16.mxu1 %v7715_v56  ;;  %v7725_v55 = vld [vmem:[#allocation51_spill] sm:$0xff]  ;;  %v7726_v56 = vld [vmem:[#allocation52_spill] sm:$0xff] }
 0x609   :  { %4573 = vmatpush1.bf16.msra.mxu0 %v7716_v26  ;;  %4637 = vmatpush1.bf16.msra.mxu1 %v7717_v0  ;;  %v7727_v26 = vld [vmem:[#allocation53_spill] sm:$0xff]  ;;  %v7728_v0 = vld [vmem:[#allocation54_spill] sm:$0xff] }
 0x60a   :  { %4575 = vmatprep.subr.bf16.mxu0 %v7718_v11  ;;  %4639 = vmatprep.subr.bf16.mxu1 %v7719_v20  ;;  %v7729_v11 = vld [vmem:[#allocation55_spill] sm:$0xff]  ;;  %v7730_v20 = vld [vmem:[#allocation56_spill] sm:$0xff] }
 0x60d   :  { %4577 = vmatpush1.bf16.msra.mxu0 %v7720_v28  ;;  %4641 = vmatpush1.bf16.msra.mxu1 %v7721_v41  ;;  %v7731_v28 = vld [vmem:[#allocation57_spill] sm:$0xff]  ;;  %v7732_v41 = vld [vmem:[#allocation58_spill] sm:$0xff] }
 0x60e   :  { %4579 = vmatprep.subr.bf16.mxu0 %v7722_v8  ;;  %4643 = vmatprep.subr.bf16.mxu1 %v7723_v50  ;;  %v7733_v8 = vld [vmem:[#allocation59_spill] sm:$0xff]  ;;  %v7734_v50 = vld [vmem:[#allocation2_spill] sm:$0xff] }
 0x611   :  { %4581 = vmatpush1.bf16.msra.mxu0 %v7724_v5  ;;  %4645 = vmatpush1.bf16.msra.mxu1 %v7725_v55  ;;  %v7735_v5 = vld [vmem:[#allocation3_spill] sm:$0xff] }
 0x612   :  { %4583 = vmatprep.subr.bf16.mxu0 %v7726_v56  ;;  %4647 = vmatprep.subr.bf16.mxu1 %v7727_v26 }
 0x615   :  { %4585 = vmatpush1.bf16.msra.mxu0 %v7728_v0  ;;  %4649 = vmatpush1.bf16.msra.mxu1 %v7729_v11 }
 0x616   :  { %4587 = vmatprep.subr.bf16.mxu0 %v7730_v20  ;;  %4651 = vmatprep.subr.bf16.mxu1 %v7731_v28  ;;  %v7737_v28 = vld [vmem:[#allocation67_spill] sm:$0xff] }
 0x619   :  { %4589 = vmatpush1.bf16.msra.mxu0 %v7732_v41  ;;  %4653 = vmatpush1.bf16.msra.mxu1 %v7733_v8  ;;  %v7738_v8 = vld [vmem:[#allocation68_spill] sm:$0xff] }
 0x61a   :  { %4655 = vmatprep.subr.bf16.mxu0 %v7734_v50  ;;  %4687 = vmatprep.subr.bf16.mxu1 %v7735_v5 }
 0x68f   :  { %v2092_v55 = vpop.f32.mrb[18].mxu0  ;;  %v2163_v56 = vpop.f32.mrb[26].mxu1 }
 0x690   :  { %v2093_v26 = vadd.f32 %v2092_v55, %v7736_v12  ;;  %v2094_v61 = vpop.f32.mrb[19].mxu0  ;;  %v2165_v0 = vpop.f32.mrb[27].mxu1  ;;  %v2164_v54 = vadd.f32 %v2163_v56, %v7738_v8 }
 0x691   :  { %v2095_v11 = vadd.f32 %v2094_v61, %v6418_v17  ;;  %v2166_v41 = vadd.f32 %v2165_v0, %v7737_v28 }
 0x692   :  { %v3427_v42 = vmul.f32 -1.442695, %v2093_v26 }
 0x693   :  { %v3428_v20 = vmul.f32 -1.442695, %v2095_v11  ;;  %v3429_v3 = vmul.f32 -1.442695, %v2166_v41 }
 0x694   :  { %5217 = vpow2.f32 %v3427_v42 }
 0x695   :  { %5219 = vpow2.f32 %v3428_v20 }
 0x696   :  { %5221 = vpow2.f32 %v3429_v3 }
 0x697   :  { %5223 = vtanh.f32 %v2164_v54 }
 0x69e   :  { %v5218_v50 = vpop.eup %5217 }
 0x69f   :  { %v5220_v18 = vpop.eup %5219  ;;  %v2171_v5 = vadd.f32 1.0, %v5218_v50 }
 0x6a0   :  { %v2177_v44 = vadd.f32 1.0, %v5220_v18  ;;  %v5222_v55 = vpop.eup %5221 }
 0x6a1   :  { %5225 = vrcp.f32 %v2171_v5  ;;  %v5224_v12 = vpop.eup %5223  ;;  %v2184_v42 = vadd.f32 1.0, %v5222_v55  ;;  %v7741_v5 = vld [vmem:[#allocation61_spill] sm:$0xff] }
 0x6a2   :  { %5227 = vrcp.f32 %v2177_v44  ;;  %v7740_v44 = vld [vmem:[#allocation60_spill] sm:$0xff] }
 0x6a3   :  { %5229 = vrcp.f32 %v2184_v42 }
 0x6ab   :  { %v5226_v61 = vpop.eup %5225 }
 0x6ac   :  { %v5228_v26 = vpop.eup %5227  ;;  %v2188_v11 = vmul.f32 %v5226_v61, %v5224_v12 }
 0x6ad   :  { %v2187_v20 = vmul.f32 %v5228_v26, %v6786_v52  ;;  %v5230_v61 = vpop.eup %5229 }
 0x6af   :  { %v6904_v0 = vadd.f32 %v2188_v11, %v2187_v20  ;;  %v2258_v41 = vpop.f32.mrb[20].mxu0  ;;  %v2329_v56 = vpop.f32.mrb[28].mxu1 }
 0x6b0   :  { %v2338_v8 = vrot.slane %v2258_v41, 6  ;;  %v2260_v50 = vpop.f32.mrb[21].mxu0  ;;  %v2331_v3 = vpop.f32.mrb[29].mxu1  ;;  %v2340_v26 = vrot.slane %v2329_v56, 6  ;;  %v7743_v41 = vld [vmem:[#allocation62_spill] sm:$0xff] }
 0x6b1   :  { %7739 = vst [vmem:[#allocation69_spill] sm:$0xff] %v6904_v0  ;;  %v2339_v54 = vrot.slane %v2260_v50, 6  ;;  %5231 = vtanh.f32 %v6904_v0  ;;  %v2341_v55 = vrot.slane %v2331_v3, 6 }
 0x6b2   :  { %v2346_v18 = vadd.f32 %v2338_v8, %v7740_v44  ;;  %v2348_v50 = vadd.f32 %v2340_v26, %v7743_v41 }
 0x6b3   :  { %v2347_v28 = vadd.f32 %v2339_v54, %v7741_v5  ;;  %v2349_v52 = vadd.f32 %v2341_v55, %v7678_v27 }
 0x6b4   :  { %v3430_v17 = vmul.f32 -1.442695, %v2346_v18 }
 0x6b5   :  { %v3431_v12 = vmul.f32 -1.442695, %v2347_v28  ;;  %v3432_v20 = vmul.f32 -1.442695, %v2349_v52 }
 0x6b6   :  { %5233 = vpow2.f32 %v3430_v17 }
 0x6b7   :  { %5235 = vpow2.f32 %v3431_v12  ;;  %v2370_v12 = vrot.slane %v6798_v1, 6  ;;  %v7744_v1 = vld [vmem:[#allocation7_spill] sm:$0xff] }
 0x6b8   :  { %5237 = vpow2.f32 %v3432_v20 }
 0x6b9   :  { %5239 = vtanh.f32 %v2348_v50 }
 0x6bb   :  { %v5232_v11 = vpop.eup %5231 }
 0x6bc   :  { %v6910_v42 = vmul.f32 %v5232_v11, %v5230_v61 }
 0x6be   :  { %7742 = vst [vmem:[#allocation4_spill] sm:$0xff] %v6910_v42  ;;  %v2378_v0 = vrot.slane %v6910_v42, 6  ;;  %v7761_v42 = vld [vmem:[#allocation24_spill] sm:$0xff] }
 0x6c0   :  { %v5234_v8 = vpop.eup %5233  ;;  %v2381_v44 = vrot.slane %v2378_v0, 2 }
 0x6c1   :  { %v5236_v54 = vpop.eup %5235  ;;  %v2353_v18 = vadd.f32 1.0, %v5234_v8  ;;  %v7745_v8 = vld [vmem:[#allocation8_spill] sm:$0xff] }
 0x6c2   :  { %v2359_v17 = vadd.f32 1.0, %v5236_v54  ;;  %2448 = vmatprep.mubr.f32.mxu0 %v2381_v44  ;;  %2519 = vmatprep.mubr.f32.mxu1 %v2381_v44  ;;  %v5238_v28 = vpop.eup %5237  ;;  %v7746_v54 = vld [vmem:[#allocation9_spill] sm:$0xff] }
 0x6c3   :  { %5241 = vrcp.f32 %v2353_v18  ;;  %v5240_v56 = vpop.eup %5239  ;;  %v2366_v61 = vadd.f32 1.0, %v5238_v28  ;;  %v7747_v18 = vld [vmem:[#allocation10_spill] sm:$0xff]  ;;  %v7749_v28 = vld [vmem:[#allocation12_spill] sm:$0xff] }
 0x6c4   :  { %5243 = vrcp.f32 %v2359_v17  ;;  %v7748_v17 = vld [vmem:[#allocation11_spill] sm:$0xff] }
 0x6c5   :  { %5245 = vrcp.f32 %v2366_v61  ;;  %v7755_v61 = vld [vmem:[#allocation18_spill] sm:$0xff] }
 0x6cd   :  { %v5242_v3 = vpop.eup %5241 }
 0x6ce   :  { %v5244_v55 = vpop.eup %5243  ;;  %v2373_v52 = vmul.f32 %v5242_v3, %v5240_v56  ;;  %v7750_v56 = vld [vmem:[#allocation13_spill] sm:$0xff]  ;;  %v7751_v3 = vld [vmem:[#allocation14_spill] sm:$0xff] }
 0x6cf   :  { %v2372_v26 = vmul.f32 %v5244_v55, %v2370_v12  ;;  %v5246_v0 = vpop.eup %5245  ;;  %v7752_v12 = vld [vmem:[#allocation15_spill] sm:$0xff]  ;;  %v7753_v55 = vld [vmem:[#allocation16_spill] sm:$0xff] }
 0x6d1   :  { %v6915_v11 = vadd.f32 %v2373_v52, %v2372_v26  ;;  %v7754_v52 = vld [vmem:[#allocation17_spill] sm:$0xff]  ;;  %v7756_v26 = vld [vmem:[#allocation19_spill] sm:$0xff] }
 0x6d3   :  { %5247 = vtanh.f32 %v6915_v11 }
 0x6dd   :  { %v5248_v20 = vpop.eup %5247 }
 0x6de   :  { %v2376_v50 = vmul.f32 %v5248_v20, %v5246_v0  ;;  %v7757_v0 = vld [vmem:[#allocation20_spill] sm:$0xff]  ;;  %v7758_v20 = vld [vmem:[#allocation21_spill] sm:$0xff] }
 0x6e0   :  { %v2380_v44 = vrot.slane %v2376_v50, 2  ;;  %v7759_v50 = vld [vmem:[#allocation22_spill] sm:$0xff] }
 0x6e2   :  { %2449 = vmatmul.mubr.f32.vlgmr.msra.gmra.mrb[22].mxu0 %v2380_v44  ;;  %2520 = vmatmul.mubr.f32.vlgmr.msra.gmra.mrb[30].mxu1 %v2380_v44 }
 0x6e3   :  { %4657 = vmatpush1.bf16.msra.mxu0 %v5397_v9  ;;  %4689 = vmatpush1.bf16.msra.mxu1 %v5476_v34 }
 0x6e4   :  { %4659 = vmatprep.subr.bf16.mxu0 %v5409_v14  ;;  %4691 = vmatprep.subr.bf16.mxu1 %v5490_v39 }
 0x6e5   :  { %2614 = vmatprep.mubr.f32.mxu0 %v7427_v36  ;;  %2685 = vmatprep.mubr.f32.mxu1 %v7427_v36 }
 0x6e7   :  { %4661 = vmatpush1.bf16.msra.mxu0 %v5427_v19  ;;  %4693 = vmatpush1.bf16.msra.mxu1 %v5513_v46 }
 0x6e8   :  { %4663 = vmatprep.subr.bf16.mxu0 %v5440_v23  ;;  %4695 = vmatprep.subr.bf16.mxu1 %v5527_v51 }
 0x6eb   :  { %4665 = vmatpush1.bf16.msra.mxu0 %v5472_v33  ;;  %4697 = vmatpush1.bf16.msra.mxu1 %v5551_v58 }
 0x6ec   :  { %4667 = vmatprep.subr.bf16.mxu0 %v5478_v35  ;;  %4699 = vmatprep.subr.bf16.mxu1 %v5565_v63 }
 0x6ef   :  { %4669 = vmatpush1.bf16.msra.mxu0 %v5509_v45  ;;  %4701 = vmatpush1.bf16.msra.mxu1 %v5588_v7 }
 0x6f0   :  { %4671 = vmatprep.subr.bf16.mxu0 %v5515_v47  ;;  %4703 = vmatprep.subr.bf16.mxu1 %v5602_v15 }
 0x6f3   :  { %4673 = vmatpush1.bf16.msra.mxu0 %v5546_v57  ;;  %4705 = vmatpush1.bf16.msra.mxu1 %v5624_v24 }
 0x6f4   :  { %4675 = vmatprep.subr.bf16.mxu0 %v5553_v59  ;;  %4707 = vmatprep.subr.bf16.mxu1 %v5635_v29 }
 0x6f7   :  { %4677 = vmatpush1.bf16.msra.mxu0 %v5584_v6  ;;  %4709 = vmatpush1.bf16.msra.mxu1 %v5654_v38 }
 0x6f8   :  { %4679 = vmatprep.subr.bf16.mxu0 %v5590_v10  ;;  %4711 = vmatprep.subr.bf16.mxu1 %v5657_v40 }
 0x6fb   :  { %4681 = vmatpush1.bf16.msra.mxu0 %v5620_v22  ;;  %4713 = vmatpush1.bf16.msra.mxu1 %v5673_v48 }
 0x6fc   :  { %4683 = vmatprep.subr.bf16.mxu0 %v5626_v25  ;;  %4715 = vmatprep.subr.bf16.mxu1 %v5676_v49 }
 0x6ff   :  { %4685 = vmatpush1.bf16.msra.mxu0 %v5650_v37  ;;  %4717 = vmatpush1.bf16.msra.mxu1 %v5687_v53 }
 0x700   :  { %4719 = vmatprep.subr.bf16.mxu0 %v5702_v60  ;;  %4783 = vmatprep.subr.bf16.mxu1 %v5707_v62 }
 0x702   :  { %2615 = vmatmul.mubr.f32.vlgmr.msra.gmra.mrb[24].mxu0 %v2380_v44  ;;  %2686 = vmatmul.mubr.f32.vlgmr.msra.gmra.mrb[32].mxu1 %v2380_v44  ;;  %v7760_v44 = vld [vmem:[#allocation23_spill] sm:$0xff] }
 0x703   :  { %4721 = vmatpush1.bf16.msra.mxu0 %v5719_v4  ;;  %4785 = vmatpush1.bf16.msra.mxu1 %v5731_v13 }
 0x704   :  { %4723 = vmatprep.subr.bf16.mxu0 %v5733_v16  ;;  %4787 = vmatprep.subr.bf16.mxu1 %v5745_v21 }
 0x707   :  { %4725 = vmatpush1.bf16.msra.mxu0 %v5758_v31  ;;  %4789 = vmatpush1.bf16.msra.mxu1 %v5760_v32 }
 0x708   :  { %4727 = vmatprep.subr.bf16.mxu0 %v7615_v30  ;;  %4791 = vmatprep.subr.bf16.mxu1 %v7616_v43 }
 0x70b   :  { %4729 = vmatpush1.bf16.msra.mxu0 %v7617_v2  ;;  %4793 = vmatpush1.bf16.msra.mxu1 %v7744_v1 }
 0x70c   :  { %4731 = vmatprep.subr.bf16.mxu0 %v7745_v8  ;;  %4795 = vmatprep.subr.bf16.mxu1 %v7746_v54 }
 0x70f   :  { %4733 = vmatpush1.bf16.msra.mxu0 %v7747_v18  ;;  %4797 = vmatpush1.bf16.msra.mxu1 %v7748_v17  ;;  %v7800_v17 = vld [vmem:[#allocation66_spill] sm:$0xff] }
 0x710   :  { %4735 = vmatprep.subr.bf16.mxu0 %v7749_v28  ;;  %4799 = vmatprep.subr.bf16.mxu1 %v7750_v56  ;;  %v7799_v56 = vld [vmem:[#allocation65_spill] sm:$0xff] }
 0x713   :  { %4737 = vmatpush1.bf16.msra.mxu0 %v7751_v3  ;;  %4801 = vmatpush1.bf16.msra.mxu1 %v7752_v12  ;;  %v7762_v3 = vld [vmem:[#allocation25_spill] sm:$0xff]  ;;  %v7763_v12 = vld [vmem:[#allocation26_spill] sm:$0xff] }
 0x714   :  { %4739 = vmatprep.subr.bf16.mxu0 %v7753_v55  ;;  %4803 = vmatprep.subr.bf16.mxu1 %v7754_v52  ;;  %v7764_v55 = vld [vmem:[#allocation27_spill] sm:$0xff]  ;;  %v7765_v52 = vld [vmem:[#allocation28_spill] sm:$0xff] }
 0x717   :  { %4741 = vmatpush1.bf16.msra.mxu0 %v7755_v61  ;;  %4805 = vmatpush1.bf16.msra.mxu1 %v7756_v26  ;;  %v7766_v61 = vld [vmem:[#allocation29_spill] sm:$0xff]  ;;  %v7767_v26 = vld [vmem:[#allocation30_spill] sm:$0xff] }
 0x718   :  { %4743 = vmatprep.subr.bf16.mxu0 %v7757_v0  ;;  %4807 = vmatprep.subr.bf16.mxu1 %v7758_v20  ;;  %v7768_v0 = vld [vmem:[#allocation31_spill] sm:$0xff]  ;;  %v7769_v20 = vld [vmem:[#allocation32_spill] sm:$0xff] }
 0x71b   :  { %4745 = vmatpush1.bf16.msra.mxu0 %v7759_v50  ;;  %4809 = vmatpush1.bf16.msra.mxu1 %v7760_v44  ;;  %v7770_v50 = vld [vmem:[#allocation33_spill] sm:$0xff]  ;;  %v7771_v44 = vld [vmem:[#allocation34_spill] sm:$0xff] }
 0x71c   :  { %4747 = vmatprep.subr.bf16.mxu0 %v7761_v42  ;;  %4811 = vmatprep.subr.bf16.mxu1 %v7762_v3  ;;  %v7772_v42 = vld [vmem:[#allocation35_spill] sm:$0xff]  ;;  %v7773_v3 = vld [vmem:[#allocation36_spill] sm:$0xff] }
 0x71f   :  { %4749 = vmatpush1.bf16.msra.mxu0 %v7763_v12  ;;  %4813 = vmatpush1.bf16.msra.mxu1 %v7764_v55  ;;  %v7774_v12 = vld [vmem:[#allocation37_spill] sm:$0xff]  ;;  %v7775_v55 = vld [vmem:[#allocation38_spill] sm:$0xff] }
 0x720   :  { %4751 = vmatprep.subr.bf16.mxu0 %v7765_v52  ;;  %4815 = vmatprep.subr.bf16.mxu1 %v7766_v61  ;;  %v7776_v52 = vld [vmem:[#allocation39_spill] sm:$0xff]  ;;  %v7777_v61 = vld [vmem:[#allocation40_spill] sm:$0xff] }
 0x723   :  { %4753 = vmatpush1.bf16.msra.mxu0 %v7767_v26  ;;  %4817 = vmatpush1.bf16.msra.mxu1 %v7768_v0  ;;  %v7778_v26 = vld [vmem:[#allocation41_spill] sm:$0xff]  ;;  %v7779_v0 = vld [vmem:[#allocation42_spill] sm:$0xff] }
 0x724   :  { %4755 = vmatprep.subr.bf16.mxu0 %v7769_v20  ;;  %4819 = vmatprep.subr.bf16.mxu1 %v7770_v50  ;;  %v7780_v20 = vld [vmem:[#allocation43_spill] sm:$0xff]  ;;  %v7781_v50 = vld [vmem:[#allocation44_spill] sm:$0xff] }
 0x727   :  { %4757 = vmatpush1.bf16.msra.mxu0 %v7771_v44  ;;  %4821 = vmatpush1.bf16.msra.mxu1 %v7772_v42  ;;  %v7782_v44 = vld [vmem:[#allocation45_spill] sm:$0xff]  ;;  %v7783_v42 = vld [vmem:[#allocation46_spill] sm:$0xff] }
 0x728   :  { %4759 = vmatprep.subr.bf16.mxu0 %v7773_v3  ;;  %4823 = vmatprep.subr.bf16.mxu1 %v7774_v12  ;;  %v7784_v3 = vld [vmem:[#allocation47_spill] sm:$0xff]  ;;  %v7785_v12 = vld [vmem:[#allocation48_spill] sm:$0xff] }
 0x72b   :  { %4761 = vmatpush1.bf16.msra.mxu0 %v7775_v55  ;;  %4825 = vmatpush1.bf16.msra.mxu1 %v7776_v52  ;;  %v7786_v55 = vld [vmem:[#allocation49_spill] sm:$0xff]  ;;  %v7787_v52 = vld [vmem:[#allocation50_spill] sm:$0xff] }
 0x72c   :  { %4763 = vmatprep.subr.bf16.mxu0 %v7777_v61  ;;  %4827 = vmatprep.subr.bf16.mxu1 %v7778_v26  ;;  %v7788_v61 = vld [vmem:[#allocation51_spill] sm:$0xff]  ;;  %v7789_v26 = vld [vmem:[#allocation52_spill] sm:$0xff] }
 0x72f   :  { %4765 = vmatpush1.bf16.msra.mxu0 %v7779_v0  ;;  %4829 = vmatpush1.bf16.msra.mxu1 %v7780_v20  ;;  %v7790_v0 = vld [vmem:[#allocation53_spill] sm:$0xff]  ;;  %v7791_v20 = vld [vmem:[#allocation54_spill] sm:$0xff] }
 0x730   :  { %4767 = vmatprep.subr.bf16.mxu0 %v7781_v50  ;;  %4831 = vmatprep.subr.bf16.mxu1 %v7782_v44  ;;  %v7792_v50 = vld [vmem:[#allocation55_spill] sm:$0xff]  ;;  %v7793_v44 = vld [vmem:[#allocation56_spill] sm:$0xff] }
 0x733   :  { %4769 = vmatpush1.bf16.msra.mxu0 %v7783_v42  ;;  %4833 = vmatpush1.bf16.msra.mxu1 %v7784_v3  ;;  %v7794_v42 = vld [vmem:[#allocation57_spill] sm:$0xff]  ;;  %v7795_v3 = vld [vmem:[#allocation58_spill] sm:$0xff] }
 0x734   :  { %4771 = vmatprep.subr.bf16.mxu0 %v7785_v12  ;;  %4835 = vmatprep.subr.bf16.mxu1 %v7786_v55  ;;  %v7796_v12 = vld [vmem:[#allocation59_spill] sm:$0xff]  ;;  %v7797_v55 = vld [vmem:[#allocation2_spill] sm:$0xff] }
 0x737   :  { %4773 = vmatpush1.bf16.msra.mxu0 %v7787_v52  ;;  %4837 = vmatpush1.bf16.msra.mxu1 %v7788_v61  ;;  %v7798_v52 = vld [vmem:[#allocation3_spill] sm:$0xff] }
 0x738   :  { %4775 = vmatprep.subr.bf16.mxu0 %v7789_v26  ;;  %4839 = vmatprep.subr.bf16.mxu1 %v7790_v0 }
 0x73b   :  { %4777 = vmatpush1.bf16.msra.mxu0 %v7791_v20  ;;  %4841 = vmatpush1.bf16.msra.mxu1 %v7792_v50 }
 0x73c   :  { %4779 = vmatprep.subr.bf16.mxu0 %v7793_v44  ;;  %4843 = vmatprep.subr.bf16.mxu1 %v7794_v42  ;;  %v7801_v42 = vld [vmem:[#allocation67_spill] sm:$0xff] }
 0x73f   :  { %4781 = vmatpush1.bf16.msra.mxu0 %v7795_v3  ;;  %4845 = vmatpush1.bf16.msra.mxu1 %v7796_v12  ;;  %v7802_v12 = vld [vmem:[#allocation68_spill] sm:$0xff] }
 0x740   :  { %4847 = vmatprep.subr.bf16.mxu0 %v7797_v55  ;;  %4879 = vmatprep.subr.bf16.mxu1 %v7798_v52 }
 0x7b5   :  { %v2450_v61 = vpop.f32.mrb[22].mxu0  ;;  %v2521_v26 = vpop.f32.mrb[30].mxu1 }
 0x7b6   :  { %v2451_v0 = vadd.f32 %v2450_v61, %v7799_v56  ;;  %v2452_v28 = vpop.f32.mrb[23].mxu0  ;;  %v2523_v20 = vpop.f32.mrb[31].mxu1  ;;  %v2522_v8 = vadd.f32 %v2521_v26, %v7802_v12 }
 0x7b7   :  { %v2453_v50 = vadd.f32 %v2452_v28, %v7800_v17  ;;  %v2524_v3 = vadd.f32 %v2523_v20, %v7801_v42 }
 0x7b8   :  { %v3433_v18 = vmul.f32 -1.442695, %v2451_v0 }
 0x7b9   :  { %v3434_v44 = vmul.f32 -1.442695, %v2453_v50  ;;  %v3435_v54 = vmul.f32 -1.442695, %v2524_v3 }
 0x7ba   :  { %5249 = vpow2.f32 %v3433_v18 }
 0x7bb   :  { %5251 = vpow2.f32 %v3434_v44  ;;  %v7803_v44 = vld [vmem:[#allocation69_spill] sm:$0xff] }
 0x7bc   :  { %5253 = vpow2.f32 %v3435_v54 }
 0x7bd   :  { %5255 = vtanh.f32 %v2522_v8 }
 0x7c4   :  { %v5250_v55 = vpop.eup %5249 }
 0x7c5   :  { %v5252_v1 = vpop.eup %5251  ;;  %v2529_v52 = vadd.f32 1.0, %v5250_v55 }
 0x7c6   :  { %v2535_v2 = vadd.f32 1.0, %v5252_v1  ;;  %v5254_v61 = vpop.eup %5253 }
 0x7c7   :  { %5257 = vrcp.f32 %v2529_v52  ;;  %v5256_v56 = vpop.eup %5255  ;;  %v2542_v18 = vadd.f32 1.0, %v5254_v61 }
 0x7c8   :  { %5259 = vrcp.f32 %v2535_v2  ;;  %v7804_v2 = vld [vmem:[#allocation60_spill] sm:$0xff] }
 0x7c9   :  { %5261 = vrcp.f32 %v2542_v18 }
 0x7d1   :  { %v5258_v28 = vpop.eup %5257 }
 0x7d2   :  { %v5260_v0 = vpop.eup %5259  ;;  %v2546_v50 = vmul.f32 %v5258_v28, %v5256_v56 }
 0x7d3   :  { %v2545_v17 = vmul.f32 %v5260_v0, %v7803_v44  ;;  %v5262_v28 = vpop.eup %5261 }
 0x7d5   :  { %v7021_v20 = vadd.f32 %v2546_v50, %v2545_v17  ;;  %v2616_v3 = vpop.f32.mrb[24].mxu0  ;;  %v2687_v26 = vpop.f32.mrb[32].mxu1 }
 0x7d6   :  { %v2696_v12 = vrot.slane %v2616_v3, 4  ;;  %v2618_v55 = vpop.f32.mrb[25].mxu0  ;;  %v2689_v54 = vpop.f32.mrb[33].mxu1  ;;  %v2698_v0 = vrot.slane %v2687_v26, 4 }
 0x7d7   :  { %v2697_v8 = vrot.slane %v2618_v55, 4  ;;  %5263 = vtanh.f32 %v7021_v20  ;;  %v2699_v61 = vrot.slane %v2689_v54, 4 }
 0x7d8   :  { %v2704_v1 = vadd.f32 %v2696_v12, %v7804_v2  ;;  %v2706_v3 = vadd.f32 %v2698_v0, %v7743_v41 }
 0x7d9   :  { %v2705_v52 = vadd.f32 %v2697_v8, %v7741_v5  ;;  %v2707_v17 = vadd.f32 %v2699_v61, %v7678_v27 }
 0x7da   :  { %v3436_v42 = vmul.f32 -1.442695, %v2704_v1 }
 0x7db   :  { %v3437_v56 = vmul.f32 -1.442695, %v2705_v52  ;;  %v3438_v44 = vmul.f32 -1.442695, %v2707_v17 }
 0x7dc   :  { %5265 = vpow2.f32 %v3436_v42 }
 0x7dd   :  { %5267 = vpow2.f32 %v3437_v56  ;;  %v2728_v56 = vrot.slane %v6915_v11, 6  ;;  %v7846_v11 = vld [vmem:[#allocation47_spill] sm:$0xff] }
 0x7de   :  { %5269 = vpow2.f32 %v3438_v44 }
 0x7df   :  { %5271 = vtanh.f32 %v2706_v3 }
 0x7e1   :  { %v5264_v50 = vpop.eup %5263 }
 0x7e2   :  { %v7027_v18 = vmul.f32 %v5264_v50, %v5262_v28 }
 0x7e4   :  { %v2736_v55 = vrot.slane %v7027_v18, 4 }
 0x7e6   :  { %v5266_v12 = vpop.eup %5265  ;;  %v2739_v2 = vrot.slane %v2736_v55, 4 }
 0x7e7   :  { %v5268_v8 = vpop.eup %5267  ;;  %v2711_v1 = vadd.f32 1.0, %v5266_v12  ;;  %v7847_v12 = vld [vmem:[#allocation48_spill] sm:$0xff] }
 0x7e8   :  { %v2717_v42 = vadd.f32 1.0, %v5268_v8  ;;  %2806 = vmatprep.mubr.f32.mxu0 %v2739_v2  ;;  %2877 = vmatprep.mubr.f32.mxu1 %v2739_v2  ;;  %v5270_v26 = vpop.eup %5269  ;;  %v7848_v8 = vld [vmem:[#allocation49_spill] sm:$0xff] }
 0x7e9   :  { %5273 = vrcp.f32 %v2711_v1  ;;  %v5272_v54 = vpop.eup %5271  ;;  %v2724_v28 = vadd.f32 1.0, %v5270_v26  ;;  %v7849_v1 = vld [vmem:[#allocation50_spill] sm:$0xff]  ;;  %v7851_v26 = vld [vmem:[#allocation52_spill] sm:$0xff] }
 0x7ea   :  { %5275 = vrcp.f32 %v2717_v42  ;;  %v7850_v42 = vld [vmem:[#allocation51_spill] sm:$0xff] }
 0x7eb   :  { %5277 = vrcp.f32 %v2724_v28  ;;  %v7857_v28 = vld [vmem:[#allocation58_spill] sm:$0xff] }
 0x7f3   :  { %v5274_v52 = vpop.eup %5273 }
 0x7f4   :  { %v5276_v61 = vpop.eup %5275  ;;  %v2731_v17 = vmul.f32 %v5274_v52, %v5272_v54  ;;  %v7852_v54 = vld [vmem:[#allocation53_spill] sm:$0xff]  ;;  %v7853_v52 = vld [vmem:[#allocation54_spill] sm:$0xff] }
 0x7f5   :  { %v2730_v0 = vmul.f32 %v5276_v61, %v2728_v56  ;;  %v5278_v44 = vpop.eup %5277  ;;  %v7854_v56 = vld [vmem:[#allocation55_spill] sm:$0xff]  ;;  %v7855_v61 = vld [vmem:[#allocation56_spill] sm:$0xff] }
 0x7f7   :  { %v7032_v50 = vadd.f32 %v2731_v17, %v2730_v0  ;;  %v7856_v17 = vld [vmem:[#allocation57_spill] sm:$0xff]  ;;  %v7858_v0 = vld [vmem:[#allocation59_spill] sm:$0xff] }
 0x7f9   :  { %5279 = vtanh.f32 %v7032_v50 }
 0x803   :  { %v5280_v3 = vpop.eup %5279 }
 0x804   :  { %v2734_v55 = vmul.f32 %v5280_v3, %v5278_v44 }
 0x806   :  { %v2738_v2 = vrot.slane %v2734_v55, 4  ;;  %v7859_v55 = vld [vmem:[#allocation65_spill] sm:$0xff] }
 0x808   :  { %2807 = vmatmul.mubr.f32.vlgmr.msra.gmra.mrb[26].mxu0 %v2738_v2  ;;  %2878 = vmatmul.mubr.f32.vlgmr.msra.gmra.mrb[34].mxu1 %v2738_v2 }
 0x809   :  { %4849 = vmatpush1.bf16.msra.mxu0 %v5397_v9  ;;  %4881 = vmatpush1.bf16.msra.mxu1 %v5476_v34  ;;  %v7805_v9 = vld [vmem:[#allocation6_spill] sm:$0xff]  ;;  %v7810_v34 = vld [vmem:[#allocation11_spill] sm:$0xff] }
 0x80a   :  { %4851 = vmatprep.subr.bf16.mxu0 %v5409_v14  ;;  %4883 = vmatprep.subr.bf16.mxu1 %v5490_v39  ;;  %v7806_v14 = vld [vmem:[#allocation7_spill] sm:$0xff]  ;;  %v7812_v39 = vld [vmem:[#allocation13_spill] sm:$0xff] }
 0x80b   :  { %2972 = vmatprep.mubr.f32.mxu0 %v7427_v36  ;;  %3043 = vmatprep.mubr.f32.mxu1 %v7427_v36  ;;  %v7843_v36 = vld [vmem:[#allocation44_spill] sm:$0xff] }
 0x80d   :  { %4853 = vmatpush1.bf16.msra.mxu0 %v5427_v19  ;;  %4885 = vmatpush1.bf16.msra.mxu1 %v5513_v46  ;;  %v7807_v19 = vld [vmem:[#allocation8_spill] sm:$0xff]  ;;  %v7814_v46 = vld [vmem:[#allocation15_spill] sm:$0xff] }
 0x80e   :  { %4855 = vmatprep.subr.bf16.mxu0 %v5440_v23  ;;  %4887 = vmatprep.subr.bf16.mxu1 %v5527_v51  ;;  %v7808_v23 = vld [vmem:[#allocation9_spill] sm:$0xff] }
 0x80f   :  { %v7816_v51 = vld [vmem:[#allocation17_spill] sm:$0xff] }
 0x811   :  { %4857 = vmatpush1.bf16.msra.mxu0 %v5472_v33  ;;  %4889 = vmatpush1.bf16.msra.mxu1 %v5551_v58  ;;  %v7809_v33 = vld [vmem:[#allocation10_spill] sm:$0xff]  ;;  %v7818_v58 = vld [vmem:[#allocation19_spill] sm:$0xff] }
 0x812   :  { %4859 = vmatprep.subr.bf16.mxu0 %v5478_v35  ;;  %4891 = vmatprep.subr.bf16.mxu1 %v5565_v63  ;;  %v7811_v35 = vld [vmem:[#allocation12_spill] sm:$0xff]  ;;  %v7820_v63 = vld [vmem:[#allocation21_spill] sm:$0xff] }
 0x815   :  { %4861 = vmatpush1.bf16.msra.mxu0 %v5509_v45  ;;  %4893 = vmatpush1.bf16.msra.mxu1 %v5588_v7  ;;  %v7813_v45 = vld [vmem:[#allocation14_spill] sm:$0xff]  ;;  %v7822_v7 = vld [vmem:[#allocation23_spill] sm:$0xff] }
 0x816   :  { %4863 = vmatprep.subr.bf16.mxu0 %v5515_v47  ;;  %4895 = vmatprep.subr.bf16.mxu1 %v5602_v15  ;;  %v7815_v47 = vld [vmem:[#allocation16_spill] sm:$0xff]  ;;  %v7824_v15 = vld [vmem:[#allocation25_spill] sm:$0xff] }
 0x819   :  { %4865 = vmatpush1.bf16.msra.mxu0 %v5546_v57  ;;  %4897 = vmatpush1.bf16.msra.mxu1 %v5624_v24  ;;  %v7817_v57 = vld [vmem:[#allocation18_spill] sm:$0xff]  ;;  %v7826_v24 = vld [vmem:[#allocation27_spill] sm:$0xff] }
 0x81a   :  { %4867 = vmatprep.subr.bf16.mxu0 %v5553_v59  ;;  %4899 = vmatprep.subr.bf16.mxu1 %v5635_v29  ;;  %v7819_v59 = vld [vmem:[#allocation20_spill] sm:$0xff]  ;;  %v7828_v29 = vld [vmem:[#allocation29_spill] sm:$0xff] }
 0x81d   :  { %4869 = vmatpush1.bf16.msra.mxu0 %v5584_v6  ;;  %4901 = vmatpush1.bf16.msra.mxu1 %v5654_v38  ;;  %v7821_v6 = vld [vmem:[#allocation22_spill] sm:$0xff]  ;;  %v7830_v38 = vld [vmem:[#allocation31_spill] sm:$0xff] }
 0x81e   :  { %4871 = vmatprep.subr.bf16.mxu0 %v5590_v10  ;;  %4903 = vmatprep.subr.bf16.mxu1 %v5657_v40  ;;  %v7823_v10 = vld [vmem:[#allocation24_spill] sm:$0xff] }
 0x81f   :  { %v7831_v40 = vld [vmem:[#allocation32_spill] sm:$0xff] }
 0x821   :  { %4873 = vmatpush1.bf16.msra.mxu0 %v5620_v22  ;;  %4905 = vmatpush1.bf16.msra.mxu1 %v5673_v48  ;;  %v7825_v22 = vld [vmem:[#allocation26_spill] sm:$0xff]  ;;  %v7832_v48 = vld [vmem:[#allocation33_spill] sm:$0xff] }
 0x822   :  { %4875 = vmatprep.subr.bf16.mxu0 %v5626_v25  ;;  %4907 = vmatprep.subr.bf16.mxu1 %v5676_v49  ;;  %v7827_v25 = vld [vmem:[#allocation28_spill] sm:$0xff]  ;;  %v7833_v49 = vld [vmem:[#allocation34_spill] sm:$0xff] }
 0x825   :  { %4877 = vmatpush1.bf16.msra.mxu0 %v5650_v37  ;;  %4909 = vmatpush1.bf16.msra.mxu1 %v5687_v53  ;;  %v7829_v37 = vld [vmem:[#allocation30_spill] sm:$0xff]  ;;  %v7834_v53 = vld [vmem:[#allocation35_spill] sm:$0xff] }
 0x826   :  { %4911 = vmatprep.subr.bf16.mxu0 %v5702_v60  ;;  %4975 = vmatprep.subr.bf16.mxu1 %v5707_v62  ;;  %v7835_v60 = vld [vmem:[#allocation36_spill] sm:$0xff]  ;;  %v7836_v62 = vld [vmem:[#allocation37_spill] sm:$0xff] }
 0x828   :  { %2973 = vmatmul.mubr.f32.vlgmr.msra.gmra.mrb[28].mxu0 %v2738_v2  ;;  %3044 = vmatmul.mubr.f32.vlgmr.msra.gmra.mrb[36].mxu1 %v2738_v2 }
 0x829   :  { %4913 = vmatpush1.bf16.msra.mxu0 %v5719_v4  ;;  %4977 = vmatpush1.bf16.msra.mxu1 %v5731_v13  ;;  %v7837_v4 = vld [vmem:[#allocation38_spill] sm:$0xff]  ;;  %v7838_v13 = vld [vmem:[#allocation39_spill] sm:$0xff] }
 0x82a   :  { %4915 = vmatprep.subr.bf16.mxu0 %v5733_v16  ;;  %4979 = vmatprep.subr.bf16.mxu1 %v5745_v21  ;;  %v7839_v16 = vld [vmem:[#allocation40_spill] sm:$0xff]  ;;  %v7840_v21 = vld [vmem:[#allocation41_spill] sm:$0xff] }
 0x82d   :  { %4917 = vmatpush1.bf16.msra.mxu0 %v5758_v31  ;;  %4981 = vmatpush1.bf16.msra.mxu1 %v5760_v32  ;;  %v7841_v31 = vld [vmem:[#allocation42_spill] sm:$0xff]  ;;  %v7842_v32 = vld [vmem:[#allocation43_spill] sm:$0xff] }
 0x82e   :  { %4919 = vmatprep.subr.bf16.mxu0 %v7615_v30  ;;  %4983 = vmatprep.subr.bf16.mxu1 %v7616_v43  ;;  %v7844_v30 = vld [vmem:[#allocation45_spill] sm:$0xff]  ;;  %v7845_v43 = vld [vmem:[#allocation46_spill] sm:$0xff] }
 0x831   :  { %4921 = vmatpush1.bf16.msra.mxu0 %v7805_v9  ;;  %4985 = vmatpush1.bf16.msra.mxu1 %v7806_v14 }
 0x832   :  { %4923 = vmatprep.subr.bf16.mxu0 %v7807_v19  ;;  %4987 = vmatprep.subr.bf16.mxu1 %v7808_v23  ;;  %v7860_v19 = vld [vmem:[#allocation66_spill] sm:$0xff] }
 0x835   :  { %4925 = vmatpush1.bf16.msra.mxu0 %v7809_v33  ;;  %4989 = vmatpush1.bf16.msra.mxu1 %v7810_v34 }
 0x836   :  { %4927 = vmatprep.subr.bf16.mxu0 %v7811_v35  ;;  %4991 = vmatprep.subr.bf16.mxu1 %v7812_v39  ;;  %v7861_v35 = vld [vmem:[#allocation67_spill] sm:$0xff] }
 0x839   :  { %4929 = vmatpush1.bf16.msra.mxu0 %v7813_v45  ;;  %4993 = vmatpush1.bf16.msra.mxu1 %v7814_v46  ;;  %v7862_v46 = vld [vmem:[#allocation68_spill] sm:$0xff] }
 0x83a   :  { %4931 = vmatprep.subr.bf16.mxu0 %v7815_v47  ;;  %4995 = vmatprep.subr.bf16.mxu1 %v7816_v51 }
 0x83d   :  { %4933 = vmatpush1.bf16.msra.mxu0 %v7817_v57  ;;  %4997 = vmatpush1.bf16.msra.mxu1 %v7818_v58 }
 0x83e   :  { %4935 = vmatprep.subr.bf16.mxu0 %v7819_v59  ;;  %4999 = vmatprep.subr.bf16.mxu1 %v7820_v63 }
 0x841   :  { %4937 = vmatpush1.bf16.msra.mxu0 %v7821_v6  ;;  %5001 = vmatpush1.bf16.msra.mxu1 %v7822_v7 }
 0x842   :  { %4939 = vmatprep.subr.bf16.mxu0 %v7823_v10  ;;  %5003 = vmatprep.subr.bf16.mxu1 %v7824_v15 }
 0x845   :  { %4941 = vmatpush1.bf16.msra.mxu0 %v7825_v22  ;;  %5005 = vmatpush1.bf16.msra.mxu1 %v7826_v24 }
 0x846   :  { %4943 = vmatprep.subr.bf16.mxu0 %v7827_v25  ;;  %5007 = vmatprep.subr.bf16.mxu1 %v7828_v29 }
 0x849   :  { %4945 = vmatpush1.bf16.msra.mxu0 %v7829_v37  ;;  %5009 = vmatpush1.bf16.msra.mxu1 %v7830_v38 }
 0x84a   :  { %4947 = vmatprep.subr.bf16.mxu0 %v7831_v40  ;;  %5011 = vmatprep.subr.bf16.mxu1 %v7832_v48 }
 0x84d   :  { %4949 = vmatpush1.bf16.msra.mxu0 %v7833_v49  ;;  %5013 = vmatpush1.bf16.msra.mxu1 %v7834_v53  ;;  %v7863_v53 = vld [vmem:[#allocation60_spill] sm:$0xff] }
 0x84e   :  { %4951 = vmatprep.subr.bf16.mxu0 %v7835_v60  ;;  %5015 = vmatprep.subr.bf16.mxu1 %v7836_v62 }
 0x851   :  { %4953 = vmatpush1.bf16.msra.mxu0 %v7837_v4  ;;  %5017 = vmatpush1.bf16.msra.mxu1 %v7838_v13 }
 0x852   :  { %4955 = vmatprep.subr.bf16.mxu0 %v7839_v16  ;;  %5019 = vmatprep.subr.bf16.mxu1 %v7840_v21 }
 0x855   :  { %4957 = vmatpush1.bf16.msra.mxu0 %v7841_v31  ;;  %5021 = vmatpush1.bf16.msra.mxu1 %v7842_v32 }
 0x856   :  { %4959 = vmatprep.subr.bf16.mxu0 %v7843_v36  ;;  %5023 = vmatprep.subr.bf16.mxu1 %v7844_v30  ;;  %v3273_v36 = vrot.slane %v7027_v18, 6 }
 0x859   :  { %4961 = vmatpush1.bf16.msra.mxu0 %v7845_v43  ;;  %5025 = vmatpush1.bf16.msra.mxu1 %v7846_v11 }
 0x85a   :  { %4963 = vmatprep.subr.bf16.mxu0 %v7847_v12  ;;  %5027 = vmatprep.subr.bf16.mxu1 %v7848_v8 }
 0x85d   :  { %4965 = vmatpush1.bf16.msra.mxu0 %v7849_v1  ;;  %5029 = vmatpush1.bf16.msra.mxu1 %v7850_v42  ;;  %v7864_v1 = vld [vmem:[#allocation4_spill] sm:$0xff] }
 0x85e   :  { %4967 = vmatprep.subr.bf16.mxu0 %v7851_v26  ;;  %5031 = vmatprep.subr.bf16.mxu1 %v7852_v54 }
 0x861   :  { %4969 = vmatpush1.bf16.msra.mxu0 %v7853_v52  ;;  %5033 = vmatpush1.bf16.msra.mxu1 %v7854_v56 }
 0x862   :  { %4971 = vmatprep.subr.bf16.mxu0 %v7855_v61  ;;  %5035 = vmatprep.subr.bf16.mxu1 %v7856_v17  ;;  %v3086_v17 = vrot.slane %v7032_v50, 6  ;;  %v3289_v50 = vld [vmem:[%s7221_s6 + $0x8] sm:$0xff] }
 0x865   :  { %4973 = vmatpush1.bf16.msra.mxu0 %v7857_v28  ;;  %5037 = vmatpush1.bf16.msra.mxu1 %v7858_v0 }
 0x8db   :  { %v2808_v44 = vpop.f32.mrb[26].mxu0  ;;  %v2879_v3 = vpop.f32.mrb[34].mxu1 }
 0x8dc   :  { %v2809_v2 = vadd.f32 %v2808_v44, %v7859_v55  ;;  %v2810_v9 = vpop.f32.mrb[27].mxu0  ;;  %v2881_v14 = vpop.f32.mrb[35].mxu1  ;;  %v2880_v47 = vadd.f32 %v2879_v3, %v7862_v46 }
 0x8dd   :  { %v2811_v23 = vadd.f32 %v2810_v9, %v7860_v19  ;;  %v2882_v39 = vadd.f32 %v2881_v14, %v7861_v35 }
 0x8de   :  { %v3439_v33 = vmul.f32 -1.442695, %v2809_v2 }
 0x8df   :  { %v3440_v34 = vmul.f32 -1.442695, %v2811_v23  ;;  %v3441_v45 = vmul.f32 -1.442695, %v2882_v39  ;;  %v3288_v39 = vld [vmem:[%s7221_s6] sm:$0xff] }
 0x8e0   :  { %5281 = vpow2.f32 %v3439_v33 }
 0x8e1   :  { %5283 = vpow2.f32 %v3440_v34  ;;  %v7865_v34 = vld [vmem:[#allocation64_spill] sm:$0xff] }
 0x8e2   :  { %5285 = vpow2.f32 %v3441_v45  ;;  %v5038_v45 = vpack.c.bf16 %v3289_v50, %v3288_v39 }
 0x8e3   :  { %5287 = vtanh.f32 %v2880_v47  ;;  %v3290_v47 = vld [vmem:[%s7221_s6 + $0x10] sm:$0xff] }
 0x8e4   :  { %5039 = vmatprep.subr.bf16.mxu0 %v5038_v45 }
 0x8ea   :  { %v5282_v51 = vpop.eup %5281 }
 0x8eb   :  { %v5284_v57 = vpop.eup %5283  ;;  %v2887_v58 = vadd.f32 1.0, %v5282_v51  ;;  %v3291_v51 = vld [vmem:[%s7221_s6 + $0x18] sm:$0xff] }
 0x8ec   :  { %v2893_v59 = vadd.f32 1.0, %v5284_v57  ;;  %v5286_v63 = vpop.eup %5285  ;;  %v5042_v57 = vpack.c.bf16 %v3291_v51, %v3290_v47 }
 0x8ed   :  { %5289 = vrcp.f32 %v2887_v58  ;;  %v5288_v6 = vpop.eup %5287  ;;  %v2900_v22 = vadd.f32 1.0, %v5286_v63  ;;  %v3292_v58 = vld [vmem:[%s7221_s6 + $0x20] sm:$0xff] }
 0x8ee   :  { %5291 = vrcp.f32 %v2893_v59  ;;  %v3293_v59 = vld [vmem:[%s7221_s6 + $0x28] sm:$0xff] }
 0x8ef   :  { %5293 = vrcp.f32 %v2900_v22  ;;  %v5046_v63 = vpack.c.bf16 %v3293_v59, %v3292_v58  ;;  %v3297_v22 = vld [vmem:[%s7221_s6 + $0x48] sm:$0xff] }
 0x8f7   :  { %v5290_v7 = vpop.eup %5289 }
 0x8f8   :  { %v5292_v10 = vpop.eup %5291  ;;  %v2904_v15 = vmul.f32 %v5290_v7, %v5288_v6  ;;  %v3294_v6 = vld [vmem:[%s7221_s6 + $0x30] sm:$0xff]  ;;  %v3295_v7 = vld [vmem:[%s7221_s6 + $0x38] sm:$0xff] }
 0x8f9   :  { %v2903_v24 = vmul.f32 %v5292_v10, %v7021_v20  ;;  %v5294_v21 = vpop.eup %5293  ;;  %v5050_v10 = vpack.c.bf16 %v3295_v7, %v3294_v6 }
 0x8fb   :  { %v7136_v25 = vadd.f32 %v2904_v15, %v2903_v24  ;;  %v2974_v29 = vpop.f32.mrb[28].mxu0  ;;  %v3045_v37 = vpop.f32.mrb[36].mxu1  ;;  %v3296_v15 = vld [vmem:[%s7221_s6 + $0x40] sm:$0xff] }
 0x8fc   :  { %v3054_v38 = vrot.slane %v2974_v29, 2  ;;  %v2976_v40 = vpop.f32.mrb[29].mxu0  ;;  %v3047_v48 = vpop.f32.mrb[37].mxu1  ;;  %v3056_v31 = vrot.slane %v3045_v37, 2  ;;  %v5054_v24 = vpack.c.bf16 %v3297_v22, %v3296_v15  ;;  %v3298_v29 = vld [vmem:[%s7221_s6 + $0x50] sm:$0xff]  ;;  %v3299_v37 = vld [vmem:[%s7221_s6 + $0x58] sm:$0xff] }
 0x8fd   :  { %v3055_v49 = vrot.slane %v2976_v40, 2  ;;  %5295 = vtanh.f32 %v7136_v25  ;;  %v3057_v16 = vrot.slane %v3047_v48, 2  ;;  %v5058_v40 = vpack.c.bf16 %v3299_v37, %v3298_v29  ;;  %v3301_v48 = vld [vmem:[%s7221_s6 + $0x68] sm:$0xff] }
 0x8fe   :  { %v3062_v60 = vadd.f32 %v3054_v38, %v7863_v53  ;;  %v3064_v11 = vadd.f32 %v3056_v31, %v7743_v41  ;;  %v3300_v38 = vld [vmem:[%s7221_s6 + $0x60] sm:$0xff]  ;;  %v3302_v53 = vld [vmem:[%s7221_s6 + $0x70] sm:$0xff] }
 0x8ff   :  { %v3063_v62 = vadd.f32 %v3055_v49, %v7741_v5  ;;  %v3065_v20 = vadd.f32 %v3057_v16, %v7678_v27  ;;  %v3285_v5 = vsel %vm3280_vm2, %v7864_v1, %v3273_v36  ;;  %v5062_v49 = vpack.c.bf16 %v3301_v48, %v3300_v38 }
 0x900   :  { %v3442_v4 = vmul.f32 -1.442695, %v3062_v60  ;;  %v3303_v60 = vld [vmem:[%s7221_s6 + $0x78] sm:$0xff] }
 0x901   :  { %v3443_v13 = vmul.f32 -1.442695, %v3063_v62  ;;  %v3444_v43 = vmul.f32 -1.442695, %v3065_v20  ;;  %v5066_v62 = vpack.c.bf16 %v3303_v60, %v3302_v53 }
 0x902   :  { %5297 = vpow2.f32 %v3442_v4 }
 0x903   :  { %5299 = vpow2.f32 %v3443_v13 }
 0x904   :  { %5301 = vpow2.f32 %v3444_v43 }
 0x905   :  { %5303 = vtanh.f32 %v3064_v11 }
 0x907   :  { %v5296_v32 = vpop.eup %5295 }
 0x908   :  { %v2907_v30 = vmul.f32 %v5296_v32, %v5294_v21 }
 0x90a   :  { %v3094_v12 = vrot.slane %v2907_v30, 2  ;;  %v3275_v8 = vrot.slane %v2907_v30, 4 }
 0x90c   :  { %v5298_v42 = vpop.eup %5297  ;;  %v3097_v26 = vrot.slane %v3094_v12, 6  ;;  %v7147_v54 = vsel %vm259_vm0, %v3285_v5, %v3275_v8 }
 0x90d   :  { %v5300_v27 = vpop.eup %5299  ;;  %v3069_v52 = vadd.f32 1.0, %v5298_v42 }
 0x90e   :  { %v3075_v56 = vadd.f32 1.0, %v5300_v27  ;;  %3164 = vmatprep.mubr.f32.mxu0 %v3097_v26  ;;  %3235 = vmatprep.mubr.f32.mxu1 %v3097_v26  ;;  %v5302_v41 = vpop.eup %5301 }
 0x90f   :  { %5305 = vrcp.f32 %v3069_v52  ;;  %v5304_v18 = vpop.eup %5303  ;;  %v3082_v44 = vadd.f32 1.0, %v5302_v41 }
 0x910   :  { %5307 = vrcp.f32 %v3075_v56 }
 0x911   :  { %5309 = vrcp.f32 %v3082_v44 }
 0x919   :  { %v5306_v61 = vpop.eup %5305 }
 0x91a   :  { %v5308_v28 = vpop.eup %5307  ;;  %v3089_v0 = vmul.f32 %v5306_v61, %v5304_v18 }
 0x91b   :  { %v3088_v3 = vmul.f32 %v5308_v28, %v3086_v17  ;;  %v5310_v9 = vpop.eup %5309  ;;  %v3448_v28 = vld [vmem:[%s7222_s7] ss:$0 sm:$0xff] }
 0x91d   :  { %v3090_v2 = vadd.f32 %v3089_v0, %v3088_v3 }
 0x91f   :  { %5311 = vtanh.f32 %v3090_v2 }
 0x929   :  { %v5312_v14 = vpop.eup %5311 }
 0x92a   :  { %v3092_v23 = vmul.f32 %v5312_v14, %v5310_v9 }
 0x92c   :  { %v3096_v33 = vrot.slane %v3092_v23, 6 }
 0x92e   :  { %3165 = vmatmul.mubr.f32.vlgmr.msra.gmra.mrb[30].mxu0 %v3096_v33  ;;  %3236 = vmatmul.mubr.f32.vlgmr.msra.gmra.mrb[38].mxu1 %v3096_v33 }
 0x92f   :  { %3499 = vmatprep.mubr.f32.mxu0 %v7865_v34  ;;  %5041 = vmatpush3.bf16.msra.mxu0 %v5038_v45 }
 0x930   :  { %5043 = vmatprep.subr.bf16.mxu0 %v5042_v57 }
 0x933   :  { %5045 = vmatpush3.bf16.msra.mxu0 %v5042_v57 }
 0x934   :  { %5047 = vmatprep.subr.bf16.mxu0 %v5046_v63 }
 0x937   :  { %5049 = vmatpush3.bf16.msra.mxu0 %v5046_v63 }
 0x938   :  { %5051 = vmatprep.subr.bf16.mxu0 %v5050_v10 }
 0x93b   :  { %5053 = vmatpush3.bf16.msra.mxu0 %v5050_v10 }
 0x93c   :  { %5055 = vmatprep.subr.bf16.mxu0 %v5054_v24 }
 0x93f   :  { %5057 = vmatpush3.bf16.msra.mxu0 %v5054_v24 }
 0x940   :  { %5059 = vmatprep.subr.bf16.mxu0 %v5058_v40 }
 0x943   :  { %5061 = vmatpush3.bf16.msra.mxu0 %v5058_v40 }
 0x944   :  { %5063 = vmatprep.subr.bf16.mxu0 %v5062_v49 }
 0x947   :  { %5065 = vmatpush3.bf16.msra.mxu0 %v5062_v49 }
 0x948   :  { %5067 = vmatprep.subr.bf16.mxu0 %v5066_v62 }
 0x94b   :  { %5069 = vmatpush3.bf16.msra.mxu0 %v5066_v62 }
 0xa01   :  { %v3166_v4 = vpop.f32.mrb[30].mxu0  ;;  %v3237_v13 = vpop.f32.mrb[38].mxu1 }
 0xa02   :  { %v3167_v16 = vadd.f32 %v3166_v4, %v7859_v55  ;;  %v3168_v20 = vpop.f32.mrb[31].mxu0  ;;  %v3239_v21 = vpop.f32.mrb[39].mxu1  ;;  %v3238_v11 = vadd.f32 %v3237_v13, %v7862_v46 }
 0xa03   :  { %v3169_v31 = vadd.f32 %v3168_v20, %v7860_v19  ;;  %v3240_v30 = vadd.f32 %v3239_v21, %v7861_v35 }
 0xa04   :  { %v3445_v32 = vmul.f32 -1.442695, %v3167_v16 }
 0xa05   :  { %v3446_v36 = vmul.f32 -1.442695, %v3169_v31  ;;  %v3447_v43 = vmul.f32 -1.442695, %v3240_v30 }
 0xa06   :  { %5313 = vpow2.f32 %v3445_v32 }
 0xa07   :  { %5315 = vpow2.f32 %v3446_v36 }
 0xa08   :  { %5317 = vpow2.f32 %v3447_v43 }
 0xa09   :  { %5319 = vtanh.f32 %v3238_v11 }
 0xa10   :  { %v5314_v12 = vpop.eup %5313 }
 0xa11   :  { %v5316_v8 = vpop.eup %5315  ;;  %v3245_v1 = vadd.f32 1.0, %v5314_v12 }
 0xa12   :  { %v3251_v5 = vadd.f32 1.0, %v5316_v8  ;;  %v5318_v55 = vpop.eup %5317 }
 0xa13   :  { %5321 = vrcp.f32 %v3245_v1  ;;  %v5320_v42 = vpop.eup %5319  ;;  %v3258_v52 = vadd.f32 1.0, %v5318_v55 }
 0xa14   :  { %5323 = vrcp.f32 %v3251_v5 }
 0xa15   :  { %5325 = vrcp.f32 %v3258_v52 }
 0xa1d   :  { %v5322_v19 = vpop.eup %5321 }
 0xa1e   :  { %v5324_v26 = vpop.eup %5323  ;;  %v3262_v27 = vmul.f32 %v5322_v19, %v5320_v42 }
 0xa1f   :  { %v3261_v56 = vmul.f32 %v5324_v26, %v7136_v25  ;;  %v5326_v46 = vpop.eup %5325 }
 0xa21   :  { %v3263_v35 = vadd.f32 %v3262_v27, %v3261_v56 }
 0xa23   :  { %5327 = vtanh.f32 %v3263_v35 }
 0xa2d   :  { %v5328_v41 = vpop.eup %5327 }
 0xa2e   :  { %v3265_v18 = vmul.f32 %v5328_v41, %v5326_v46 }
 0xa30   :  { %v3278_v61 = vrot.slane %v3265_v18, 2 }
 0xa32   :  { %v3287_v17 = vsel %vm3283_vm3, %v7147_v54, %v3278_v61 }
 0xa33   :  { %3500 = vmatmul.mubr.f32.vlgmr.msra.gmra.mrb[32].mxu0 %v3287_v17 }
 0xb06   :  { %v3501_v0 = vpop.f32.mrb[32].mxu0 }
 0xb07   :  { %v3383_v44 = vadd.f32 %v3501_v0, %v3448_v28  ;;  %v3377_v3 = vpop.f32.mrb[33].mxu0 }
 0xb08   :  { %v3378_v2 = vadd.f32 %v3448_v28, %v3377_v3 }
 0xb09   :  { %3387 = vst [vmem:[%s7223_s8 + $0x8] sm:$0xff] %v3383_v44 }
 0xb0a   :  { %3386 = vst [vmem:[%s7223_s8] sm:$0xff] %v3378_v2 }

</bundles_post_ra>
